<compile_context>
chip_gen: v5e
topology: v5e:2x2
jax: 0.10.0
libtpu: 0.0.40
codegen_flags: <defaults>
</compile_context>

<pallas_src>
import functools

import jax
import jax.numpy as jnp
from jax import lax
from jax.experimental import pallas as pl
from jax.experimental.pallas import tpu as pltpu


_BN_EPS = 1e-5

# dtype of cross-kernel intermediates (xg / pooled / vmean / z / strip inputs).  bf16 halves
# their HBM traffic on v5e/v6e/v7x (all bf16 MXU/VPU capable); kept f32 here so the 1e-3
# check against the f32 reference passes.  The tolerance in __main__ adapts if flipped.
_IO_DTYPE = jnp.float32


def _vmem_limit_bytes():
    # Generation-aware scoped-VMEM limit (v5e/v6e: 128 MiB physical, v7x: 64 MiB per TC).
    try:
        cap = int(pltpu.get_tpu_info().vmem_capacity_bytes)
    except Exception:
        cap = 64 * 1024 * 1024
    return int(min(cap * 6 // 10, 96 * 1024 * 1024))


_VMEM_LIMIT = _vmem_limit_bytes()
_BLOCK_BUDGET = max(2 * 1024 * 1024, _VMEM_LIMIT // 12)


def _round_up(n, m):
    return ((n + m - 1) // m) * m


def _pick_window_tile(n_win, row_bytes, min_grid=4, max_tile=512):
    """Windows per grid step: largest power of two inside the block budget, grid >= min_grid."""
    t = max_tile
    while t > 1 and (t * row_bytes > _BLOCK_BUDGET or n_win < min_grid * t):
        t //= 2
    return t


def _pick_strip_rows(h, w, e, batch, min_grid=8, max_rows=16):
    """Rows per FFN strip: (rows+2)*(w+2)*E f32 under budget and batch*n_strips >= min_grid."""
    th = max_rows
    while th > 1 and ((th + 2) * (w + 2) * e * 4 > _BLOCK_BUDGET
                      or batch * ((h + th - 1) // th) < min_grid
                      or th > h):
        th //= 2
    return th


# ----------------------------------------------------------------------------------------------
# Kernel 1: per-window attention combine.
#   score[w, n] = max_m ( xg[w, n] . pooled[w, m] + u . pooled[w, m] )
#   z[w, n, :]  = score[w, n] * vmean[w, :]
# (q/k 1x1 convs folded into xg = x @ (Wq^T Wk) on the host; proj(+norm1) deferred to kernel 2.)
# ----------------------------------------------------------------------------------------------
def _attn_combine_kernel(xg_ref, p_ref, vm_ref, u_ref, o_ref, *, m_tok):
    xg = xg_ref[...].astype(jnp.float32)                       # (TW, N, C)
    p = p_ref[...].astype(jnp.float32)                         # (TW, M, C)
    pu = jnp.sum(p * u_ref[...], axis=-1, keepdims=True)       # (TW, M, 1)  q-bias contribution
    score = None
    for m in range(m_tok):                                     # VPU multiply + lane reduce + max
        s = jnp.sum(xg * p[:, m:m + 1, :], axis=-1, keepdims=True) + pu[:, m:m + 1, :]
        score = s if score is None else jnp.maximum(score, s)
    z = score * vm_ref[...].astype(jnp.float32)                # (TW, N, 1) * (TW, 1, C)
    o_ref[...] = z.astype(o_ref.dtype)


def _attention_combine(xg, pooled, vmean, u):
    bw, n_tok, c = xg.shape
    m_tok = pooled.shape[1]
    itemsize = jnp.dtype(_IO_DTYPE).itemsize
    row_bytes = (2 * n_tok + m_tok + 1) * c * itemsize
    tw = _pick_window_tile(bw, row_bytes)
    bwp = _round_up(bw, tw)
    if bwp != bw:
        pad = bwp - bw
        xg = jnp.pad(xg, ((0, pad), (0, 0), (0, 0)))
        pooled = jnp.pad(pooled, ((0, pad), (0, 0), (0, 0)))
        vmean = jnp.pad(vmean, ((0, pad), (0, 0), (0, 0)))

    kernel = functools.partial(_attn_combine_kernel, m_tok=m_tok)
    out = pl.pallas_call(
        kernel,
        out_shape=jax.ShapeDtypeStruct((bwp, n_tok, c), _IO_DTYPE),
        grid_spec=pltpu.PrefetchScalarGridSpec(
            num_scalar_prefetch=0,
            grid=(bwp // tw,),
            in_specs=[
                pl.BlockSpec((tw, n_tok, c), lambda i: (i, 0, 0)),
                pl.BlockSpec((tw, m_tok, c), lambda i: (i, 0, 0)),
                pl.BlockSpec((tw, 1, c), lambda i: (i, 0, 0)),
                pl.BlockSpec((1, 1, c), lambda i: (0, 0, 0)),
            ],
            out_specs=pl.BlockSpec((tw, n_tok, c), lambda i: (i, 0, 0)),
        ),
        compiler_params=pltpu.CompilerParams(
            dimension_semantics=("parallel",),
            vmem_limit_bytes=_VMEM_LIMIT),
        cost_estimate=pl.CostEstimate(
            flops=int(2 * bwp * n_tok * m_tok * c + 2 * bwp * m_tok * c + bwp * n_tok * c),
            transcendentals=0,
            bytes_accessed=int(bwp * (2 * n_tok + m_tok + 1) * c * itemsize + c * 4)),
    )(xg.astype(_IO_DTYPE), pooled.astype(_IO_DTYPE), vmean.astype(_IO_DTYPE),
      u.reshape(1, 1, c).astype(jnp.float32))
    return out[:bw]


# ----------------------------------------------------------------------------------------------
# Kernel 2: fused  x1 = shortcut + proj(+norm1)(z);  out = x1 + MixFFN(x1)
# on row strips with a 1-row halo.  h1/h2 (E channels) never leave VMEM.
# ----------------------------------------------------------------------------------------------
def _ffn_block_kernel(sc_ref, z_ref, wpv_ref, bpv_ref, w1_ref, b1_ref, w2_ref, b2_ref, w3_ref,
                      o_ref, *, th, w_img, h_img, n_strips):
    s_idx = pl.program_id(0) % n_strips                        # strip index within its image
    wpv = wpv_ref[...]
    bpv = bpv_ref[...]
    w1 = w1_ref[...]
    b1 = b1_ref[...]
    w2 = w2_ref[...]
    b2 = b2_ref[...]
    w3 = w3_ref[...]

    # The depthwise conv zero-pads h1 (not x1): mask the 1-pixel halo ring of h1 to zero.
    col = lax.broadcasted_iota(jnp.int32, (w_img + 2, 1), 0)
    col_ok = (col >= 1) & (col <= w_img)

    x1_rows = []                                               # (W+2, C) per row, halo included
    h1_rows = []                                               # (W+2, E) per row, ring masked
    for r in range(th + 2):
        sc_r = sc_ref[0, r].astype(jnp.float32)
        z_r = z_ref[0, r].astype(jnp.float32)
        x1_r = sc_r + jnp.dot(z_r, wpv, preferred_element_type=jnp.float32) + bpv
        x1_rows.append(x1_r)
        row_g = s_idx * th + r                                 # global (1-padded) row index
        valid = (col_ok & (row_g >= 1) & (row_g <= h_img)).astype(jnp.float32)
        h1_r = (jnp.dot(x1_r, w1, preferred_element_type=jnp.float32) + b1) * valid
        h1_rows.append(h1_r)

    # 3x3 depthwise conv + BN2 + ReLU + conv3 + residual, one output row at a time.
    # (dy handled by picking neighbouring strip rows, dx by a static column slice.)
    for r in range(th):
        acc = None
        for dy in range(3):
            hrow = h1_rows[r + dy]
            for dx in range(3):
                tap = w2[dy * 3 + dx:dy * 3 + dx + 1, :]       # (1, E) folded BN2*tap
                term = hrow[dx:dx + w_img, :] * tap
                acc = term if acc is None else acc + term
        h2 = jnp.maximum(acc + b2, 0.0)                        # (W, E)
        out_r = (jnp.dot(h2, w3, preferred_element_type=jnp.float32)
                 + x1_rows[r + 1][1:1 + w_img, :])
        o_ref[0, r, :, :] = out_r.astype(o_ref.dtype)


def _build_strips(img, th, n_strips):
    """(B, H, W, C) -> (B*n_strips, th+2, W+2, C) row strips with a 1-row/col zero halo."""
    b, h, w, c = img.shape
    hp = n_strips * th
    xp = jnp.pad(img, ((0, 0), (1, 1 + hp - h), (1, 1), (0, 0)))
    strips = jnp.stack([xp[:, s * th:s * th + th + 2] for s in range(n_strips)], axis=1)
    return strips.reshape(b * n_strips, th + 2, w + 2, c)


def _ffn_fused(shortcut, z, p):
    b, h, w, c = shortcut.shape
    e = p["w1_fold"].shape[1]
    th = _pick_strip_rows(h, w, e, b)
    n_s = (h + th - 1) // th
    sc_strips = _build_strips(shortcut, th, n_s).astype(_IO_DTYPE)
    z_strips = _build_strips(z, th, n_s).astype(_IO_DTYPE)

    n_steps = b * n_s
    itemsize = jnp.dtype(_IO_DTYPE).itemsize
    flops = int(n_steps * ((th + 2) * (w + 2) * 2 * c * (c + e) + th * w * (18 * e + 2 * e * c)))
    bytes_accessed = int(2 * n_steps * (th + 2) * (w + 2) * c * itemsize
                         + n_steps * th * w * c * 4
                         + (2 * c * c + 2 * c * e + e * c + 11 * e + c) * 4)

    kernel = functools.partial(_ffn_block_kernel, th=th, w_img=w, h_img=h, n_strips=n_s)
    out = pl.pallas_call(
        kernel,
        out_shape=jax.ShapeDtypeStruct((n_steps, th, w, c), jnp.float32),
        grid_spec=pltpu.PrefetchScalarGridSpec(
            num_scalar_prefetch=0,
            grid=(n_steps,),
            in_specs=[
                pl.BlockSpec((1, th + 2, w + 2, c), lambda i: (i, 0, 0, 0)),
                pl.BlockSpec((1, th + 2, w + 2, c), lambda i: (i, 0, 0, 0)),
                pl.BlockSpec((c, c), lambda i: (0, 0)),
                pl.BlockSpec((1, c), lambda i: (0, 0)),
                pl.BlockSpec((c, e), lambda i: (0, 0)),
                pl.BlockSpec((1, e), lambda i: (0, 0)),
                pl.BlockSpec((9, e), lambda i: (0, 0)),
                pl.BlockSpec((1, e), lambda i: (0, 0)),
                pl.BlockSpec((e, c), lambda i: (0, 0)),
            ],
            out_specs=pl.BlockSpec((1, th, w, c), lambda i: (i, 0, 0, 0)),
        ),
        compiler_params=pltpu.CompilerParams(
            dimension_semantics=("parallel",),
            vmem_limit_bytes=_VMEM_LIMIT),
        cost_estimate=pl.CostEstimate(flops=flops, transcendentals=0,
                                      bytes_accessed=bytes_accessed),
    )(sc_strips, z_strips,
      p["wpv"].astype(jnp.float32), p["bpv"].reshape(1, c).astype(jnp.float32),
      p["w1_fold"].astype(jnp.float32), p["b1_fold"].reshape(1, e).astype(jnp.float32),
      p["w2_fold"].astype(jnp.float32), p["b2_fold"].reshape(1, e).astype(jnp.float32),
      p["w3"].astype(jnp.float32))
    return out.reshape(b, n_s * th, w, c)[:, :h]


# ----------------------------------------------------------------------------------------------
# NHWC window helpers (host-side layout glue on the small C-channel tensor).
# ----------------------------------------------------------------------------------------------
def _window_partition_nhwc(x, k):
    b, hp, wp, c = x.shape
    x = x.reshape(b, hp // k, k, wp // k, k, c).transpose(0, 1, 3, 2, 4, 5)
    return x.reshape(b * (hp // k) * (wp // k), k, k, c)


def _window_reverse_nhwc(wins, k, b, hp, wp):
    c = wins.shape[-1]
    x = wins.reshape(b, hp // k, wp // k, k, k, c).transpose(0, 1, 3, 2, 4, 5)
    return x.reshape(b, hp, wp, c)


# ----------------------------------------------------------------------------------------------
# SwinTransformerBlockL / SwinTransformerLayerL forward (inference, NHWC internally).
# ----------------------------------------------------------------------------------------------
def _swin_block_nhwc(x, resolution, p, window_size, shift_size):
    h, w = resolution
    b, _, _, c = x.shape
    k = window_size
    assert k >= 2, "window_size must be >= 2 (2x2 max-pool needs at least one pooled token)"
    assert k * k <= h * w, "window too big for resolution"

    shortcut = x
    pad_b = (k - h % k) % k
    pad_r = (k - w % k) % k
    xp = jnp.pad(x, ((0, 0), (0, pad_b), (0, pad_r), (0, 0))) if (pad_b or pad_r) else x
    hp, wp = h + pad_b, w + pad_r
    xs = jnp.roll(xp, (-shift_size, -shift_size), axis=(1, 2)) if shift_size > 0 else xp
    # NOTE: the PyTorch attn_mask is computed but never used by WindowAttentionL.forward.

    # Host prep (fused by XLA, all C-channel): window partition, per-window 2x2 max-pool and
    # spatial mean, and the folded q.k metric  xg = x @ (Wq^T Wk).
    x_win = _window_partition_nhwc(xs, k)                           # (Bw, K, K, C)
    bw = x_win.shape[0]
    n_tok = k * k
    kc = (k // 2) * 2                                               # torch max_pool2d floor mode
    m_tok = (k // 2) ** 2
    pooled = x_win[:, :kc, :kc, :].reshape(bw, k // 2, 2, k // 2, 2, c).max(axis=(2, 4))
    pooled = pooled.reshape(bw, m_tok, c)
    x_tok = x_win.reshape(bw, n_tok, c)
    vmean = jnp.mean(x_tok, axis=1, keepdims=True)                  # (Bw, 1, C)
    xg = jnp.dot(x_tok.reshape(bw * n_tok, c), p["g"]).reshape(bw, n_tok, c)

    # Pallas kernel 1: scores (VPU) + running max + z = score * window-mean.
    z_win = _attention_combine(xg, pooled, vmean, p["u"])           # (Bw, N, C)

    z = _window_reverse_nhwc(z_win.reshape(bw, k, k, c), k, b, hp, wp)
    if shift_size > 0:
        z = jnp.roll(z, (shift_size, shift_size), axis=(1, 2))
    if pad_b or pad_r:
        z = z[:, :h, :w, :]

    # Pallas kernel 2: x1 = shortcut + proj(+norm1)(z);  out = x1 + MixFFN(x1)  (fully fused).
    return _ffn_fused(shortcut, z, p)


def swin_transformer_layer_l(x_nchw, resolution, block_params, window_size):
    """Forward of SwinTransformerLayerL (downsample=None): returns (x, res, x_down, res_down)."""
    x = jnp.transpose(x_nchw, (0, 2, 3, 1))            # NCHW -> NHWC once for the whole stage
    for i, p in enumerate(block_params):
        shift = 0 if i % 2 == 0 else window_size // 2
        x = _swin_block_nhwc(x, resolution, p, window_size, shift)
    x_out = jnp.transpose(x, (0, 3, 1, 2))             # back to NCHW once (module contract)
    return x_out, resolution, x_out, resolution


# ----------------------------------------------------------------------------------------------
# Parameter construction (torch-layout weights) and inference-mode BN / conv folding.
# ----------------------------------------------------------------------------------------------
def _init_block_raw(key, c, e):
    ks = jax.random.split(key, 20)
    u = lambda i, shape, s=0.2: jax.random.normal(ks[i], shape, jnp.float32) * s
    return dict(
        q_w=u(0, (c, c)), q_b=u(1, (c,)),
        k_w=u(2, (c, c)),
        proj_w=u(3, (c, c)), proj_b=u(4, (c,)),
        n1_g=1.0 + u(5, (c,), 0.1), n1_b=u(6, (c,), 0.1),
        n1_m=u(7, (c,), 0.1), n1_v=jax.random.uniform(ks[8], (c,), jnp.float32, 0.5, 1.5),
        c1_w=u(9, (e, c)),
        bn1_g=1.0 + u(10, (e,), 0.1), bn1_b=u(11, (e,), 0.1),
        bn1_m=u(12, (e,), 0.1), bn1_v=jax.random.uniform(ks[13], (e,), jnp.float32, 0.5, 1.5),
        c2_w=u(14, (e, 1, 3, 3)),
        bn2_g=1.0 + u(15, (e,), 0.1), bn2_b=u(16, (e,), 0.1),
        bn2_m=u(17, (e,), 0.1), bn2_v=jax.random.uniform(ks[18], (e,), jnp.float32, 0.5, 1.5),
        c3_w=u(19, (c, e)),
    )


def _fold_block_params(r, eps=_BN_EPS):
    e = r["c1_w"].shape[0]
    s1 = r["n1_g"] / jnp.sqrt(r["n1_v"] + eps)            # norm1 folded into proj
    sb1 = r["bn1_g"] / jnp.sqrt(r["bn1_v"] + eps)         # bn1 folded into conv1
    sb2 = r["bn2_g"] / jnp.sqrt(r["bn2_v"] + eps)         # bn2 folded into depthwise conv2
    return dict(
        g=r["q_w"].T @ r["k_w"],                          # q/k 1x1 convs folded: x.(Wq^T Wk).p
        u=r["q_b"] @ r["k_w"],                            # q-bias contribution to the score
        wpv=r["proj_w"].T * s1[None, :],
        bpv=s1 * (r["proj_b"] - r["n1_m"]) + r["n1_b"],
        w1_fold=r["c1_w"].T * sb1[None, :],
        b1_fold=r["bn1_b"] - sb1 * r["bn1_m"],
        w2_fold=(r["c2_w"][:, 0].transpose(1, 2, 0) * sb2[None, None, :]).reshape(9, e),
        b2_fold=r["bn2_b"] - sb2 * r["bn2_m"],
        w3=r["c3_w"].T,
    )


# ----------------------------------------------------------------------------------------------
# Pure-JAX reference (mirrors the PyTorch module op-for-op, NCHW).
# ----------------------------------------------------------------------------------------------
def _bn_nchw(x, g, b, m, v, eps=_BN_EPS):
    inv = 1.0 / jnp.sqrt(v + eps)
    return (x - m[None, :, None, None]) * inv[None, :, None, None] * g[None, :, None, None] \
        + b[None, :, None, None]


def _conv1x1_nchw(x, w, b=None):
    y = jnp.einsum('bchw,oc->bohw', x, w)
    if b is not None:
        y = y + b[None, :, None, None]
    return y


def _reference_block_nchw(x, resolution, r, k, shift, eps=_BN_EPS):
    h, w = resolution
    bsz, c = x.shape[0], x.shape[1]
    e = r["c1_w"].shape[0]
    shortcut = x
    pad_b = (k - h % k) % k
    pad_r = (k - w % k) % k
    xp = jnp.pad(x, ((0, 0), (0, 0), (0, pad_b), (0, pad_r)))
    hp, wp = h + pad_b, w + pad_r
    xs = jnp.roll(xp, (-shift, -shift), axis=(2, 3)) if shift > 0 else xp
    xw = xs.reshape(bsz, c, hp // k, k, wp // k, k).transpose(0, 2, 4, 1, 3, 5).reshape(-1, c, k, k)
    # WindowAttentionL.forward
    q = _conv1x1_nchw(xw, r["q_w"], r["q_b"]).reshape(-1, c, k * k).transpose(0, 2, 1)
    kpool = lax.reduce_window(xw, -jnp.inf, lax.max, (1, 1, 2, 2), (1, 1, 2, 2), 'VALID')
    kk = _conv1x1_nchw(kpool, r["k_w"]).reshape(-1, c, (k // 2) ** 2)
    qk = q @ kk
    qk = jnp.max(qk, axis=2, keepdims=True)
    v = jnp.mean(xw, axis=(2, 3)).reshape(-1, 1, c)
    out = (qk @ v).transpose(0, 2, 1).reshape(-1, c, k, k)
    out = _conv1x1_nchw(out, r["proj_w"], r["proj_b"])
    # window reverse, un-shift, crop
    sx = out.reshape(bsz, hp // k, wp // k, c, k, k).transpose(0, 3, 1, 4, 2, 5).reshape(bsz, c, hp, wp)
    x2 = jnp.roll(sx, (shift, shift), axis=(2, 3)) if shift > 0 else sx
    x2 = x2[:, :, :h, :w]
    x3 = shortcut + _bn_nchw(x2, r["n1_g"], r["n1_b"], r["n1_m"], r["n1_v"], eps)
    # MixFFN
    h1 = _bn_nchw(_conv1x1_nchw(x3, r["c1_w"]), r["bn1_g"], r["bn1_b"], r["bn1_m"], r["bn1_v"], eps)
    h2 = lax.conv_general_dilated(h1, r["c2_w"], (1, 1), ((1, 1), (1, 1)),
                                  dimension_numbers=('NCHW', 'OIHW', 'NCHW'),
                                  feature_group_count=e)
    h2 = jnp.maximum(_bn_nchw(h2, r["bn2_g"], r["bn2_b"], r["bn2_m"], r["bn2_v"], eps), 0.0)
    h3 = _conv1x1_nchw(h2, r["c3_w"])
    return x3 + h3


def _reference_layer(x, resolution, raw_blocks, k):
    for i, r in enumerate(raw_blocks):
        x = _reference_block_nchw(x, resolution, r, k, 0 if i % 2 == 0 else k // 2)
    return x, resolution, x, resolution


if __name__ == "__main__":
    key = jax.random.PRNGKey(0)
    B, dim, H, W = 2, 4, 16, 16
    window_size, depth, mlp_ratio = 4, 2, 4.0
    E = int(dim * mlp_ratio)

    kx, kparams = jax.random.split(key)
    x = jax.random.normal(kx, (B, dim, H, W), dtype=jnp.float32)

    raw_blocks = [_init_block_raw(bk, dim, E) for bk in jax.random.split(kparams, depth)]
    folded_blocks = [_fold_block_params(r) for r in raw_blocks]

    layer_fn = jax.jit(
        functools.partial(swin_transformer_layer_l, window_size=window_size),
        static_argnums=(1,))
    y, res, y_down, res_down = layer_fn(x, (H, W), folded_blocks)
    y = jax.block_until_ready(y)

    y_ref, res_ref, y_down_ref, _ = _reference_layer(x, (H, W), raw_blocks, window_size)
    assert y.shape == y_ref.shape == (B, dim, H, W), (y.shape, y_ref.shape)
    assert int(res[0]) == H and int(res[1]) == W

    tol = 1e-3 if jnp.dtype(_IO_DTYPE) == jnp.dtype(jnp.float32) else 3e-2
    err = float(jnp.max(jnp.abs(y - y_ref)))
    assert jnp.allclose(y, y_ref, atol=tol, rtol=tol), err
    err_d = float(jnp.max(jnp.abs(y_down - y_down_ref)))
    assert jnp.allclose(y_down, y_down_ref, atol=tol, rtol=tol), err_d

    print("KERNEL_OK")
</pallas_src>

<mosaic_0001>
module attributes {stable_mosaic.version = 11 : i64} {
  func.func @_attn_combine_kernel(%arg0: i32, %arg1: memref<8x16x4xf32, #tpu.memory_space<vmem>>, %arg2: memref<8x4x4xf32, #tpu.memory_space<vmem>>, %arg3: memref<8x1x4xf32, #tpu.memory_space<vmem>>, %arg4: memref<1x1x4xf32, #tpu.memory_space<vmem>>, %arg5: memref<8x16x4xf32, #tpu.memory_space<vmem>>) attributes {dimension_semantics = [#tpu.dimension_semantics<parallel>], iteration_bounds = array<i64: 4>, scalar_prefetch = 0 : i64, scratch_operands = 0 : i64, tpu.core_type = #tpu.core_type<tc>, window_params = [{transform_indices = @transform_0, window_bounds = array<i64: 8, 16, 4>}, {transform_indices = @transform_1, window_bounds = array<i64: 8, 4, 4>}, {transform_indices = @transform_2, window_bounds = array<i64: 8, 1, 4>}, {pipeline_mode = #tpu.pipeline_mode<synchronous>, transform_indices = @transform_3, window_bounds = array<i64: 1, 1, 4>}, {transform_indices = @transform_4, window_bounds = array<i64: 8, 16, 4>}]} {
    %c0 = arith.constant 0 : index
    %c0_0 = arith.constant 0 : index
    %c0_1 = arith.constant 0 : index
    %0 = vector.load %arg1[%c0, %c0_0, %c0_1] : memref<8x16x4xf32, #tpu.memory_space<vmem>>, vector<8x16x4xf32>
    %c0_2 = arith.constant 0 : index
    %c0_3 = arith.constant 0 : index
    %c0_4 = arith.constant 0 : index
    %1 = vector.load %arg2[%c0_2, %c0_3, %c0_4] : memref<8x4x4xf32, #tpu.memory_space<vmem>>, vector<8x4x4xf32>
    %c0_5 = arith.constant 0 : index
    %c0_6 = arith.constant 0 : index
    %c0_7 = arith.constant 0 : index
    %2 = vector.load %arg4[%c0_5, %c0_6, %c0_7] : memref<1x1x4xf32, #tpu.memory_space<vmem>>, vector<1x1x4xf32>
    %3 = vector.broadcast %2 : vector<1x1x4xf32> to vector<8x4x4xf32>
    %4 = arith.mulf %1, %3 : vector<8x4x4xf32>
    %cst = arith.constant dense<0.000000e+00> : vector<8x4xf32>
    %5 = vector.multi_reduction <add>, %4, %cst [2] : vector<8x4x4xf32> to vector<8x4xf32>
    %6 = vector.shape_cast %5 : vector<8x4xf32> to vector<8x4x1xf32>
    %7 = vector.extract_strided_slice %1 {offsets = [0, 0, 0], sizes = [8, 1, 4], strides = [1, 1, 1]} : vector<8x4x4xf32> to vector<8x1x4xf32>
    %8 = vector.broadcast %7 : vector<8x1x4xf32> to vector<8x16x4xf32>
    %9 = arith.mulf %0, %8 : vector<8x16x4xf32>
    %cst_8 = arith.constant dense<0.000000e+00> : vector<8x16xf32>
    %10 = vector.multi_reduction <add>, %9, %cst_8 [2] : vector<8x16x4xf32> to vector<8x16xf32>
    %11 = vector.shape_cast %10 : vector<8x16xf32> to vector<8x16x1xf32>
    %12 = vector.extract_strided_slice %6 {offsets = [0, 0, 0], sizes = [8, 1, 1], strides = [1, 1, 1]} : vector<8x4x1xf32> to vector<8x1x1xf32>
    %13 = vector.broadcast %12 : vector<8x1x1xf32> to vector<8x16x1xf32>
    %14 = arith.addf %11, %13 : vector<8x16x1xf32>
    %15 = vector.extract_strided_slice %1 {offsets = [0, 1, 0], sizes = [8, 1, 4], strides = [1, 1, 1]} : vector<8x4x4xf32> to vector<8x1x4xf32>
    %16 = vector.broadcast %15 : vector<8x1x4xf32> to vector<8x16x4xf32>
    %17 = arith.mulf %0, %16 : vector<8x16x4xf32>
    %cst_9 = arith.constant dense<0.000000e+00> : vector<8x16xf32>
    %18 = vector.multi_reduction <add>, %17, %cst_9 [2] : vector<8x16x4xf32> to vector<8x16xf32>
    %19 = vector.shape_cast %18 : vector<8x16xf32> to vector<8x16x1xf32>
    %20 = vector.extract_strided_slice %6 {offsets = [0, 1, 0], sizes = [8, 1, 1], strides = [1, 1, 1]} : vector<8x4x1xf32> to vector<8x1x1xf32>
    %21 = vector.broadcast %20 : vector<8x1x1xf32> to vector<8x16x1xf32>
    %22 = arith.addf %19, %21 : vector<8x16x1xf32>
    %23 = arith.maximumf %14, %22 : vector<8x16x1xf32>
    %24 = vector.extract_strided_slice %1 {offsets = [0, 2, 0], sizes = [8, 1, 4], strides = [1, 1, 1]} : vector<8x4x4xf32> to vector<8x1x4xf32>
    %25 = vector.broadcast %24 : vector<8x1x4xf32> to vector<8x16x4xf32>
    %26 = arith.mulf %0, %25 : vector<8x16x4xf32>
    %cst_10 = arith.constant dense<0.000000e+00> : vector<8x16xf32>
    %27 = vector.multi_reduction <add>, %26, %cst_10 [2] : vector<8x16x4xf32> to vector<8x16xf32>
    %28 = vector.shape_cast %27 : vector<8x16xf32> to vector<8x16x1xf32>
    %29 = vector.extract_strided_slice %6 {offsets = [0, 2, 0], sizes = [8, 1, 1], strides = [1, 1, 1]} : vector<8x4x1xf32> to vector<8x1x1xf32>
    %30 = vector.broadcast %29 : vector<8x1x1xf32> to vector<8x16x1xf32>
    %31 = arith.addf %28, %30 : vector<8x16x1xf32>
    %32 = arith.maximumf %23, %31 : vector<8x16x1xf32>
    %33 = vector.extract_strided_slice %1 {offsets = [0, 3, 0], sizes = [8, 1, 4], strides = [1, 1, 1]} : vector<8x4x4xf32> to vector<8x1x4xf32>
    %34 = vector.broadcast %33 : vector<8x1x4xf32> to vector<8x16x4xf32>
    %35 = arith.mulf %0, %34 : vector<8x16x4xf32>
    %cst_11 = arith.constant dense<0.000000e+00> : vector<8x16xf32>
    %36 = vector.multi_reduction <add>, %35, %cst_11 [2] : vector<8x16x4xf32> to vector<8x16xf32>
    %37 = vector.shape_cast %36 : vector<8x16xf32> to vector<8x16x1xf32>
    %38 = vector.extract_strided_slice %6 {offsets = [0, 3, 0], sizes = [8, 1, 1], strides = [1, 1, 1]} : vector<8x4x1xf32> to vector<8x1x1xf32>
    %39 = vector.broadcast %38 : vector<8x1x1xf32> to vector<8x16x1xf32>
    %40 = arith.addf %37, %39 : vector<8x16x1xf32>
    %41 = arith.maximumf %32, %40 : vector<8x16x1xf32>
    %c0_12 = arith.constant 0 : index
    %c0_13 = arith.constant 0 : index
    %c0_14 = arith.constant 0 : index
    %42 = vector.load %arg3[%c0_12, %c0_13, %c0_14] : memref<8x1x4xf32, #tpu.memory_space<vmem>>, vector<8x1x4xf32>
    %43 = vector.broadcast %41 : vector<8x16x1xf32> to vector<8x16x4xf32>
    %44 = vector.broadcast %42 : vector<8x1x4xf32> to vector<8x16x4xf32>
    %45 = arith.mulf %43, %44 : vector<8x16x4xf32>
    %c0_15 = arith.constant 0 : index
    %c0_16 = arith.constant 0 : index
    %c0_17 = arith.constant 0 : index
    %46 = vector.load %arg5[%c0_15, %c0_16, %c0_17] : memref<8x16x4xf32, #tpu.memory_space<vmem>>, vector<8x16x4xf32>
    tpu.vector_store %arg5[%c0_15, %c0_16, %c0_17], %45 {strides = array<i32>} : memref<8x16x4xf32, #tpu.memory_space<vmem>>, vector<8x16x4xf32>,
    return
  }
  func.func @transform_0(%arg0: i32) -> (i32, i32, i32) {
    %c0_i32 = arith.constant 0 : i32
    %c0_i32_0 = arith.constant 0 : i32
    %c0_i32_1 = arith.constant 0 : i32
    return %arg0, %c0_i32, %c0_i32_0 : i32, i32, i32
  }
  func.func @transform_1(%arg0: i32) -> (i32, i32, i32) {
    %c0_i32 = arith.constant 0 : i32
    %c0_i32_0 = arith.constant 0 : i32
    %c0_i32_1 = arith.constant 0 : i32
    return %arg0, %c0_i32, %c0_i32_0 : i32, i32, i32
  }
  func.func @transform_2(%arg0: i32) -> (i32, i32, i32) {
    %c0_i32 = arith.constant 0 : i32
    %c0_i32_0 = arith.constant 0 : i32
    %c0_i32_1 = arith.constant 0 : i32
    return %arg0, %c0_i32, %c0_i32_0 : i32, i32, i32
  }
  func.func @transform_3(%arg0: i32) -> (i32, i32, i32) {
    %c0_i32 = arith.constant 0 : i32
    %c0_i32_0 = arith.constant 0 : i32
    %c0_i32_1 = arith.constant 0 : i32
    %c0_i32_2 = arith.constant 0 : i32
    return %c0_i32, %c0_i32_0, %c0_i32_1 : i32, i32, i32
  }
  func.func @transform_4(%arg0: i32) -> (i32, i32, i32) {
    %c0_i32 = arith.constant 0 : i32
    %c0_i32_0 = arith.constant 0 : i32
    %c0_i32_1 = arith.constant 0 : i32
    return %arg0, %c0_i32, %c0_i32_0 : i32, i32, i32
  }
}

module attributes {stable_mosaic.version = 11 : i64} {
  func.func @_ffn_block_kernel(%arg0: i32, %arg1: memref<1x6x18x4xf32, #tpu.memory_space<vmem>>, %arg2: memref<1x6x18x4xf32, #tpu.memory_space<vmem>>, %arg3: memref<4x4xf32, #tpu.memory_space<vmem>>, %arg4: memref<1x4xf32, #tpu.memory_space<vmem>>, %arg5: memref<4x16xf32, #tpu.memory_space<vmem>>, %arg6: memref<1x16xf32, #tpu.memory_space<vmem>>, %arg7: memref<9x16xf32, #tpu.memory_space<vmem>>, %arg8: memref<1x16xf32, #tpu.memory_space<vmem>>, %arg9: memref<16x4xf32, #tpu.memory_space<vmem>>, %arg10: memref<1x4x16x4xf32, #tpu.memory_space<vmem>>) attributes {dimension_semantics = [#tpu.dimension_semantics<parallel>], iteration_bounds = array<i64: 8>, scalar_prefetch = 0 : i64, scratch_operands = 0 : i64, tpu.core_type = #tpu.core_type<tc>, window_params = [{transform_indices = @transform_0, window_bounds = array<i64: 1, 6, 18, 4>}, {transform_indices = @transform_1, window_bounds = array<i64: 1, 6, 18, 4>}, {pipeline_mode = #tpu.pipeline_mode<synchronous>, transform_indices = @transform_2, window_bounds = array<i64: 4, 4>}, {pipeline_mode = #tpu.pipeline_mode<synchronous>, transform_indices = @transform_3, window_bounds = array<i64: 1, 4>}, {pipeline_mode = #tpu.pipeline_mode<synchronous>, transform_indices = @transform_4, window_bounds = array<i64: 4, 16>}, {pipeline_mode = #tpu.pipeline_mode<synchronous>, transform_indices = @transform_5, window_bounds = array<i64: 1, 16>}, {pipeline_mode = #tpu.pipeline_mode<synchronous>, transform_indices = @transform_6, window_bounds = array<i64: 9, 16>}, {pipeline_mode = #tpu.pipeline_mode<synchronous>, transform_indices = @transform_7, window_bounds = array<i64: 1, 16>}, {pipeline_mode = #tpu.pipeline_mode<synchronous>, transform_indices = @transform_8, window_bounds = array<i64: 16, 4>}, {transform_indices = @transform_9, window_bounds = array<i64: 1, 4, 16, 4>}]} {
    %c4_i32 = arith.constant 4 : i32
    %c0_i32 = arith.constant 0 : i32
    %0 = arith.cmpi eq, %c4_i32, %c0_i32 : i32
    %c1_i32 = arith.constant 1 : i32
    %1 = arith.select %0, %c1_i32, %c4_i32 : i32
    %2 = arith.remsi %arg0, %1 : i32
    %c0_i32_0 = arith.constant 0 : i32
    %3 = arith.cmpi ne, %2, %c0_i32_0 : i32
    %c0_i32_1 = arith.constant 0 : i32
    %4 = arith.cmpi slt, %2, %c0_i32_1 : i32
    %c0_i32_2 = arith.constant 0 : i32
    %5 = arith.cmpi slt, %1, %c0_i32_2 : i32
    %6 = arith.xori %4, %5 : i1
    %7 = arith.andi %6, %3 : i1
    %8 = arith.addi %2, %1 : i32
    %9 = arith.select %7, %8, %2 : i32
    %c0 = arith.constant 0 : index
    %c0_3 = arith.constant 0 : index
    %10 = vector.load %arg3[%c0, %c0_3] : memref<4x4xf32, #tpu.memory_space<vmem>>, vector<4x4xf32>
    %c0_4 = arith.constant 0 : index
    %c0_5 = arith.constant 0 : index
    %11 = vector.load %arg4[%c0_4, %c0_5] : memref<1x4xf32, #tpu.memory_space<vmem>>, vector<1x4xf32>
    %c0_6 = arith.constant 0 : index
    %c0_7 = arith.constant 0 : index
    %12 = vector.load %arg5[%c0_6, %c0_7] : memref<4x16xf32, #tpu.memory_space<vmem>>, vector<4x16xf32>
    %c0_8 = arith.constant 0 : index
    %c0_9 = arith.constant 0 : index
    %13 = vector.load %arg6[%c0_8, %c0_9] : memref<1x16xf32, #tpu.memory_space<vmem>>, vector<1x16xf32>
    %c0_10 = arith.constant 0 : index
    %c0_11 = arith.constant 0 : index
    %14 = vector.load %arg7[%c0_10, %c0_11] : memref<9x16xf32, #tpu.memory_space<vmem>>, vector<9x16xf32>
    %c0_12 = arith.constant 0 : index
    %c0_13 = arith.constant 0 : index
    %15 = vector.load %arg8[%c0_12, %c0_13] : memref<1x16xf32, #tpu.memory_space<vmem>>, vector<1x16xf32>
    %c0_14 = arith.constant 0 : index
    %c0_15 = arith.constant 0 : index
    %16 = vector.load %arg9[%c0_14, %c0_15] : memref<16x4xf32, #tpu.memory_space<vmem>>, vector<16x4xf32>
    %17 = tpu.iota {dimensions = array<i32: 0>} : vector<18x1xi32>
    %c1_i32_16 = arith.constant 1 : i32
    %18 = vector.broadcast %c1_i32_16 : i32 to vector<18x1xi32>
    %19 = arith.cmpi sge, %17, %18 : vector<18x1xi32>
    %c16_i32 = arith.constant 16 : i32
    %20 = vector.broadcast %c16_i32 : i32 to vector<18x1xi32>
    %21 = arith.cmpi sle, %17, %20 : vector<18x1xi32>
    %22 = arith.andi %19, %21 : vector<18x1xi1>
    %c0_17 = arith.constant 0 : index
    %c0_18 = arith.constant 0 : index
    %c0_19 = arith.constant 0 : index
    %c0_20 = arith.constant 0 : index
    %23 = vector.load %arg1[%c0_17, %c0_18, %c0_19, %c0_20] : memref<1x6x18x4xf32, #tpu.memory_space<vmem>>, vector<1x1x18x4xf32>
    %24 = vector.shape_cast %23 : vector<1x1x18x4xf32> to vector<18x4xf32>
    %c0_21 = arith.constant 0 : index
    %c0_22 = arith.constant 0 : index
    %c0_23 = arith.constant 0 : index
    %c0_24 = arith.constant 0 : index
    %25 = vector.load %arg2[%c0_21, %c0_22, %c0_23, %c0_24] : memref<1x6x18x4xf32, #tpu.memory_space<vmem>>, vector<1x1x18x4xf32>
    %26 = vector.shape_cast %25 : vector<1x1x18x4xf32> to vector<18x4xf32>
    %cst = arith.constant dense<0.000000e+00> : vector<18x4xf32>
    %27 = tpu.matmul %26, %10, %cst {dimension_numbers = #tpu.dot_dimension_numbers<[1], [0], [0], [1], [0, 0, 1, 1], [], []>} : vector<18x4xf32>, vector<4x4xf32>, vector<18x4xf32> -> vector<18x4xf32>
    %28 = arith.addf %24, %27 : vector<18x4xf32>
    %29 = vector.broadcast %11 : vector<1x4xf32> to vector<18x4xf32>
    %30 = arith.addf %28, %29 : vector<18x4xf32>
    %c4_i32_25 = arith.constant 4 : i32
    %31 = arith.muli %9, %c4_i32_25 : i32
    %c0_i32_26 = arith.constant 0 : i32
    %32 = arith.addi %31, %c0_i32_26 : i32
    %c1_i32_27 = arith.constant 1 : i32
    %33 = arith.cmpi sge, %32, %c1_i32_27 : i32
    %34 = vector.broadcast %33 : i1 to vector<18x1xi1>
    %35 = arith.andi %22, %34 : vector<18x1xi1>
    %c16_i32_28 = arith.constant 16 : i32
    %36 = arith.cmpi sle, %32, %c16_i32_28 : i32
    %37 = vector.broadcast %36 : i1 to vector<18x1xi1>
    %38 = arith.andi %35, %37 : vector<18x1xi1>
    %39 = arith.extui %38 : vector<18x1xi1> to vector<18x1xi32>
    %40 = arith.sitofp %39 : vector<18x1xi32> to vector<18x1xf32>
    %cst_29 = arith.constant dense<0.000000e+00> : vector<18x16xf32>
    %41 = tpu.matmul %30, %12, %cst_29 {dimension_numbers = #tpu.dot_dimension_numbers<[1], [0], [0], [1], [0, 0, 1, 1], [], []>} : vector<18x4xf32>, vector<4x16xf32>, vector<18x16xf32> -> vector<18x16xf32>
    %42 = vector.broadcast %13 : vector<1x16xf32> to vector<18x16xf32>
    %43 = arith.addf %41, %42 : vector<18x16xf32>
    %44 = vector.broadcast %40 : vector<18x1xf32> to vector<18x16xf32>
    %45 = arith.mulf %43, %44 : vector<18x16xf32>
    %c0_30 = arith.constant 0 : index
    %c1 = arith.constant 1 : index
    %c0_31 = arith.constant 0 : index
    %c0_32 = arith.constant 0 : index
    %46 = vector.load %arg1[%c0_30, %c1, %c0_31, %c0_32] : memref<1x6x18x4xf32, #tpu.memory_space<vmem>>, vector<1x1x18x4xf32>
    %47 = vector.shape_cast %46 : vector<1x1x18x4xf32> to vector<18x4xf32>
    %c0_33 = arith.constant 0 : index
    %c1_34 = arith.constant 1 : index
    %c0_35 = arith.constant 0 : index
    %c0_36 = arith.constant 0 : index
    %48 = vector.load %arg2[%c0_33, %c1_34, %c0_35, %c0_36] : memref<1x6x18x4xf32, #tpu.memory_space<vmem>>, vector<1x1x18x4xf32>
    %49 = vector.shape_cast %48 : vector<1x1x18x4xf32> to vector<18x4xf32>
    %cst_37 = arith.constant dense<0.000000e+00> : vector<18x4xf32>
    %50 = tpu.matmul %49, %10, %cst_37 {dimension_numbers = #tpu.dot_dimension_numbers<[1], [0], [0], [1], [0, 0, 1, 1], [], []>} : vector<18x4xf32>, vector<4x4xf32>, vector<18x4xf32> -> vector<18x4xf32>
    %51 = arith.addf %47, %50 : vector<18x4xf32>
    %52 = vector.broadcast %11 : vector<1x4xf32> to vector<18x4xf32>
    %53 = arith.addf %51, %52 : vector<18x4xf32>
    %c4_i32_38 = arith.constant 4 : i32
    %54 = arith.muli %9, %c4_i32_38 : i32
    %c1_i32_39 = arith.constant 1 : i32
    %55 = arith.addi %54, %c1_i32_39 : i32
    %c1_i32_40 = arith.constant 1 : i32
    %56 = arith.cmpi sge, %55, %c1_i32_40 : i32
    %57 = vector.broadcast %56 : i1 to vector<18x1xi1>
    %58 = arith.andi %22, %57 : vector<18x1xi1>
    %c16_i32_41 = arith.constant 16 : i32
    %59 = arith.cmpi sle, %55, %c16_i32_41 : i32
    %60 = vector.broadcast %59 : i1 to vector<18x1xi1>
    %61 = arith.andi %58, %60 : vector<18x1xi1>
    %62 = arith.extui %61 : vector<18x1xi1> to vector<18x1xi32>
    %63 = arith.sitofp %62 : vector<18x1xi32> to vector<18x1xf32>
    %cst_42 = arith.constant dense<0.000000e+00> : vector<18x16xf32>
    %64 = tpu.matmul %53, %12, %cst_42 {dimension_numbers = #tpu.dot_dimension_numbers<[1], [0], [0], [1], [0, 0, 1, 1], [], []>} : vector<18x4xf32>, vector<4x16xf32>, vector<18x16xf32> -> vector<18x16xf32>
    %65 = vector.broadcast %13 : vector<1x16xf32> to vector<18x16xf32>
    %66 = arith.addf %64, %65 : vector<18x16xf32>
    %67 = vector.broadcast %63 : vector<18x1xf32> to vector<18x16xf32>
    %68 = arith.mulf %66, %67 : vector<18x16xf32>
    %c0_43 = arith.constant 0 : index
    %c2 = arith.constant 2 : index
    %c0_44 = arith.constant 0 : index
    %c0_45 = arith.constant 0 : index
    %69 = vector.load %arg1[%c0_43, %c2, %c0_44, %c0_45] : memref<1x6x18x4xf32, #tpu.memory_space<vmem>>, vector<1x1x18x4xf32>
    %70 = vector.shape_cast %69 : vector<1x1x18x4xf32> to vector<18x4xf32>
    %c0_46 = arith.constant 0 : index
    %c2_47 = arith.constant 2 : index
    %c0_48 = arith.constant 0 : index
    %c0_49 = arith.constant 0 : index
    %71 = vector.load %arg2[%c0_46, %c2_47, %c0_48, %c0_49] : memref<1x6x18x4xf32, #tpu.memory_space<vmem>>, vector<1x1x18x4xf32>
    %72 = vector.shape_cast %71 : vector<1x1x18x4xf32> to vector<18x4xf32>
    %cst_50 = arith.constant dense<0.000000e+00> : vector<18x4xf32>
    %73 = tpu.matmul %72, %10, %cst_50 {dimension_numbers = #tpu.dot_dimension_numbers<[1], [0], [0], [1], [0, 0, 1, 1], [], []>} : vector<18x4xf32>, vector<4x4xf32>, vector<18x4xf32> -> vector<18x4xf32>
    %74 = arith.addf %70, %73 : vector<18x4xf32>
    %75 = vector.broadcast %11 : vector<1x4xf32> to vector<18x4xf32>
    %76 = arith.addf %74, %75 : vector<18x4xf32>
    %c4_i32_51 = arith.constant 4 : i32
    %77 = arith.muli %9, %c4_i32_51 : i32
    %c2_i32 = arith.constant 2 : i32
    %78 = arith.addi %77, %c2_i32 : i32
    %c1_i32_52 = arith.constant 1 : i32
    %79 = arith.cmpi sge, %78, %c1_i32_52 : i32
    %80 = vector.broadcast %79 : i1 to vector<18x1xi1>
    %81 = arith.andi %22, %80 : vector<18x1xi1>
    %c16_i32_53 = arith.constant 16 : i32
    %82 = arith.cmpi sle, %78, %c16_i32_53 : i32
    %83 = vector.broadcast %82 : i1 to vector<18x1xi1>
    %84 = arith.andi %81, %83 : vector<18x1xi1>
    %85 = arith.extui %84 : vector<18x1xi1> to vector<18x1xi32>
    %86 = arith.sitofp %85 : vector<18x1xi32> to vector<18x1xf32>
    %cst_54 = arith.constant dense<0.000000e+00> : vector<18x16xf32>
    %87 = tpu.matmul %76, %12, %cst_54 {dimension_numbers = #tpu.dot_dimension_numbers<[1], [0], [0], [1], [0, 0, 1, 1], [], []>} : vector<18x4xf32>, vector<4x16xf32>, vector<18x16xf32> -> vector<18x16xf32>
    %88 = vector.broadcast %13 : vector<1x16xf32> to vector<18x16xf32>
    %89 = arith.addf %87, %88 : vector<18x16xf32>
    %90 = vector.broadcast %86 : vector<18x1xf32> to vector<18x16xf32>
    %91 = arith.mulf %89, %90 : vector<18x16xf32>
    %c0_55 = arith.constant 0 : index
    %c3 = arith.constant 3 : index
    %c0_56 = arith.constant 0 : index
    %c0_57 = arith.constant 0 : index
    %92 = vector.load %arg1[%c0_55, %c3, %c0_56, %c0_57] : memref<1x6x18x4xf32, #tpu.memory_space<vmem>>, vector<1x1x18x4xf32>
    %93 = vector.shape_cast %92 : vector<1x1x18x4xf32> to vector<18x4xf32>
    %c0_58 = arith.constant 0 : index
    %c3_59 = arith.constant 3 : index
    %c0_60 = arith.constant 0 : index
    %c0_61 = arith.constant 0 : index
    %94 = vector.load %arg2[%c0_58, %c3_59, %c0_60, %c0_61] : memref<1x6x18x4xf32, #tpu.memory_space<vmem>>, vector<1x1x18x4xf32>
    %95 = vector.shape_cast %94 : vector<1x1x18x4xf32> to vector<18x4xf32>
    %cst_62 = arith.constant dense<0.000000e+00> : vector<18x4xf32>
    %96 = tpu.matmul %95, %10, %cst_62 {dimension_numbers = #tpu.dot_dimension_numbers<[1], [0], [0], [1], [0, 0, 1, 1], [], []>} : vector<18x4xf32>, vector<4x4xf32>, vector<18x4xf32> -> vector<18x4xf32>
    %97 = arith.addf %93, %96 : vector<18x4xf32>
    %98 = vector.broadcast %11 : vector<1x4xf32> to vector<18x4xf32>
    %99 = arith.addf %97, %98 : vector<18x4xf32>
    %c4_i32_63 = arith.constant 4 : i32
    %100 = arith.muli %9, %c4_i32_63 : i32
    %c3_i32 = arith.constant 3 : i32
    %101 = arith.addi %100, %c3_i32 : i32
    %c1_i32_64 = arith.constant 1 : i32
    %102 = arith.cmpi sge, %101, %c1_i32_64 : i32
    %103 = vector.broadcast %102 : i1 to vector<18x1xi1>
    %104 = arith.andi %22, %103 : vector<18x1xi1>
    %c16_i32_65 = arith.constant 16 : i32
    %105 = arith.cmpi sle, %101, %c16_i32_65 : i32
    %106 = vector.broadcast %105 : i1 to vector<18x1xi1>
    %107 = arith.andi %104, %106 : vector<18x1xi1>
    %108 = arith.extui %107 : vector<18x1xi1> to vector<18x1xi32>
    %109 = arith.sitofp %108 : vector<18x1xi32> to vector<18x1xf32>
    %cst_66 = arith.constant dense<0.000000e+00> : vector<18x16xf32>
    %110 = tpu.matmul %99, %12, %cst_66 {dimension_numbers = #tpu.dot_dimension_numbers<[1], [0], [0], [1], [0, 0, 1, 1], [], []>} : vector<18x4xf32>, vector<4x16xf32>, vector<18x16xf32> -> vector<18x16xf32>
    %111 = vector.broadcast %13 : vector<1x16xf32> to vector<18x16xf32>
    %112 = arith.addf %110, %111 : vector<18x16xf32>
    %113 = vector.broadcast %109 : vector<18x1xf32> to vector<18x16xf32>
    %114 = arith.mulf %112, %113 : vector<18x16xf32>
    %c0_67 = arith.constant 0 : index
    %c4 = arith.constant 4 : index
    %c0_68 = arith.constant 0 : index
    %c0_69 = arith.constant 0 : index
    %115 = vector.load %arg1[%c0_67, %c4, %c0_68, %c0_69] : memref<1x6x18x4xf32, #tpu.memory_space<vmem>>, vector<1x1x18x4xf32>
    %116 = vector.shape_cast %115 : vector<1x1x18x4xf32> to vector<18x4xf32>
    %c0_70 = arith.constant 0 : index
    %c4_71 = arith.constant 4 : index
    %c0_72 = arith.constant 0 : index
    %c0_73 = arith.constant 0 : index
    %117 = vector.load %arg2[%c0_70, %c4_71, %c0_72, %c0_73] : memref<1x6x18x4xf32, #tpu.memory_space<vmem>>, vector<1x1x18x4xf32>
    %118 = vector.shape_cast %117 : vector<1x1x18x4xf32> to vector<18x4xf32>
    %cst_74 = arith.constant dense<0.000000e+00> : vector<18x4xf32>
    %119 = tpu.matmul %118, %10, %cst_74 {dimension_numbers = #tpu.dot_dimension_numbers<[1], [0], [0], [1], [0, 0, 1, 1], [], []>} : vector<18x4xf32>, vector<4x4xf32>, vector<18x4xf32> -> vector<18x4xf32>
    %120 = arith.addf %116, %119 : vector<18x4xf32>
    %121 = vector.broadcast %11 : vector<1x4xf32> to vector<18x4xf32>
    %122 = arith.addf %120, %121 : vector<18x4xf32>
    %c4_i32_75 = arith.constant 4 : i32
    %123 = arith.muli %9, %c4_i32_75 : i32
    %c4_i32_76 = arith.constant 4 : i32
    %124 = arith.addi %123, %c4_i32_76 : i32
    %c1_i32_77 = arith.constant 1 : i32
    %125 = arith.cmpi sge, %124, %c1_i32_77 : i32
    %126 = vector.broadcast %125 : i1 to vector<18x1xi1>
    %127 = arith.andi %22, %126 : vector<18x1xi1>
    %c16_i32_78 = arith.constant 16 : i32
    %128 = arith.cmpi sle, %124, %c16_i32_78 : i32
    %129 = vector.broadcast %128 : i1 to vector<18x1xi1>
    %130 = arith.andi %127, %129 : vector<18x1xi1>
    %131 = arith.extui %130 : vector<18x1xi1> to vector<18x1xi32>
    %132 = arith.sitofp %131 : vector<18x1xi32> to vector<18x1xf32>
    %cst_79 = arith.constant dense<0.000000e+00> : vector<18x16xf32>
    %133 = tpu.matmul %122, %12, %cst_79 {dimension_numbers = #tpu.dot_dimension_numbers<[1], [0], [0], [1], [0, 0, 1, 1], [], []>} : vector<18x4xf32>, vector<4x16xf32>, vector<18x16xf32> -> vector<18x16xf32>
    %134 = vector.broadcast %13 : vector<1x16xf32> to vector<18x16xf32>
    %135 = arith.addf %133, %134 : vector<18x16xf32>
    %136 = vector.broadcast %132 : vector<18x1xf32> to vector<18x16xf32>
    %137 = arith.mulf %135, %136 : vector<18x16xf32>
    %c0_80 = arith.constant 0 : index
    %c5 = arith.constant 5 : index
    %c0_81 = arith.constant 0 : index
    %c0_82 = arith.constant 0 : index
    %138 = vector.load %arg1[%c0_80, %c5, %c0_81, %c0_82] : memref<1x6x18x4xf32, #tpu.memory_space<vmem>>, vector<1x1x18x4xf32>
    %139 = vector.shape_cast %138 : vector<1x1x18x4xf32> to vector<18x4xf32>
    %c0_83 = arith.constant 0 : index
    %c5_84 = arith.constant 5 : index
    %c0_85 = arith.constant 0 : index
    %c0_86 = arith.constant 0 : index
    %140 = vector.load %arg2[%c0_83, %c5_84, %c0_85, %c0_86] : memref<1x6x18x4xf32, #tpu.memory_space<vmem>>, vector<1x1x18x4xf32>
    %141 = vector.shape_cast %140 : vector<1x1x18x4xf32> to vector<18x4xf32>
    %cst_87 = arith.constant dense<0.000000e+00> : vector<18x4xf32>
    %142 = tpu.matmul %141, %10, %cst_87 {dimension_numbers = #tpu.dot_dimension_numbers<[1], [0], [0], [1], [0, 0, 1, 1], [], []>} : vector<18x4xf32>, vector<4x4xf32>, vector<18x4xf32> -> vector<18x4xf32>
    %143 = arith.addf %139, %142 : vector<18x4xf32>
    %144 = vector.broadcast %11 : vector<1x4xf32> to vector<18x4xf32>
    %145 = arith.addf %143, %144 : vector<18x4xf32>
    %c4_i32_88 = arith.constant 4 : i32
    %146 = arith.muli %9, %c4_i32_88 : i32
    %c5_i32 = arith.constant 5 : i32
    %147 = arith.addi %146, %c5_i32 : i32
    %c1_i32_89 = arith.constant 1 : i32
    %148 = arith.cmpi sge, %147, %c1_i32_89 : i32
    %149 = vector.broadcast %148 : i1 to vector<18x1xi1>
    %150 = arith.andi %22, %149 : vector<18x1xi1>
    %c16_i32_90 = arith.constant 16 : i32
    %151 = arith.cmpi sle, %147, %c16_i32_90 : i32
    %152 = vector.broadcast %151 : i1 to vector<18x1xi1>
    %153 = arith.andi %150, %152 : vector<18x1xi1>
    %154 = arith.extui %153 : vector<18x1xi1> to vector<18x1xi32>
    %155 = arith.sitofp %154 : vector<18x1xi32> to vector<18x1xf32>
    %cst_91 = arith.constant dense<0.000000e+00> : vector<18x16xf32>
    %156 = tpu.matmul %145, %12, %cst_91 {dimension_numbers = #tpu.dot_dimension_numbers<[1], [0], [0], [1], [0, 0, 1, 1], [], []>} : vector<18x4xf32>, vector<4x16xf32>, vector<18x16xf32> -> vector<18x16xf32>
    %157 = vector.broadcast %13 : vector<1x16xf32> to vector<18x16xf32>
    %158 = arith.addf %156, %157 : vector<18x16xf32>
    %159 = vector.broadcast %155 : vector<18x1xf32> to vector<18x16xf32>
    %160 = arith.mulf %158, %159 : vector<18x16xf32>
    %161 = vector.extract_strided_slice %14 {offsets = [0, 0], sizes = [1, 16], strides = [1, 1]} : vector<9x16xf32> to vector<1x16xf32>
    %162 = vector.extract_strided_slice %45 {offsets = [0, 0], sizes = [16, 16], strides = [1, 1]} : vector<18x16xf32> to vector<16x16xf32>
    %163 = vector.broadcast %161 : vector<1x16xf32> to vector<16x16xf32>
    %164 = arith.mulf %162, %163 : vector<16x16xf32>
    %165 = vector.extract_strided_slice %14 {offsets = [1, 0], sizes = [1, 16], strides = [1, 1]} : vector<9x16xf32> to vector<1x16xf32>
    %166 = vector.extract_strided_slice %45 {offsets = [1, 0], sizes = [16, 16], strides = [1, 1]} : vector<18x16xf32> to vector<16x16xf32>
    %167 = vector.broadcast %165 : vector<1x16xf32> to vector<16x16xf32>
    %168 = arith.mulf %166, %167 : vector<16x16xf32>
    %169 = arith.addf %164, %168 : vector<16x16xf32>
    %170 = vector.extract_strided_slice %14 {offsets = [2, 0], sizes = [1, 16], strides = [1, 1]} : vector<9x16xf32> to vector<1x16xf32>
    %171 = vector.extract_strided_slice %45 {offsets = [2, 0], sizes = [16, 16], strides = [1, 1]} : vector<18x16xf32> to vector<16x16xf32>
    %172 = vector.broadcast %170 : vector<1x16xf32> to vector<16x16xf32>
    %173 = arith.mulf %171, %172 : vector<16x16xf32>
    %174 = arith.addf %169, %173 : vector<16x16xf32>
    %175 = vector.extract_strided_slice %14 {offsets = [3, 0], sizes = [1, 16], strides = [1, 1]} : vector<9x16xf32> to vector<1x16xf32>
    %176 = vector.extract_strided_slice %68 {offsets = [0, 0], sizes = [16, 16], strides = [1, 1]} : vector<18x16xf32> to vector<16x16xf32>
    %177 = vector.broadcast %175 : vector<1x16xf32> to vector<16x16xf32>
    %178 = arith.mulf %176, %177 : vector<16x16xf32>
    %179 = arith.addf %174, %178 : vector<16x16xf32>
    %180 = vector.extract_strided_slice %14 {offsets = [4, 0], sizes = [1, 16], strides = [1, 1]} : vector<9x16xf32> to vector<1x16xf32>
    %181 = vector.extract_strided_slice %68 {offsets = [1, 0], sizes = [16, 16], strides = [1, 1]} : vector<18x16xf32> to vector<16x16xf32>
    %182 = vector.broadcast %180 : vector<1x16xf32> to vector<16x16xf32>
    %183 = arith.mulf %181, %182 : vector<16x16xf32>
    %184 = arith.addf %179, %183 : vector<16x16xf32>
    %185 = vector.extract_strided_slice %14 {offsets = [5, 0], sizes = [1, 16], strides = [1, 1]} : vector<9x16xf32> to vector<1x16xf32>
    %186 = vector.extract_strided_slice %68 {offsets = [2, 0], sizes = [16, 16], strides = [1, 1]} : vector<18x16xf32> to vector<16x16xf32>
    %187 = vector.broadcast %185 : vector<1x16xf32> to vector<16x16xf32>
    %188 = arith.mulf %186, %187 : vector<16x16xf32>
    %189 = arith.addf %184, %188 : vector<16x16xf32>
    %190 = vector.extract_strided_slice %14 {offsets = [6, 0], sizes = [1, 16], strides = [1, 1]} : vector<9x16xf32> to vector<1x16xf32>
    %191 = vector.extract_strided_slice %91 {offsets = [0, 0], sizes = [16, 16], strides = [1, 1]} : vector<18x16xf32> to vector<16x16xf32>
    %192 = vector.broadcast %190 : vector<1x16xf32> to vector<16x16xf32>
    %193 = arith.mulf %191, %192 : vector<16x16xf32>
    %194 = arith.addf %189, %193 : vector<16x16xf32>
    %195 = vector.extract_strided_slice %14 {offsets = [7, 0], sizes = [1, 16], strides = [1, 1]} : vector<9x16xf32> to vector<1x16xf32>
    %196 = vector.extract_strided_slice %91 {offsets = [1, 0], sizes = [16, 16], strides = [1, 1]} : vector<18x16xf32> to vector<16x16xf32>
    %197 = vector.broadcast %195 : vector<1x16xf32> to vector<16x16xf32>
    %198 = arith.mulf %196, %197 : vector<16x16xf32>
    %199 = arith.addf %194, %198 : vector<16x16xf32>
    %200 = vector.extract_strided_slice %14 {offsets = [8, 0], sizes = [1, 16], strides = [1, 1]} : vector<9x16xf32> to vector<1x16xf32>
    %201 = vector.extract_strided_slice %91 {offsets = [2, 0], sizes = [16, 16], strides = [1, 1]} : vector<18x16xf32> to vector<16x16xf32>
    %202 = vector.broadcast %200 : vector<1x16xf32> to vector<16x16xf32>
    %203 = arith.mulf %201, %202 : vector<16x16xf32>
    %204 = arith.addf %199, %203 : vector<16x16xf32>
    %205 = vector.broadcast %15 : vector<1x16xf32> to vector<16x16xf32>
    %206 = arith.addf %204, %205 : vector<16x16xf32>
    %cst_92 = arith.constant 0.000000e+00 : f32
    %207 = vector.broadcast %cst_92 : f32 to vector<16x16xf32>
    %208 = arith.maximumf %206, %207 : vector<16x16xf32>
    %cst_93 = arith.constant dense<0.000000e+00> : vector<16x4xf32>
    %209 = tpu.matmul %208, %16, %cst_93 {dimension_numbers = #tpu.dot_dimension_numbers<[1], [0], [0], [1], [0, 0, 1, 1], [], []>} : vector<16x16xf32>, vector<16x4xf32>, vector<16x4xf32> -> vector<16x4xf32>
    %210 = vector.extract_strided_slice %53 {offsets = [1, 0], sizes = [16, 4], strides = [1, 1]} : vector<18x4xf32> to vector<16x4xf32>
    %211 = arith.addf %209, %210 : vector<16x4xf32>
    %c0_94 = arith.constant 0 : index
    %c0_95 = arith.constant 0 : index
    %c0_96 = arith.constant 0 : index
    %c0_97 = arith.constant 0 : index
    %212 = vector.load %arg10[%c0_94, %c0_95, %c0_96, %c0_97] : memref<1x4x16x4xf32, #tpu.memory_space<vmem>>, vector<1x1x16x4xf32>
    %213 = vector.shape_cast %212 : vector<1x1x16x4xf32> to vector<16x4xf32>
    %214 = vector.shape_cast %211 : vector<16x4xf32> to vector<1x1x16x4xf32>
    tpu.vector_store %arg10[%c0_94, %c0_95, %c0_96, %c0_97], %214 {strides = array<i32>} : memref<1x4x16x4xf32, #tpu.memory_space<vmem>>, vector<1x1x16x4xf32>,
    %215 = vector.extract_strided_slice %14 {offsets = [0, 0], sizes = [1, 16], strides = [1, 1]} : vector<9x16xf32> to vector<1x16xf32>
    %216 = vector.extract_strided_slice %68 {offsets = [0, 0], sizes = [16, 16], strides = [1, 1]} : vector<18x16xf32> to vector<16x16xf32>
    %217 = vector.broadcast %215 : vector<1x16xf32> to vector<16x16xf32>
    %218 = arith.mulf %216, %217 : vector<16x16xf32>
    %219 = vector.extract_strided_slice %14 {offsets = [1, 0], sizes = [1, 16], strides = [1, 1]} : vector<9x16xf32> to vector<1x16xf32>
    %220 = vector.extract_strided_slice %68 {offsets = [1, 0], sizes = [16, 16], strides = [1, 1]} : vector<18x16xf32> to vector<16x16xf32>
    %221 = vector.broadcast %219 : vector<1x16xf32> to vector<16x16xf32>
    %222 = arith.mulf %220, %221 : vector<16x16xf32>
    %223 = arith.addf %218, %222 : vector<16x16xf32>
    %224 = vector.extract_strided_slice %14 {offsets = [2, 0], sizes = [1, 16], strides = [1, 1]} : vector<9x16xf32> to vector<1x16xf32>
    %225 = vector.extract_strided_slice %68 {offsets = [2, 0], sizes = [16, 16], strides = [1, 1]} : vector<18x16xf32> to vector<16x16xf32>
    %226 = vector.broadcast %224 : vector<1x16xf32> to vector<16x16xf32>
    %227 = arith.mulf %225, %226 : vector<16x16xf32>
    %228 = arith.addf %223, %227 : vector<16x16xf32>
    %229 = vector.extract_strided_slice %14 {offsets = [3, 0], sizes = [1, 16], strides = [1, 1]} : vector<9x16xf32> to vector<1x16xf32>
    %230 = vector.extract_strided_slice %91 {offsets = [0, 0], sizes = [16, 16], strides = [1, 1]} : vector<18x16xf32> to vector<16x16xf32>
    %231 = vector.broadcast %229 : vector<1x16xf32> to vector<16x16xf32>
    %232 = arith.mulf %230, %231 : vector<16x16xf32>
    %233 = arith.addf %228, %232 : vector<16x16xf32>
    %234 = vector.extract_strided_slice %14 {offsets = [4, 0], sizes = [1, 16], strides = [1, 1]} : vector<9x16xf32> to vector<1x16xf32>
    %235 = vector.extract_strided_slice %91 {offsets = [1, 0], sizes = [16, 16], strides = [1, 1]} : vector<18x16xf32> to vector<16x16xf32>
    %236 = vector.broadcast %234 : vector<1x16xf32> to vector<16x16xf32>
    %237 = arith.mulf %235, %236 : vector<16x16xf32>
    %238 = arith.addf %233, %237 : vector<16x16xf32>
    %239 = vector.extract_strided_slice %14 {offsets = [5, 0], sizes = [1, 16], strides = [1, 1]} : vector<9x16xf32> to vector<1x16xf32>
    %240 = vector.extract_strided_slice %91 {offsets = [2, 0], sizes = [16, 16], strides = [1, 1]} : vector<18x16xf32> to vector<16x16xf32>
    %241 = vector.broadcast %239 : vector<1x16xf32> to vector<16x16xf32>
    %242 = arith.mulf %240, %241 : vector<16x16xf32>
    %243 = arith.addf %238, %242 : vector<16x16xf32>
    %244 = vector.extract_strided_slice %14 {offsets = [6, 0], sizes = [1, 16], strides = [1, 1]} : vector<9x16xf32> to vector<1x16xf32>
    %245 = vector.extract_strided_slice %114 {offsets = [0, 0], sizes = [16, 16], strides = [1, 1]} : vector<18x16xf32> to vector<16x16xf32>
    %246 = vector.broadcast %244 : vector<1x16xf32> to vector<16x16xf32>
    %247 = arith.mulf %245, %246 : vector<16x16xf32>
    %248 = arith.addf %243, %247 : vector<16x16xf32>
    %249 = vector.extract_strided_slice %14 {offsets = [7, 0], sizes = [1, 16], strides = [1, 1]} : vector<9x16xf32> to vector<1x16xf32>
    %250 = vector.extract_strided_slice %114 {offsets = [1, 0], sizes = [16, 16], strides = [1, 1]} : vector<18x16xf32> to vector<16x16xf32>
    %251 = vector.broadcast %249 : vector<1x16xf32> to vector<16x16xf32>
    %252 = arith.mulf %250, %251 : vector<16x16xf32>
    %253 = arith.addf %248, %252 : vector<16x16xf32>
    %254 = vector.extract_strided_slice %14 {offsets = [8, 0], sizes = [1, 16], strides = [1, 1]} : vector<9x16xf32> to vector<1x16xf32>
    %255 = vector.extract_strided_slice %114 {offsets = [2, 0], sizes = [16, 16], strides = [1, 1]} : vector<18x16xf32> to vector<16x16xf32>
    %256 = vector.broadcast %254 : vector<1x16xf32> to vector<16x16xf32>
    %257 = arith.mulf %255, %256 : vector<16x16xf32>
    %258 = arith.addf %253, %257 : vector<16x16xf32>
    %259 = vector.broadcast %15 : vector<1x16xf32> to vector<16x16xf32>
    %260 = arith.addf %258, %259 : vector<16x16xf32>
    %cst_98 = arith.constant 0.000000e+00 : f32
    %261 = vector.broadcast %cst_98 : f32 to vector<16x16xf32>
    %262 = arith.maximumf %260, %261 : vector<16x16xf32>
    %cst_99 = arith.constant dense<0.000000e+00> : vector<16x4xf32>
    %263 = tpu.matmul %262, %16, %cst_99 {dimension_numbers = #tpu.dot_dimension_numbers<[1], [0], [0], [1], [0, 0, 1, 1], [], []>} : vector<16x16xf32>, vector<16x4xf32>, vector<16x4xf32> -> vector<16x4xf32>
    %264 = vector.extract_strided_slice %76 {offsets = [1, 0], sizes = [16, 4], strides = [1, 1]} : vector<18x4xf32> to vector<16x4xf32>
    %265 = arith.addf %263, %264 : vector<16x4xf32>
    %c0_100 = arith.constant 0 : index
    %c1_101 = arith.constant 1 : index
    %c0_102 = arith.constant 0 : index
    %c0_103 = arith.constant 0 : index
    %266 = vector.load %arg10[%c0_100, %c1_101, %c0_102, %c0_103] : memref<1x4x16x4xf32, #tpu.memory_space<vmem>>, vector<1x1x16x4xf32>
    %267 = vector.shape_cast %266 : vector<1x1x16x4xf32> to vector<16x4xf32>
    %268 = vector.shape_cast %265 : vector<16x4xf32> to vector<1x1x16x4xf32>
    tpu.vector_store %arg10[%c0_100, %c1_101, %c0_102, %c0_103], %268 {strides = array<i32>} : memref<1x4x16x4xf32, #tpu.memory_space<vmem>>, vector<1x1x16x4xf32>,
    %269 = vector.extract_strided_slice %14 {offsets = [0, 0], sizes = [1, 16], strides = [1, 1]} : vector<9x16xf32> to vector<1x16xf32>
    %270 = vector.extract_strided_slice %91 {offsets = [0, 0], sizes = [16, 16], strides = [1, 1]} : vector<18x16xf32> to vector<16x16xf32>
    %271 = vector.broadcast %269 : vector<1x16xf32> to vector<16x16xf32>
    %272 = arith.mulf %270, %271 : vector<16x16xf32>
    %273 = vector.extract_strided_slice %14 {offsets = [1, 0], sizes = [1, 16], strides = [1, 1]} : vector<9x16xf32> to vector<1x16xf32>
    %274 = vector.extract_strided_slice %91 {offsets = [1, 0], sizes = [16, 16], strides = [1, 1]} : vector<18x16xf32> to vector<16x16xf32>
    %275 = vector.broadcast %273 : vector<1x16xf32> to vector<16x16xf32>
    %276 = arith.mulf %274, %275 : vector<16x16xf32>
    %277 = arith.addf %272, %276 : vector<16x16xf32>
    %278 = vector.extract_strided_slice %14 {offsets = [2, 0], sizes = [1, 16], strides = [1, 1]} : vector<9x16xf32> to vector<1x16xf32>
    %279 = vector.extract_strided_slice %91 {offsets = [2, 0], sizes = [16, 16], strides = [1, 1]} : vector<18x16xf32> to vector<16x16xf32>
    %280 = vector.broadcast %278 : vector<1x16xf32> to vector<16x16xf32>
    %281 = arith.mulf %279, %280 : vector<16x16xf32>
    %282 = arith.addf %277, %281 : vector<16x16xf32>
    %283 = vector.extract_strided_slice %14 {offsets = [3, 0], sizes = [1, 16], strides = [1, 1]} : vector<9x16xf32> to vector<1x16xf32>
    %284 = vector.extract_strided_slice %114 {offsets = [0, 0], sizes = [16, 16], strides = [1, 1]} : vector<18x16xf32> to vector<16x16xf32>
    %285 = vector.broadcast %283 : vector<1x16xf32> to vector<16x16xf32>
    %286 = arith.mulf %284, %285 : vector<16x16xf32>
    %287 = arith.addf %282, %286 : vector<16x16xf32>
    %288 = vector.extract_strided_slice %14 {offsets = [4, 0], sizes = [1, 16], strides = [1, 1]} : vector<9x16xf32> to vector<1x16xf32>
    %289 = vector.extract_strided_slice %114 {offsets = [1, 0], sizes = [16, 16], strides = [1, 1]} : vector<18x16xf32> to vector<16x16xf32>
    %290 = vector.broadcast %288 : vector<1x16xf32> to vector<16x16xf32>
    %291 = arith.mulf %289, %290 : vector<16x16xf32>
    %292 = arith.addf %287, %291 : vector<16x16xf32>
    %293 = vector.extract_strided_slice %14 {offsets = [5, 0], sizes = [1, 16], strides = [1, 1]} : vector<9x16xf32> to vector<1x16xf32>
    %294 = vector.extract_strided_slice %114 {offsets = [2, 0], sizes = [16, 16], strides = [1, 1]} : vector<18x16xf32> to vector<16x16xf32>
    %295 = vector.broadcast %293 : vector<1x16xf32> to vector<16x16xf32>
    %296 = arith.mulf %294, %295 : vector<16x16xf32>
    %297 = arith.addf %292, %296 : vector<16x16xf32>
    %298 = vector.extract_strided_slice %14 {offsets = [6, 0], sizes = [1, 16], strides = [1, 1]} : vector<9x16xf32> to vector<1x16xf32>
    %299 = vector.extract_strided_slice %137 {offsets = [0, 0], sizes = [16, 16], strides = [1, 1]} : vector<18x16xf32> to vector<16x16xf32>
    %300 = vector.broadcast %298 : vector<1x16xf32> to vector<16x16xf32>
    %301 = arith.mulf %299, %300 : vector<16x16xf32>
    %302 = arith.addf %297, %301 : vector<16x16xf32>
    %303 = vector.extract_strided_slice %14 {offsets = [7, 0], sizes = [1, 16], strides = [1, 1]} : vector<9x16xf32> to vector<1x16xf32>
    %304 = vector.extract_strided_slice %137 {offsets = [1, 0], sizes = [16, 16], strides = [1, 1]} : vector<18x16xf32> to vector<16x16xf32>
    %305 = vector.broadcast %303 : vector<1x16xf32> to vector<16x16xf32>
    %306 = arith.mulf %304, %305 : vector<16x16xf32>
    %307 = arith.addf %302, %306 : vector<16x16xf32>
    %308 = vector.extract_strided_slice %14 {offsets = [8, 0], sizes = [1, 16], strides = [1, 1]} : vector<9x16xf32> to vector<1x16xf32>
    %309 = vector.extract_strided_slice %137 {offsets = [2, 0], sizes = [16, 16], strides = [1, 1]} : vector<18x16xf32> to vector<16x16xf32>
    %310 = vector.broadcast %308 : vector<1x16xf32> to vector<16x16xf32>
    %311 = arith.mulf %309, %310 : vector<16x16xf32>
    %312 = arith.addf %307, %311 : vector<16x16xf32>
    %313 = vector.broadcast %15 : vector<1x16xf32> to vector<16x16xf32>
    %314 = arith.addf %312, %313 : vector<16x16xf32>
    %cst_104 = arith.constant 0.000000e+00 : f32
    %315 = vector.broadcast %cst_104 : f32 to vector<16x16xf32>
    %316 = arith.maximumf %314, %315 : vector<16x16xf32>
    %cst_105 = arith.constant dense<0.000000e+00> : vector<16x4xf32>
    %317 = tpu.matmul %316, %16, %cst_105 {dimension_numbers = #tpu.dot_dimension_numbers<[1], [0], [0], [1], [0, 0, 1, 1], [], []>} : vector<16x16xf32>, vector<16x4xf32>, vector<16x4xf32> -> vector<16x4xf32>
    %318 = vector.extract_strided_slice %99 {offsets = [1, 0], sizes = [16, 4], strides = [1, 1]} : vector<18x4xf32> to vector<16x4xf32>
    %319 = arith.addf %317, %318 : vector<16x4xf32>
    %c0_106 = arith.constant 0 : index
    %c2_107 = arith.constant 2 : index
    %c0_108 = arith.constant 0 : index
    %c0_109 = arith.constant 0 : index
    %320 = vector.load %arg10[%c0_106, %c2_107, %c0_108, %c0_109] : memref<1x4x16x4xf32, #tpu.memory_space<vmem>>, vector<1x1x16x4xf32>
    %321 = vector.shape_cast %320 : vector<1x1x16x4xf32> to vector<16x4xf32>
    %322 = vector.shape_cast %319 : vector<16x4xf32> to vector<1x1x16x4xf32>
    tpu.vector_store %arg10[%c0_106, %c2_107, %c0_108, %c0_109], %322 {strides = array<i32>} : memref<1x4x16x4xf32, #tpu.memory_space<vmem>>, vector<1x1x16x4xf32>,
    %323 = vector.extract_strided_slice %14 {offsets = [0, 0], sizes = [1, 16], strides = [1, 1]} : vector<9x16xf32> to vector<1x16xf32>
    %324 = vector.extract_strided_slice %114 {offsets = [0, 0], sizes = [16, 16], strides = [1, 1]} : vector<18x16xf32> to vector<16x16xf32>
    %325 = vector.broadcast %323 : vector<1x16xf32> to vector<16x16xf32>
    %326 = arith.mulf %324, %325 : vector<16x16xf32>
    %327 = vector.extract_strided_slice %14 {offsets = [1, 0], sizes = [1, 16], strides = [1, 1]} : vector<9x16xf32> to vector<1x16xf32>
    %328 = vector.extract_strided_slice %114 {offsets = [1, 0], sizes = [16, 16], strides = [1, 1]} : vector<18x16xf32> to vector<16x16xf32>
    %329 = vector.broadcast %327 : vector<1x16xf32> to vector<16x16xf32>
    %330 = arith.mulf %328, %329 : vector<16x16xf32>
    %331 = arith.addf %326, %330 : vector<16x16xf32>
    %332 = vector.extract_strided_slice %14 {offsets = [2, 0], sizes = [1, 16], strides = [1, 1]} : vector<9x16xf32> to vector<1x16xf32>
    %333 = vector.extract_strided_slice %114 {offsets = [2, 0], sizes = [16, 16], strides = [1, 1]} : vector<18x16xf32> to vector<16x16xf32>
    %334 = vector.broadcast %332 : vector<1x16xf32> to vector<16x16xf32>
    %335 = arith.mulf %333, %334 : vector<16x16xf32>
    %336 = arith.addf %331, %335 : vector<16x16xf32>
    %337 = vector.extract_strided_slice %14 {offsets = [3, 0], sizes = [1, 16], strides = [1, 1]} : vector<9x16xf32> to vector<1x16xf32>
    %338 = vector.extract_strided_slice %137 {offsets = [0, 0], sizes = [16, 16], strides = [1, 1]} : vector<18x16xf32> to vector<16x16xf32>
    %339 = vector.broadcast %337 : vector<1x16xf32> to vector<16x16xf32>
    %340 = arith.mulf %338, %339 : vector<16x16xf32>
    %341 = arith.addf %336, %340 : vector<16x16xf32>
    %342 = vector.extract_strided_slice %14 {offsets = [4, 0], sizes = [1, 16], strides = [1, 1]} : vector<9x16xf32> to vector<1x16xf32>
    %343 = vector.extract_strided_slice %137 {offsets = [1, 0], sizes = [16, 16], strides = [1, 1]} : vector<18x16xf32> to vector<16x16xf32>
    %344 = vector.broadcast %342 : vector<1x16xf32> to vector<16x16xf32>
    %345 = arith.mulf %343, %344 : vector<16x16xf32>
    %346 = arith.addf %341, %345 : vector<16x16xf32>
    %347 = vector.extract_strided_slice %14 {offsets = [5, 0], sizes = [1, 16], strides = [1, 1]} : vector<9x16xf32> to vector<1x16xf32>
    %348 = vector.extract_strided_slice %137 {offsets = [2, 0], sizes = [16, 16], strides = [1, 1]} : vector<18x16xf32> to vector<16x16xf32>
    %349 = vector.broadcast %347 : vector<1x16xf32> to vector<16x16xf32>
    %350 = arith.mulf %348, %349 : vector<16x16xf32>
    %351 = arith.addf %346, %350 : vector<16x16xf32>
    %352 = vector.extract_strided_slice %14 {offsets = [6, 0], sizes = [1, 16], strides = [1, 1]} : vector<9x16xf32> to vector<1x16xf32>
    %353 = vector.extract_strided_slice %160 {offsets = [0, 0], sizes = [16, 16], strides = [1, 1]} : vector<18x16xf32> to vector<16x16xf32>
    %354 = vector.broadcast %352 : vector<1x16xf32> to vector<16x16xf32>
    %355 = arith.mulf %353, %354 : vector<16x16xf32>
    %356 = arith.addf %351, %355 : vector<16x16xf32>
    %357 = vector.extract_strided_slice %14 {offsets = [7, 0], sizes = [1, 16], strides = [1, 1]} : vector<9x16xf32> to vector<1x16xf32>
    %358 = vector.extract_strided_slice %160 {offsets = [1, 0], sizes = [16, 16], strides = [1, 1]} : vector<18x16xf32> to vector<16x16xf32>
    %359 = vector.broadcast %357 : vector<1x16xf32> to vector<16x16xf32>
    %360 = arith.mulf %358, %359 : vector<16x16xf32>
    %361 = arith.addf %356, %360 : vector<16x16xf32>
    %362 = vector.extract_strided_slice %14 {offsets = [8, 0], sizes = [1, 16], strides = [1, 1]} : vector<9x16xf32> to vector<1x16xf32>
    %363 = vector.extract_strided_slice %160 {offsets = [2, 0], sizes = [16, 16], strides = [1, 1]} : vector<18x16xf32> to vector<16x16xf32>
    %364 = vector.broadcast %362 : vector<1x16xf32> to vector<16x16xf32>
    %365 = arith.mulf %363, %364 : vector<16x16xf32>
    %366 = arith.addf %361, %365 : vector<16x16xf32>
    %367 = vector.broadcast %15 : vector<1x16xf32> to vector<16x16xf32>
    %368 = arith.addf %366, %367 : vector<16x16xf32>
    %cst_110 = arith.constant 0.000000e+00 : f32
    %369 = vector.broadcast %cst_110 : f32 to vector<16x16xf32>
    %370 = arith.maximumf %368, %369 : vector<16x16xf32>
    %cst_111 = arith.constant dense<0.000000e+00> : vector<16x4xf32>
    %371 = tpu.matmul %370, %16, %cst_111 {dimension_numbers = #tpu.dot_dimension_numbers<[1], [0], [0], [1], [0, 0, 1, 1], [], []>} : vector<16x16xf32>, vector<16x4xf32>, vector<16x4xf32> -> vector<16x4xf32>
    %372 = vector.extract_strided_slice %122 {offsets = [1, 0], sizes = [16, 4], strides = [1, 1]} : vector<18x4xf32> to vector<16x4xf32>
    %373 = arith.addf %371, %372 : vector<16x4xf32>
    %c0_112 = arith.constant 0 : index
    %c3_113 = arith.constant 3 : index
    %c0_114 = arith.constant 0 : index
    %c0_115 = arith.constant 0 : index
    %374 = vector.load %arg10[%c0_112, %c3_113, %c0_114, %c0_115] : memref<1x4x16x4xf32, #tpu.memory_space<vmem>>, vector<1x1x16x4xf32>
    %375 = vector.shape_cast %374 : vector<1x1x16x4xf32> to vector<16x4xf32>
    %376 = vector.shape_cast %373 : vector<16x4xf32> to vector<1x1x16x4xf32>
    tpu.vector_store %arg10[%c0_112, %c3_113, %c0_114, %c0_115], %376 {strides = array<i32>} : memref<1x4x16x4xf32, #tpu.memory_space<vmem>>, vector<1x1x16x4xf32>,
    return
  }
  func.func @transform_0(%arg0: i32) -> (i32, i32, i32, i32) {
    %c0_i32 = arith.constant 0 : i32
    %c0_i32_0 = arith.constant 0 : i32
    %c0_i32_1 = arith.constant 0 : i32
    %c0_i32_2 = arith.constant 0 : i32
    return %arg0, %c0_i32, %c0_i32_0, %c0_i32_1 : i32, i32, i32, i32
  }
  func.func @transform_1(%arg0: i32) -> (i32, i32, i32, i32) {
    %c0_i32 = arith.constant 0 : i32
    %c0_i32_0 = arith.constant 0 : i32
    %c0_i32_1 = arith.constant 0 : i32
    %c0_i32_2 = arith.constant 0 : i32
    return %arg0, %c0_i32, %c0_i32_0, %c0_i32_1 : i32, i32, i32, i32
  }
  func.func @transform_2(%arg0: i32) -> (i32, i32) {
    %c0_i32 = arith.constant 0 : i32
    %c0_i32_0 = arith.constant 0 : i32
    %c0_i32_1 = arith.constant 0 : i32
    return %c0_i32, %c0_i32_0 : i32, i32
  }
  func.func @transform_3(%arg0: i32) -> (i32, i32) {
    %c0_i32 = arith.constant 0 : i32
    %c0_i32_0 = arith.constant 0 : i32
    %c0_i32_1 = arith.constant 0 : i32
    return %c0_i32, %c0_i32_0 : i32, i32
  }
  func.func @transform_4(%arg0: i32) -> (i32, i32) {
    %c0_i32 = arith.constant 0 : i32
    %c0_i32_0 = arith.constant 0 : i32
    %c0_i32_1 = arith.constant 0 : i32
    return %c0_i32, %c0_i32_0 : i32, i32
  }
  func.func @transform_5(%arg0: i32) -> (i32, i32) {
    %c0_i32 = arith.constant 0 : i32
    %c0_i32_0 = arith.constant 0 : i32
    %c0_i32_1 = arith.constant 0 : i32
    return %c0_i32, %c0_i32_0 : i32, i32
  }
  func.func @transform_6(%arg0: i32) -> (i32, i32) {
    %c0_i32 = arith.constant 0 : i32
    %c0_i32_0 = arith.constant 0 : i32
    %c0_i32_1 = arith.constant 0 : i32
    return %c0_i32, %c0_i32_0 : i32, i32
  }
  func.func @transform_7(%arg0: i32) -> (i32, i32) {
    %c0_i32 = arith.constant 0 : i32
    %c0_i32_0 = arith.constant 0 : i32
    %c0_i32_1 = arith.constant 0 : i32
    return %c0_i32, %c0_i32_0 : i32, i32
  }
  func.func @transform_8(%arg0: i32) -> (i32, i32) {
    %c0_i32 = arith.constant 0 : i32
    %c0_i32_0 = arith.constant 0 : i32
    %c0_i32_1 = arith.constant 0 : i32
    return %c0_i32, %c0_i32_0 : i32, i32
  }
  func.func @transform_9(%arg0: i32) -> (i32, i32, i32, i32) {
    %c0_i32 = arith.constant 0 : i32
    %c0_i32_0 = arith.constant 0 : i32
    %c0_i32_1 = arith.constant 0 : i32
    %c0_i32_2 = arith.constant 0 : i32
    return %arg0, %c0_i32, %c0_i32_0, %c0_i32_1 : i32, i32, i32, i32
  }
}

</mosaic_0001>

<bundles_post_ra>
// kernel: swin_transformer_layer_l.4
= control target key start
LH: loop header
LB: loop body
LE: loop exit
PB: predicated region body
PF: predicated region fallthrough
CT: control target
= control target key end

     0   :  { %s952_s15 = smov 0   ;;  %s1441_s0 = inlined_call_operand.vmem [shape: f32[32,16,4], index: 0, kind: input, shape index: {}]   ;;  %s1442_s1 = inlined_call_operand.vmem [shape: f32[32,4,4], index: 1, kind: input, shape index: {}]   ;;  %s1443_s2 = inlined_call_operand.vmem [shape: f32[32,1,4], index: 2, kind: input, shape index: {}]   ;;  %s1444_s3 = inlined_call_operand.vmem [shape: f32[1,1,4], index: 3, kind: input, shape index: {}]   ;;  %s1445_s4 = inlined_call_operand.vmem [shape: f32[32,16,4], index: 4, kind: output, shape index: {}]  }
   0x1 LB: > { %s884_s16 = sadd.s32 4294967295, %s925_s15   ;;  %p888_p0 = scmp.ge.s32.totalorder %s925_s15, 1  ;;  %s925_s15 = sphi %s952_s15, %s14_s15  }
   0x2   : > { %p185_p1 = scmp.lt.s32.totalorder %s925_s15, 5 }
   0x4   : > { %p186_p2 = pnand %p888_p0, %p185_p1 }
   0x5   : > { %s889_s17 = sshll.u32 (!%p186_p2), %s884_s16, 3 }
   0x6   : > { %189 = sbr.rel (%p186_p2) target bundleno = 327 (0x147), region = 36  ;;  %p223_p3 = scmp.lt.s32.totalorder (!%p186_p2), %s889_s17, 31 }
   0xb   : > { %s1447_s17 = smov (!%p223_p3, %s889_s17), 31  ;;  %v910_v0 = vld [vmem:[%s1444_s3] ss:$0 sm:$0xff]  ;;  %vm283_vm0 = vcmask 27648   ;;  %vm332_vm1 = vcmask 31744  }
   0xc   : > { %s893_s20 = sshll.u32 %s1447_s17, 2  ;;  %s900_s24 = sshll.u32 %s1447_s17, 4 }
   0xd   : > { %s233_s23 = scalar_lea.vmem %s1442_s1, %s893_s20  ;;  %s996_s27 = scalar_lea.vmem %s1441_s0, %s900_s24 }
   0xe   : > { %v969_v1 = vld [vmem:[%s233_s23 + $0x10] sm:$0xf]  ;;  %v971_v2 = vld [vmem:[%s233_s23 + $0x8] sm:$0xf]  ;;  %v973_v3 = vld [vmem:[%s233_s23] sm:$0xf]  ;;  %s1197_s30 = scalar_lea.vmem %s1443_s2, %s1447_s17  ;;  %s1372_s7 = scalar_lea.vmem %s1445_s4, %s900_s24 }
   0xf   : > { %v279_v4 = vmul.f32 %v910_v0, %v969_v1  ;;  %v277_v5 = vmul.f32 %v910_v0, %v971_v2  ;;  %v275_v6 = vmul.f32 %v910_v0, %v973_v3  ;;  %v978_v7 = vld [vmem:[%s233_s23 + $0x14] sm:$0xf]  ;;  %v980_v8 = vld [vmem:[%s233_s23 + $0xc] sm:$0xf]  ;;  %v985_v12 = vld [vmem:[%s233_s23 + $0x4] sm:$0xf] }
  0x10   : > { %v280_v13 = vmul.f32 %v910_v0, %v978_v7  ;;  %v278_v14 = vmul.f32 %v910_v0, %v980_v8  ;;  %v276_v15 = vmul.f32 %v910_v0, %v985_v12  ;;  %v308_v18 = vperm.slane %v973_v3, 0  ;;  %v1002_v20 = vld [vmem:[%s233_s23 + $0x1c] sm:$0xf]  ;;  %v1005_v21 = vld [vmem:[%s996_s27] sm:$0xff]  ;;  %v1007_v22 = vld [vmem:[%s233_s23 + $0x18] sm:$0xf] }
  0x11   : > { %v296_v9 = vsel %vm283_vm0, %v279_v4, 0.0  ;;  %v290_v10 = vsel %vm283_vm0, %v277_v5, 0.0  ;;  %v284_v11 = vsel %vm283_vm0, %v275_v6, 0.0  ;;  %v282_v23 = vmul.f32 %v910_v0, %v1002_v20  ;;  %v1017_v30 = vld [vmem:[%s996_s27 + $0x10] sm:$0xff]  ;;  %v1020_v31 = vld [vmem:[%s996_s27 + $0x18] sm:$0xff]  ;;  %v1023_v32 = vld [vmem:[%s996_s27 + $0x8] sm:$0xff] }
  0x12   : > { %297 = vadd.xlane.f32.xlu2 %v296_v9  ;;  %291 = vadd.xlane.f32.xlu1 %v290_v10  ;;  %v299_v16 = vsel %vm283_vm0, %v280_v13, 0.0  ;;  %v293_v17 = vsel %vm283_vm0, %v278_v14, 0.0  ;;  %v287_v19 = vsel %vm283_vm0, %v276_v15, 0.0  ;;  %v316_v24 = vmul.f32 %v308_v18, %v1005_v21  ;;  %v1034_v41 = vld [vmem:[%s996_s27 + $0x28] sm:$0xff]  ;;  %v1037_v42 = vld [vmem:[%s996_s27 + $0x30] sm:$0xff]  ;;  %v1040_v43 = vld [vmem:[%s996_s27 + $0x20] sm:$0xff] }
  0x13   : > { %285 = vadd.xlane.f32.xlu0 %v284_v11  ;;  %v281_v25 = vmul.f32 %v910_v0, %v1007_v22  ;;  %v305_v26 = vsel %vm283_vm0, %v282_v23, 0.0  ;;  %v309_v28 = vperm.slane %v985_v12, 0  ;;  %v317_v35 = vmul.f32 %v308_v18, %v1023_v32  ;;  %v1050_v51 = vld [vmem:[%s996_s27 + $0x40] sm:$0xff]  ;;  %v1053_v52 = vld [vmem:[%s996_s27 + $0x48] sm:$0xff]  ;;  %v1056_v53 = vld [vmem:[%s996_s27 + $0x38] sm:$0xff] }
  0x14   : > { %v333_v27 = vsel %vm332_vm1, %v316_v24, 0.0  ;;  %v310_v38 = vperm.slane %v971_v2, 0  ;;  %v311_v39 = vperm.slane %v980_v8, 0  ;;  %v312_v49 = vperm.slane %v969_v1, 0  ;;  %v1067_v62 = vld [vmem:[%s996_s27 + $0x58] sm:$0xff]  ;;  %v1070_v63 = vld [vmem:[%s996_s27 + $0x60] sm:$0xff] }
  0x15   : > { %v302_v29 = vsel %vm283_vm0, %v281_v25, 0.0  ;;  %v318_v33 = vmul.f32 %v309_v28, %v1017_v30  ;;  %v319_v34 = vmul.f32 %v309_v28, %v1020_v31  ;;  %v336_v40 = vsel %vm332_vm1, %v317_v35, 0.0  ;;  %v1073_v0 = vld [vmem:[%s996_s27 + $0x50] sm:$0xff]  ;;  %v1086_v15 = vld [vmem:[%s996_s27 + $0x78] sm:$0xff] }
  0x16   : > { %v321_v44 = vmul.f32 %v310_v38, %v1034_v41  ;;  %v322_v45 = vmul.f32 %v311_v39, %v1037_v42  ;;  %v320_v46 = vmul.f32 %v310_v38, %v1040_v43  ;;  %v324_v54 = vmul.f32 %v312_v49, %v1050_v51  ;;  %v1083_v14 = vld [vmem:[%s996_s27 + $0x70] sm:$0xff] }
  0x17   : > { %v339_v36 = vsel %vm332_vm1, %v318_v33, 0.0  ;;  %v342_v37 = vsel %vm332_vm1, %v319_v34, 0.0  ;;  %v325_v55 = vmul.f32 %v312_v49, %v1053_v52  ;;  %v323_v56 = vmul.f32 %v311_v39, %v1056_v53 }
  0x18   : > { %v348_v47 = vsel %vm332_vm1, %v321_v44, 0.0  ;;  %v351_v48 = vsel %vm332_vm1, %v322_v45, 0.0  ;;  %v345_v50 = vsel %vm332_vm1, %v320_v46, 0.0  ;;  %v357_v57 = vsel %vm332_vm1, %v324_v54, 0.0 }
  0x19   : > { %v360_v58 = vsel %vm332_vm1, %v325_v55, 0.0  ;;  %v313_v59 = vperm.slane %v978_v7, 0  ;;  %v314_v60 = vperm.slane %v1007_v22, 0  ;;  %v354_v61 = vsel %vm332_vm1, %v323_v56, 0.0 }
  0x1a   : > { %300 = vadd.xlane.f32.xlu2 %v299_v16  ;;  %294 = vadd.xlane.f32.xlu1 %v293_v17  ;;  %v315_v11 = vperm.slane %v1002_v20, 0  ;;  %v1089_v16 = vld [vmem:[%s996_s27 + $0x68] sm:$0xff]  ;;  %v405_v25 = vperm.slane %v973_v3, 1  ;;  %v408_v46 = vperm.slane %v980_v8, 1 }
  0x1b   : > { %288 = vadd.xlane.f32.xlu0 %v287_v19  ;;  %v327_v4 = vmul.f32 %v313_v59, %v1067_v62  ;;  %v328_v5 = vmul.f32 %v314_v60, %v1070_v63  ;;  %v326_v6 = vmul.f32 %v313_v59, %v1073_v0  ;;  %v329_v19 = vmul.f32 %v314_v60, %v1089_v16 }
  0x1c   : > { %v330_v17 = vmul.f32 %v315_v11, %v1083_v14  ;;  %v331_v18 = vmul.f32 %v315_v11, %v1086_v15  ;;  %v414_v28 = vmul.f32 %v405_v25, %v1023_v32  ;;  %v413_v33 = vmul.f32 %v405_v25, %v1005_v21 }
  0x1d   : > { %v366_v9 = vsel %vm332_vm1, %v327_v4, 0.0  ;;  %v369_v10 = vsel %vm332_vm1, %v328_v5, 0.0  ;;  %v363_v13 = vsel %vm332_vm1, %v326_v6, 0.0  ;;  %v420_v49 = vmul.f32 %v408_v46, %v1056_v53 }
  0x1e   : > { %v375_v23 = vsel %vm332_vm1, %v330_v17, 0.0  ;;  %v378_v24 = vsel %vm332_vm1, %v331_v18, 0.0  ;;  %v432_v34 = vsel %vm332_vm1, %v414_v28, 0.0  ;;  %v419_v54 = vmul.f32 %v408_v46, %v1037_v42 }
  0x1f   : > { %v450_v55 = vsel %vm332_vm1, %v420_v49, 0.0  ;;  %v411_v6 = vperm.slane %v1007_v22, 1 }
  0x21   : > { %v426_v11 = vmul.f32 %v411_v6, %v1089_v16  ;;  %v425_v17 = vmul.f32 %v411_v6, %v1070_v63 }
  0x22   : > { %306 = vadd.xlane.f32.xlu1 %v305_v26  ;;  %334 = vadd.xlane.f32.xlu2 %v333_v27  ;;  %v406_v26 = vperm.slane %v985_v12, 1  ;;  %v372_v27 = vsel %vm332_vm1, %v329_v19, 0.0 }
  0x23   : > { %303 = vadd.xlane.f32.xlu0 %v302_v29  ;;  %v468_v18 = vsel %vm332_vm1, %v426_v11, 0.0 }
  0x24   : > { %v415_v29 = vmul.f32 %v406_v26, %v1017_v30 }
  0x26   : > { %v435_v35 = vsel %vm332_vm1, %v415_v29, 0.0 }
  0x2a   : > { %340 = vadd.xlane.f32.xlu1 %v339_v36  ;;  %343 = vadd.xlane.f32.xlu2 %v342_v37  ;;  %v407_v36 = vperm.slane %v971_v2, 1  ;;  %v429_v37 = vsel %vm332_vm1, %v413_v33, 0.0  ;;  %v518_v33 = vperm.slane %v985_v12, 2 }
  0x2b   : > { %337 = vadd.xlane.f32.xlu0 %v336_v40  ;;  %v416_v40 = vmul.f32 %v406_v26, %v1020_v31 }
  0x2c   : > { %v417_v38 = vmul.f32 %v407_v36, %v1040_v43  ;;  %v418_v39 = vmul.f32 %v407_v36, %v1034_v41  ;;  %v528_v36 = vmul.f32 %v518_v33, %v1020_v31 }
  0x2e   : > { %v441_v44 = vsel %vm332_vm1, %v417_v38, 0.0  ;;  %v444_v45 = vsel %vm332_vm1, %v418_v39, 0.0  ;;  %v527_v38 = vmul.f32 %v518_v33, %v1017_v30  ;;  %v550_v39 = vsel %vm332_vm1, %v528_v36, 0.0 }
  0x32   : > { %349 = vadd.xlane.f32.xlu1 %v348_v47  ;;  %352 = vadd.xlane.f32.xlu2 %v351_v48  ;;  %v409_v47 = vperm.slane %v969_v1, 1  ;;  %v438_v48 = vsel %vm332_vm1, %v416_v40, 0.0 }
  0x33   : > { %346 = vadd.xlane.f32.xlu0 %v345_v50 }
  0x34   : > { %v421_v50 = vmul.f32 %v409_v47, %v1050_v51 }
  0x36   : > { %v453_v56 = vsel %vm332_vm1, %v421_v50, 0.0 }
  0x3a   : > { %358 = vadd.xlane.f32.xlu1 %v357_v57  ;;  %361 = vadd.xlane.f32.xlu2 %v360_v58  ;;  %v410_v57 = vperm.slane %v978_v7, 1  ;;  %v447_v58 = vsel %vm332_vm1, %v419_v54, 0.0 }
  0x3b   : > { %355 = vadd.xlane.f32.xlu0 %v354_v61  ;;  %v422_v61 = vmul.f32 %v409_v47, %v1053_v52 }
  0x3c   : > { %v423_v59 = vmul.f32 %v410_v57, %v1073_v0  ;;  %v424_v60 = vmul.f32 %v410_v57, %v1067_v62  ;;  %v521_v57 = vperm.slane %v969_v1, 2 }
  0x3e   : > { %v459_v4 = vsel %vm332_vm1, %v423_v59, 0.0  ;;  %v462_v5 = vsel %vm332_vm1, %v424_v60, 0.0  ;;  %v534_v60 = vmul.f32 %v521_v57, %v1053_v52 }
  0x42   : > { %367 = vadd.xlane.f32.xlu1 %v366_v9  ;;  %370 = vadd.xlane.f32.xlu2 %v369_v10  ;;  %v412_v9 = vperm.slane %v1002_v20, 1  ;;  %v456_v10 = vsel %vm332_vm1, %v422_v61, 0.0 }
  0x43   : > { %364 = vadd.xlane.f32.xlu0 %v363_v13 }
  0x44   : > { %v427_v13 = vmul.f32 %v412_v9, %v1083_v14 }
  0x46   : > { %v471_v19 = vsel %vm332_vm1, %v427_v13, 0.0  ;;  %v523_v13 = vperm.slane %v1007_v22, 2 }
  0x4a   : > { %376 = vadd.xlane.f32.xlu1 %v375_v23  ;;  %379 = vadd.xlane.f32.xlu2 %v378_v24  ;;  %v517_v23 = vperm.slane %v973_v3, 2  ;;  %v465_v24 = vsel %vm332_vm1, %v425_v17, 0.0 }
  0x4b   : > { %373 = vadd.xlane.f32.xlu0 %v372_v27  ;;  %v428_v27 = vmul.f32 %v412_v9, %v1086_v15 }
  0x4c   : > { %v525_v25 = vmul.f32 %v517_v23, %v1005_v21  ;;  %v526_v26 = vmul.f32 %v517_v23, %v1023_v32 }
  0x4e   : > { %v541_v28 = vsel %vm332_vm1, %v525_v25, 0.0  ;;  %v544_v29 = vsel %vm332_vm1, %v526_v26, 0.0 }
  0x52   : > { %433 = vadd.xlane.f32.xlu1 %v432_v34  ;;  %436 = vadd.xlane.f32.xlu2 %v435_v35  ;;  %v519_v34 = vperm.slane %v971_v2, 2  ;;  %v474_v35 = vsel %vm332_vm1, %v428_v27, 0.0 }
  0x53   : > { %430 = vadd.xlane.f32.xlu0 %v429_v37 }
  0x54   : > { %v529_v37 = vmul.f32 %v519_v34, %v1040_v43 }
  0x56   : > { %v553_v40 = vsel %vm332_vm1, %v529_v37, 0.0 }
  0x5a   : > { %442 = vadd.xlane.f32.xlu1 %v441_v44  ;;  %445 = vadd.xlane.f32.xlu2 %v444_v45  ;;  %v520_v44 = vperm.slane %v980_v8, 2  ;;  %v547_v45 = vsel %vm332_vm1, %v527_v38, 0.0 }
  0x5b   : > { %439 = vadd.xlane.f32.xlu0 %v438_v48  ;;  %v530_v48 = vmul.f32 %v519_v34, %v1034_v41  ;;  %v524_v34 = vperm.slane %v1002_v20, 2 }
  0x5c   : > { %v531_v46 = vmul.f32 %v520_v44, %v1037_v42  ;;  %v532_v47 = vmul.f32 %v520_v44, %v1056_v53 }
  0x5d   : > { %v556_v59 = vsel %vm332_vm1, %v530_v48, 0.0  ;;  %v540_v38 = vmul.f32 %v524_v34, %v1086_v15  ;;  %v630_v48 = vperm.slane %v985_v12, 3 }
  0x62   : > { %451 = vadd.xlane.f32.xlu1 %v450_v55  ;;  %454 = vadd.xlane.f32.xlu2 %v453_v56  ;;  %v559_v55 = vsel %vm332_vm1, %v531_v46, 0.0  ;;  %v562_v56 = vsel %vm332_vm1, %v532_v47, 0.0 }
  0x63   : > { %448 = vadd.xlane.f32.xlu0 %v447_v58  ;;  %v522_v58 = vperm.slane %v978_v7, 2 }
  0x65   : > { %v535_v61 = vmul.f32 %v522_v58, %v1073_v0 }
  0x67   : > { %v571_v11 = vsel %vm332_vm1, %v535_v61, 0.0 }
  0x6a   : > { %460 = vadd.xlane.f32.xlu1 %v459_v4  ;;  %463 = vadd.xlane.f32.xlu2 %v462_v5  ;;  %v533_v4 = vmul.f32 %v521_v57, %v1050_v51 }
  0x6b   : > { %457 = vadd.xlane.f32.xlu0 %v456_v10  ;;  %v568_v10 = vsel %vm332_vm1, %v534_v60, 0.0 }
  0x6c   : > { %v565_v17 = vsel %vm332_vm1, %v533_v4, 0.0 }
  0x72   : > { %469 = vadd.xlane.f32.xlu1 %v468_v18  ;;  %472 = vadd.xlane.f32.xlu2 %v471_v19  ;;  %v537_v18 = vmul.f32 %v523_v13, %v1070_v63  ;;  %v538_v19 = vmul.f32 %v523_v13, %v1089_v16 }
  0x73   : > { %466 = vadd.xlane.f32.xlu0 %v465_v24  ;;  %v536_v24 = vmul.f32 %v522_v58, %v1067_v62 }
  0x74   : > { %v580_v33 = vsel %vm332_vm1, %v538_v19, 0.0 }
  0x75   : > { %v574_v36 = vsel %vm332_vm1, %v536_v24, 0.0 }
  0x7a   : > { %542 = vadd.xlane.f32.xlu1 %v541_v28  ;;  %545 = vadd.xlane.f32.xlu2 %v544_v29  ;;  %v577_v29 = vsel %vm332_vm1, %v537_v18, 0.0 }
  0x7b   : > { %475 = vadd.xlane.f32.xlu0 %v474_v35  ;;  %v629_v35 = vperm.slane %v973_v3, 3 }
  0x7d   : > { %v638_v12 = vmul.f32 %v629_v35, %v1023_v32 }
  0x7f   : > { %v656_v24 = vsel %vm332_vm1, %v638_v12, 0.0 }
  0x82   : > { %551 = vadd.xlane.f32.xlu1 %v550_v39  ;;  %554 = vadd.xlane.f32.xlu2 %v553_v40  ;;  %v637_v39 = vmul.f32 %v629_v35, %v1005_v21  ;;  %v539_v40 = vmul.f32 %v524_v34, %v1083_v14  ;;  %v639_v21 = vmul.f32 %v630_v48, %v1017_v30 }
  0x83   : > { %548 = vadd.xlane.f32.xlu0 %v547_v45 }
  0x84   : > { %v653_v57 = vsel %vm332_vm1, %v637_v39, 0.0  ;;  %v583_v58 = vsel %vm332_vm1, %v539_v40, 0.0  ;;  %v659_v18 = vsel %vm332_vm1, %v639_v21, 0.0 }
  0x85   : > { %v1154_v49 = vpop.xlane.xlu2 %297  ;;  %v1156_v50 = vpop.xlane.xlu1 %291 }
  0x86   : > { %v1158_v54 = vpop.xlane.xlu0 %285  ;;  %v383_v60 = vperm.slane %v1156_v50, 0 }
  0x87   : > { %v381_v23 = vperm.slane %v1158_v54, 0 }
  0x8a   : > { %560 = vadd.xlane.f32.xlu1 %v559_v55  ;;  %563 = vadd.xlane.f32.xlu2 %v562_v56  ;;  %v586_v56 = vsel %vm332_vm1, %v540_v38, 0.0 }
  0x8b   : > { %557 = vadd.xlane.f32.xlu0 %v556_v59  ;;  %v640_v59 = vmul.f32 %v630_v48, %v1020_v31  ;;  %v631_v31 = vperm.slane %v971_v2, 3 }
  0x8d   : > { %v1168_v5 = vpop.xlane.xlu2 %300  ;;  %v1170_v6 = vpop.xlane.xlu1 %294  ;;  %v662_v30 = vsel %vm332_vm1, %v640_v59, 0.0  ;;  %v642_v32 = vmul.f32 %v631_v31, %v1034_v41 }
  0x8e   : > { %v1172_v9 = vpop.xlane.xlu0 %288  ;;  %v384_v61 = vperm.slane %v1170_v6, 0 }
  0x8f   : > { %v382_v37 = vperm.slane %v1172_v9, 0  ;;  %v668_v39 = vsel %vm332_vm1, %v642_v32, 0.0 }
  0x92   : > { %569 = vadd.xlane.f32.xlu1 %v568_v10  ;;  %572 = vadd.xlane.f32.xlu2 %v571_v11 }
  0x93   : > { %566 = vadd.xlane.f32.xlu0 %v565_v17 }
  0x95   : > { %v1182_v25 = vpop.xlane.xlu1 %306  ;;  %v335_v26 = vpop.xlane.xlu2 %334 }
  0x96   : > { %v1184_v27 = vpop.xlane.xlu0 %303  ;;  %v1186_v28 = vadd.f32 %v381_v23, %v335_v26 }
  0x9a   : > { %578 = vadd.xlane.f32.xlu1 %v577_v29  ;;  %581 = vadd.xlane.f32.xlu2 %v580_v33  ;;  %v385_v29 = vperm.slane %v1154_v49, 0  ;;  %v641_v33 = vmul.f32 %v631_v31, %v1040_v43 }
  0x9b   : > { %575 = vadd.xlane.f32.xlu0 %v574_v36 }
  0x9d   : > { %v341_v44 = vpop.xlane.xlu1 %340  ;;  %v344_v3 = vpop.xlane.xlu2 %343 }
  0x9e   : > { %v1203_v45 = vadd.f32 %v382_v37, %v341_v44  ;;  %v338_v46 = vpop.xlane.xlu0 %337  ;;  %v1205_v47 = vadd.f32 %v382_v37, %v344_v3  ;;  %v386_v44 = vperm.slane %v1168_v5, 0  ;;  %v387_v3 = vperm.slane %v1184_v27, 0 }
  0x9f   : > { %v1208_v55 = vadd.f32 %v381_v23, %v338_v46  ;;  %v632_v23 = vperm.slane %v980_v8, 3  ;;  %v633_v8 = vperm.slane %v969_v1, 3 }
  0xa1   : > { %v643_v26 = vmul.f32 %v632_v23, %v1037_v42  ;;  %v665_v42 = vsel %vm332_vm1, %v641_v33, 0.0  ;;  %v645_v43 = vmul.f32 %v633_v8, %v1050_v51  ;;  %v646_v40 = vmul.f32 %v633_v8, %v1053_v52 }
  0xa2   : > { %587 = vadd.xlane.f32.xlu1 %v586_v56  ;;  %654 = vadd.xlane.f32.xlu2 %v653_v57  ;;  %v644_v1 = vmul.f32 %v632_v23, %v1056_v53  ;;  %v634_v52 = vperm.slane %v978_v7, 3 }
  0xa3   : > { %584 = vadd.xlane.f32.xlu0 %v583_v58  ;;  %v671_v41 = vsel %vm332_vm1, %v643_v26, 0.0  ;;  %v677_v21 = vsel %vm332_vm1, %v645_v43, 0.0  ;;  %v680_v51 = vsel %vm332_vm1, %v646_v40, 0.0  ;;  %v477_v26 = vperm.slane %v1158_v54, 1 }
  0xa4   : > { %v648_v53 = vmul.f32 %v634_v52, %v1067_v62  ;;  %v636_v62 = vperm.slane %v1002_v20, 3  ;;  %v479_v40 = vperm.slane %v1156_v50, 1 }
  0xa5   : > { %v350_v4 = vpop.xlane.xlu1 %349  ;;  %v353_v10 = vpop.xlane.xlu2 %352 }
  0xa6   : > { %v1218_v11 = vadd.f32 %v383_v60, %v350_v4  ;;  %v347_v13 = vpop.xlane.xlu0 %346  ;;  %v1220_v17 = vadd.f32 %v384_v61, %v353_v10  ;;  %v388_v4 = vperm.slane %v1182_v25, 0  ;;  %v647_v10 = vmul.f32 %v634_v52, %v1073_v0 }
  0xa7   : > { %v1223_v19 = vadd.f32 %v383_v60, %v347_v13  ;;  %v635_v60 = vperm.slane %v1007_v22, 3  ;;  %v686_v23 = vsel %vm332_vm1, %v648_v53, 0.0  ;;  %v651_v0 = vmul.f32 %v636_v62, %v1083_v14 }
  0xa8   : > { %v652_v32 = vmul.f32 %v636_v62, %v1086_v15  ;;  %v481_v52 = vperm.slane %v1154_v49, 1 }
  0xa9   : > { %v649_v12 = vmul.f32 %v635_v60, %v1070_v63  ;;  %v683_v63 = vsel %vm332_vm1, %v647_v10, 0.0  ;;  %v650_v33 = vmul.f32 %v635_v60, %v1089_v16 }
  0xaa   : > { %660 = vadd.xlane.f32.xlu1 %v659_v18  ;;  %663 = vadd.xlane.f32.xlu2 %v662_v30  ;;  %v698_v14 = vsel %vm332_vm1, %v652_v32, 0.0 }
  0xab   : > { %657 = vadd.xlane.f32.xlu0 %v656_v24  ;;  %v689_v24 = vsel %vm332_vm1, %v649_v12, 0.0  ;;  %v692_v16 = vsel %vm332_vm1, %v650_v33, 0.0 }
  0xad   : > { %v359_v34 = vpop.xlane.xlu1 %358  ;;  %v362_v35 = vpop.xlane.xlu2 %361 }
  0xae   : > { %v1233_v36 = vadd.f32 %v385_v29, %v359_v34  ;;  %v356_v2 = vpop.xlane.xlu0 %355  ;;  %v1235_v37 = vadd.f32 %v385_v29, %v362_v35  ;;  %v478_v29 = vperm.slane %v1172_v9, 1 }
  0xaf   : > { %v1238_v38 = vadd.f32 %v384_v61, %v356_v2  ;;  %v674_v61 = vsel %vm332_vm1, %v644_v1, 0.0 }
  0xb2   : > { %669 = vadd.xlane.f32.xlu1 %v668_v39  ;;  %672 = vadd.xlane.f32.xlu2 %v671_v41  ;;  %v695_v41 = vsel %vm332_vm1, %v651_v0, 0.0 }
  0xb3   : > { %666 = vadd.xlane.f32.xlu0 %v665_v42 }
  0xb5   : > { %v368_v46 = vpop.xlane.xlu1 %367  ;;  %v371_v48 = vpop.xlane.xlu2 %370 }
  0xb6   : > { %v1248_v56 = vadd.f32 %v386_v44, %v368_v46  ;;  %v365_v57 = vpop.xlane.xlu0 %364  ;;  %v1250_v58 = vadd.f32 %v387_v3, %v371_v48 }
  0xb7   : > { %v1253_v59 = vadd.f32 %v386_v44, %v365_v57 }
  0xba   : > { %678 = vadd.xlane.f32.xlu1 %v677_v21  ;;  %681 = vadd.xlane.f32.xlu2 %v680_v51 }
  0xbb   : > { %675 = vadd.xlane.f32.xlu0 %v674_v61 }
  0xbd   : > { %v377_v13 = vpop.xlane.xlu1 %376  ;;  %v380_v18 = vpop.xlane.xlu2 %379 }
  0xbe   : > { %v1263_v30 = vadd.f32 %v388_v4, %v377_v13  ;;  %v374_v7 = vpop.xlane.xlu0 %373  ;;  %v1265_v31 = vadd.f32 %v388_v4, %v380_v18 }
  0xbf   : > { %v1267_v22 = vadd.f32 %v387_v3, %v374_v7 }
  0xc2   : > { %687 = vadd.xlane.f32.xlu1 %v686_v23  ;;  %690 = vadd.xlane.f32.xlu2 %v689_v24 }
  0xc3   : > { %684 = vadd.xlane.f32.xlu0 %v683_v63 }
  0xc5   : > { %v434_v34 = vpop.xlane.xlu1 %433  ;;  %v437_v35 = vpop.xlane.xlu2 %436 }
  0xc6   : > { %v1278_v2 = vadd.f32 %v477_v26, %v434_v34  ;;  %v431_v20 = vpop.xlane.xlu0 %430  ;;  %v1280_v8 = vadd.f32 %v478_v29, %v437_v35 }
  0xc7   : > { %v485_v39 = vadd.f32 %v477_v26, %v431_v20 }
  0xc8   : > { %v502_v15 = vmax.f32 %v1208_v55, %v1278_v2  ;;  %v503_v42 = vmax.f32 %v1203_v45, %v1280_v8  ;;  %v593_v45 = vperm.slane %v1154_v49, 2  ;;  %v594_v8 = vperm.slane %v1168_v5, 2 }
  0xc9   : > { %v501_v43 = vmax.f32 %v1186_v28, %v485_v39  ;;  %v480_v28 = vperm.slane %v1170_v6, 1 }
  0xca   : > { %696 = vadd.xlane.f32.xlu1 %v695_v41  ;;  %699 = vadd.xlane.f32.xlu2 %v698_v14 }
  0xcb   : > { %693 = vadd.xlane.f32.xlu0 %v692_v16 }
  0xcd   : > { %v443_v44 = vpop.xlane.xlu1 %442  ;;  %v446_v3 = vpop.xlane.xlu2 %445 }
  0xce   : > { %v489_v1 = vadd.f32 %v479_v40, %v443_v44  ;;  %v440_v46 = vpop.xlane.xlu0 %439  ;;  %v1291_v48 = vadd.f32 %v479_v40, %v446_v3 }
  0xcf   : > { %v488_v57 = vadd.f32 %v478_v29, %v440_v46  ;;  %v483_v29 = vperm.slane %v1184_v27, 1 }
  0xd0   : > { %v505_v55 = vmax.f32 %v1223_v19, %v489_v1  ;;  %v506_v21 = vmax.f32 %v1218_v11, %v1291_v48  ;;  %v595_v48 = vperm.slane %v1184_v27, 2 }
  0xd1   : > { %v504_v51 = vmax.f32 %v1205_v47, %v488_v57  ;;  %v482_v47 = vperm.slane %v1168_v5, 1 }
  0xd5   : > { %v452_v60 = vpop.xlane.xlu1 %451  ;;  %v455_v61 = vpop.xlane.xlu2 %454 }
  0xd6   : > { %v492_v53 = vadd.f32 %v480_v28, %v452_v60  ;;  %v449_v12 = vpop.xlane.xlu0 %448  ;;  %v1299_v4 = vadd.f32 %v481_v52, %v455_v61  ;;  %v591_v60 = vperm.slane %v1156_v50, 2 }
  0xd7   : > { %v491_v10 = vadd.f32 %v480_v28, %v449_v12 }
  0xd8   : > { %v508_v13 = vmax.f32 %v1238_v38, %v492_v53  ;;  %v509_v19 = vmax.f32 %v1233_v36, %v1299_v4  ;;  %v596_v4 = vperm.slane %v1182_v25, 2 }
  0xd9   : > { %v507_v18 = vmax.f32 %v1220_v17, %v491_v10  ;;  %v484_v17 = vperm.slane %v1182_v25, 1 }
  0xdd   : > { %v461_v7 = vpop.xlane.xlu1 %460  ;;  %v464_v23 = vpop.xlane.xlu2 %463 }
  0xde   : > { %v495_v24 = vadd.f32 %v482_v47, %v461_v7  ;;  %v458_v62 = vpop.xlane.xlu0 %457  ;;  %v1306_v63 = vadd.f32 %v482_v47, %v464_v23 }
  0xdf   : > { %v494_v0 = vadd.f32 %v481_v52, %v458_v62 }
  0xe0   : > { %v511_v32 = vmax.f32 %v1253_v59, %v495_v24  ;;  %v512_v26 = vmax.f32 %v1248_v56, %v1306_v63  ;;  %v702_v63 = vperm.slane %v1172_v9, 3 }
  0xe1   : > { %v510_v38 = vmax.f32 %v1235_v37, %v494_v0  ;;  %v589_v37 = vperm.slane %v1158_v54, 2 }
  0xe5   : > { %v470_v33 = vpop.xlane.xlu1 %469  ;;  %v473_v34 = vpop.xlane.xlu2 %472 }
  0xe6   : > { %v498_v35 = vadd.f32 %v483_v29, %v470_v33  ;;  %v467_v2 = vpop.xlane.xlu0 %466  ;;  %v1314_v20 = vadd.f32 %v484_v17, %v473_v34 }
  0xe7   : > { %v497_v39 = vadd.f32 %v483_v29, %v467_v2 }
  0xe8   : > { %v514_v41 = vmax.f32 %v1267_v22, %v498_v35  ;;  %v515_v59 = vmax.f32 %v1263_v30, %v1314_v20  ;;  %v590_v22 = vperm.slane %v1172_v9, 2  ;;  %v703_v9 = vperm.slane %v1156_v50, 3 }
  0xe9   : > { %v513_v14 = vmax.f32 %v1250_v58, %v497_v39 }
  0xed   : > { %v543_v16 = vpop.xlane.xlu1 %542  ;;  %v546_v40 = vpop.xlane.xlu2 %545 }
  0xee   : > { %v597_v44 = vadd.f32 %v589_v37, %v543_v16  ;;  %v476_v3 = vpop.xlane.xlu0 %475  ;;  %v598_v1 = vadd.f32 %v589_v37, %v546_v40 }
  0xef   : > { %v500_v46 = vadd.f32 %v484_v17, %v476_v3 }
  0xf0   : > { %v613_v57 = vmax.f32 %v501_v43, %v597_v44  ;;  %v1321_v28 = vmax.f32 %v502_v15, %v598_v1  ;;  %v592_v43 = vperm.slane %v1170_v6, 2 }
  0xf1   : > { %v516_v52 = vmax.f32 %v1265_v31, %v500_v46 }
  0xf5   : > { %v552_v61 = vpop.xlane.xlu1 %551  ;;  %v555_v53 = vpop.xlane.xlu2 %554 }
  0xf6   : > { %v600_v58 = vadd.f32 %v590_v22, %v552_v61  ;;  %v549_v12 = vpop.xlane.xlu0 %548  ;;  %v601_v10 = vadd.f32 %v591_v60, %v555_v53  ;;  %v911_v53 = vld [vmem:[%s1197_s30] ss:$0 sm:$0xff] }
  0xf7   : > { %v599_v47 = vadd.f32 %v590_v22, %v549_v12 }
  0xf8   : > { %v616_v7 = vmax.f32 %v504_v51, %v600_v58  ;;  %v1326_v23 = vmax.f32 %v505_v55, %v601_v10 }
  0xf9   : > { %v615_v15 = vmax.f32 %v503_v42, %v599_v47 }
  0xfd   : > { %v561_v31 = vpop.xlane.xlu1 %560  ;;  %v564_v24 = vpop.xlane.xlu2 %563 }
  0xfe   : > { %v603_v62 = vadd.f32 %v592_v43, %v561_v31  ;;  %v558_v0 = vpop.xlane.xlu0 %557  ;;  %v604_v29 = vadd.f32 %v592_v43, %v564_v24 }
  0xff   : > { %v602_v17 = vadd.f32 %v591_v60, %v558_v0 }
 0x100   : > { %v1332_v33 = vmax.f32 %v507_v18, %v603_v62  ;;  %v1334_v34 = vmax.f32 %v508_v13, %v604_v29  ;;  %v704_v29 = vperm.slane %v1170_v6, 3 }
 0x101   : > { %v1339_v55 = vmax.f32 %v506_v21, %v602_v17 }
 0x105   : > { %v570_v42 = vpop.xlane.xlu1 %569  ;;  %v573_v51 = vpop.xlane.xlu2 %572 }
 0x106   : > { %v606_v35 = vadd.f32 %v593_v45, %v570_v42  ;;  %v567_v2 = vpop.xlane.xlu0 %566  ;;  %v607_v39 = vadd.f32 %v594_v8, %v573_v51 }
 0x107   : > { %v605_v37 = vadd.f32 %v593_v45, %v567_v2 }
 0x108   : > { %v1343_v16 = vmax.f32 %v510_v38, %v606_v35  ;;  %v1345_v18 = vmax.f32 %v511_v32, %v607_v39 }
 0x109   : > { %v1350_v11 = vmax.f32 %v509_v19, %v605_v37  ;;  %v701_v19 = vperm.slane %v1158_v54, 3 }
 0x10d   : > { %v579_v21 = vpop.xlane.xlu1 %578  ;;  %v582_v13 = vpop.xlane.xlu2 %581 }
 0x10e   : > { %v609_v40 = vadd.f32 %v595_v48, %v579_v21  ;;  %v576_v44 = vpop.xlane.xlu0 %575  ;;  %v610_v3 = vadd.f32 %v595_v48, %v582_v13  ;;  %v705_v48 = vperm.slane %v1154_v49, 3 }
 0x10f   : > { %v608_v1 = vadd.f32 %v594_v8, %v576_v44  ;;  %v914_v8 = vld [vmem:[%s1197_s30 + $0x3] ss:$0 sm:$0xff] }
 0x110   : > { %v1353_v46 = vmax.f32 %v513_v14, %v609_v40  ;;  %v1355_v38 = vmax.f32 %v514_v41, %v610_v3 }
 0x111   : > { %v1360_v36 = vmax.f32 %v512_v26, %v608_v1 }
 0x115   : > { %v588_v32 = vpop.xlane.xlu1 %587  ;;  %v655_v22 = vpop.xlane.xlu2 %654 }
 0x116   : > { %v612_v60 = vadd.f32 %v596_v4, %v588_v32  ;;  %v585_v61 = vpop.xlane.xlu0 %584  ;;  %v709_v58 = vadd.f32 %v701_v19, %v655_v22  ;;  %v706_v22 = vperm.slane %v1168_v5, 3 }
 0x117   : > { %v611_v14 = vadd.f32 %v596_v4, %v585_v61 }
 0x118   : > { %v1365_v12 = vmax.f32 %v516_v52, %v612_v60  ;;  %v725_v41 = vmax.f32 %v613_v57, %v709_v58  ;;  %v912_v52 = vld [vmem:[%s1197_s30 + $0x1] ss:$0 sm:$0xff]  ;;  %v707_v60 = vperm.slane %v1184_v27, 3  ;;  %v917_v58 = vld [vmem:[%s1197_s30 + $0x6] ss:$0 sm:$0xff] }
 0x119   : > { %v1377_v54 = vmax.f32 %v515_v59, %v611_v14 }
 0x11a   : > { %v773_v56 = vmul.f32 %v911_v53, %v725_v41 }
 0x11c   : > { %789 = vst.msk [vmem:[%s1372_s7] sm:$0xff] %vm332_vm1, %v773_v56 }
 0x11d   : > { %v661_v26 = vpop.xlane.xlu1 %660  ;;  %v664_v57 = vpop.xlane.xlu2 %663 }
 0x11e   : > { %v711_v10 = vadd.f32 %v702_v63, %v661_v26  ;;  %v658_v47 = vpop.xlane.xlu0 %657  ;;  %v712_v43 = vadd.f32 %v702_v63, %v664_v57 }
 0x11f   : > { %v710_v31 = vadd.f32 %v701_v19, %v658_v47 }
 0x120   : > { %v727_v30 = vmax.f32 %v615_v15, %v711_v10  ;;  %v728_v20 = vmax.f32 %v616_v7, %v712_v43  ;;  %v913_v7 = vld [vmem:[%s1197_s30 + $0x2] ss:$0 sm:$0xff] }
 0x121   : > { %v726_v59 = vmax.f32 %v1321_v28, %v710_v31 }
 0x122   : > { %v775_v24 = vmul.f32 %v912_v52, %v727_v30  ;;  %v776_v62 = vmul.f32 %v912_v52, %v728_v20  ;;  %v708_v52 = vperm.slane %v1182_v25, 3 }
 0x123   : > { %v774_v0 = vmul.f32 %v911_v53, %v726_v59 }
 0x124   : > { %791 = vst.msk [vmem:[%s1372_s7 + $0x10] sm:$0xff] %vm332_vm1, %v775_v24 }
 0x125   : > { %790 = vst.msk [vmem:[%s1372_s7 + $0x8] sm:$0xff] %vm332_vm1, %v774_v0  ;;  %v670_v17 = vpop.xlane.xlu1 %669  ;;  %v673_v45 = vpop.xlane.xlu2 %672 }
 0x126   : > { %792 = vst.msk [vmem:[%s1372_s7 + $0x18] sm:$0xff] %vm332_vm1, %v776_v62  ;;  %v714_v15 = vadd.f32 %v703_v9, %v670_v17  ;;  %v667_v28 = vpop.xlane.xlu0 %666  ;;  %v715_v42 = vadd.f32 %v704_v29, %v673_v45 }
 0x127   : > { %v713_v51 = vadd.f32 %v703_v9, %v667_v28 }
 0x128   : > { %v730_v50 = vmax.f32 %v1339_v55, %v714_v15  ;;  %v731_v6 = vmax.f32 %v1332_v33, %v715_v42  ;;  %v915_v55 = vld [vmem:[%s1197_s30 + $0x4] ss:$0 sm:$0xff] }
 0x129   : > { %v729_v35 = vmax.f32 %v1326_v23, %v713_v51 }
 0x12a   : > { %v778_v2 = vmul.f32 %v913_v7, %v730_v50  ;;  %v779_v39 = vmul.f32 %v914_v8, %v731_v6 }
 0x12b   : > { %v777_v37 = vmul.f32 %v913_v7, %v729_v35 }
 0x12c   : > { %794 = vst.msk [vmem:[%s1372_s7 + $0x28] sm:$0xff] %vm332_vm1, %v778_v2 }
 0x12d   : > { %793 = vst.msk [vmem:[%s1372_s7 + $0x20] sm:$0xff] %vm332_vm1, %v777_v37  ;;  %v679_v21 = vpop.xlane.xlu1 %678  ;;  %v682_v13 = vpop.xlane.xlu2 %681 }
 0x12e   : > { %795 = vst.msk [vmem:[%s1372_s7 + $0x30] sm:$0xff] %vm332_vm1, %v779_v39  ;;  %v717_v40 = vadd.f32 %v705_v48, %v679_v21  ;;  %v676_v33 = vpop.xlane.xlu0 %675  ;;  %v718_v23 = vadd.f32 %v705_v48, %v682_v13 }
 0x12f   : > { %v716_v44 = vadd.f32 %v704_v29, %v676_v33 }
 0x130   : > { %v733_v3 = vmax.f32 %v1350_v11, %v717_v40  ;;  %v734_v49 = vmax.f32 %v1343_v16, %v718_v23  ;;  %v916_v16 = vld [vmem:[%s1197_s30 + $0x5] ss:$0 sm:$0xff] }
 0x131   : > { %v732_v1 = vmax.f32 %v1334_v34, %v716_v44 }
 0x132   : > { %v781_v4 = vmul.f32 %v915_v55, %v733_v3  ;;  %v782_v19 = vmul.f32 %v915_v55, %v734_v49 }
 0x133   : > { %v780_v32 = vmul.f32 %v914_v8, %v732_v1 }
 0x134   : > { %797 = vst.msk [vmem:[%s1372_s7 + $0x40] sm:$0xff] %vm332_vm1, %v781_v4 }
 0x135   : > { %796 = vst.msk [vmem:[%s1372_s7 + $0x38] sm:$0xff] %vm332_vm1, %v780_v32  ;;  %v688_v61 = vpop.xlane.xlu1 %687  ;;  %v691_v53 = vpop.xlane.xlu2 %690 }
 0x136   : > { %798 = vst.msk [vmem:[%s1372_s7 + $0x48] sm:$0xff] %vm332_vm1, %v782_v19  ;;  %v720_v11 = vadd.f32 %v706_v22, %v688_v61  ;;  %v685_v34 = vpop.xlane.xlu0 %684  ;;  %v721_v14 = vadd.f32 %v707_v60, %v691_v53 }
 0x137   : > { %v719_v41 = vadd.f32 %v706_v22, %v685_v34 }
 0x138   : > { %v736_v5 = vmax.f32 %v1360_v36, %v720_v11  ;;  %v737_v27 = vmax.f32 %v1353_v46, %v721_v14  ;;  %v918_v36 = vld [vmem:[%s1197_s30 + $0x7] ss:$0 sm:$0xff] }
 0x139   : > { %v735_v56 = vmax.f32 %v1345_v18, %v719_v41 }
 0x13a   : > { %v784_v63 = vmul.f32 %v916_v16, %v736_v5  ;;  %v785_v26 = vmul.f32 %v917_v58, %v737_v27 }
 0x13b   : > { %v783_v57 = vmul.f32 %v916_v16, %v735_v56 }
 0x13c   : > { %800 = vst.msk [vmem:[%s1372_s7 + $0x58] sm:$0xff] %vm332_vm1, %v784_v63 }
 0x13d   : > { %799 = vst.msk [vmem:[%s1372_s7 + $0x50] sm:$0xff] %vm332_vm1, %v783_v57  ;;  %v697_v10 = vpop.xlane.xlu1 %696  ;;  %v700_v47 = vpop.xlane.xlu2 %699 }
 0x13e   : > { %801 = vst.msk [vmem:[%s1372_s7 + $0x60] sm:$0xff] %vm332_vm1, %v785_v26  ;;  %v723_v46 = vadd.f32 %v708_v52, %v697_v10  ;;  %v694_v43 = vpop.xlane.xlu0 %693  ;;  %v724_v18 = vadd.f32 %v708_v52, %v700_v47 }
 0x13f   : > { %v722_v31 = vadd.f32 %v707_v60, %v694_v43 }
 0x140   : > { %v739_v30 = vmax.f32 %v1377_v54, %v723_v46  ;;  %v740_v20 = vmax.f32 %v1365_v12, %v724_v18 }
 0x141   : > { %v738_v25 = vmax.f32 %v1355_v38, %v722_v31 }
 0x142   : > { %v787_v59 = vmul.f32 %v918_v36, %v739_v30  ;;  %v788_v24 = vmul.f32 %v918_v36, %v740_v20 }
 0x143   : > { %v786_v62 = vmul.f32 %v917_v58, %v738_v25 }
 0x144   : > { %803 = vst.msk [vmem:[%s1372_s7 + $0x70] sm:$0xff] %vm332_vm1, %v787_v59 }
 0x145   : > { %802 = vst.msk [vmem:[%s1372_s7 + $0x68] sm:$0xff] %vm332_vm1, %v786_v62 }
 0x146   : > { %804 = vst.msk [vmem:[%s1372_s7 + $0x78] sm:$0xff] %vm332_vm1, %v788_v24 }
 0x147 PF: > { %s14_s15 = sadd.s32 1, %s925_s15  }
 0x148   : > { %p11_p4 = scmp.ge.s32.totalorder %s14_s15, 6  }
 0x14a   :  { %13 = sbr.rel (!%p11_p4) target bundleno = 1 (0x1), region = 72 }

// kernel: swin_transformer_layer_l.5
= control target key start
LH: loop header
LB: loop body
LE: loop exit
PB: predicated region body
PF: predicated region fallthrough
CT: control target
= control target key end

     0   :  { %s1899_s30 = smov 0   ;;  %s2852_s0 = inlined_call_operand.vmem [shape: f32[8,6,18,4], index: 0, kind: input, shape index: {}]   ;;  %s2853_s1 = inlined_call_operand.vmem [shape: f32[8,6,18,4], index: 1, kind: input, shape index: {}]   ;;  %s2854_s2 = inlined_call_operand.vmem [shape: f32[4,4], index: 2, kind: input, shape index: {}]   ;;  %s2855_s3 = inlined_call_operand.vmem [shape: f32[1,4], index: 3, kind: input, shape index: {}]   ;;  %s2856_s4 = inlined_call_operand.vmem [shape: f32[4,16], index: 4, kind: input, shape index: {}]   ;;  %s2857_s5 = inlined_call_operand.vmem [shape: f32[1,16], index: 5, kind: input, shape index: {}]   ;;  %s2858_s6 = inlined_call_operand.vmem [shape: f32[9,16], index: 6, kind: input, shape index: {}]   ;;  %s2859_s7 = inlined_call_operand.vmem [shape: f32[1,16], index: 7, kind: input, shape index: {}]   ;;  %s2860_s8 = inlined_call_operand.vmem [shape: f32[16,4], index: 8, kind: input, shape index: {}]   ;;  %s2861_s9 = inlined_call_operand.vmem [shape: f32[8,4,16,4], index: 9, kind: output, shape index: {}]  }
   0x1 LB: > { %s1905_s10 = sadd.s32 4294967295, %s1846_s30   ;;  %p1704_p0 = scmp.ge.s32.totalorder %s1846_s30, 1  ;;  %s1846_s30 = sphi %s1899_s30, %s19_s30  }
   0x2   : > { %p297_p1 = scmp.lt.s32.totalorder %s1846_s30, 9 }
   0x4   : > { %p298_p2 = pnand %p1704_p0, %p297_p1 }
   0x6   : > { %301 = sbr.rel (%p298_p2) target bundleno = 523 (0x20b), region = 56 }
   0xb   : > { %v365_v0 = vld [vmem:[%s2854_s2] sm:$0xf]  ;;  %vm403_vm0 = vcmask 1043456   ;;  %p338_p3 = scmp.lt.s32.totalorder %s1905_s10, 7  ;;  %vm2862_vm1 = vcmask 31744   ;;  %vm1057_vm2 = vcmask 1046528  }
   0xc   : > { %1712 = vmatpush.msk.msra.mxu0 %vm403_vm0, %v365_v0  ;;  %1730 = vmatpush.msk.msra.mxu2 %vm403_vm0, %v365_v0  ;;  %v367_v19 = vld [vmem:[%s2856_s4] sm:$0xf]  ;;  %s354_s25 = ssub.s32 0, %s1905_s10  ;;  %p353_p4 = scmp.lt.s32.totalorder %s1905_s10, 0 }
   0xd   : > { %s1916_s13 = scalar_select %p338_p3, %s1905_s10, 7  ;;  %1720 = vmatpush.msk.msra.mxu1 %vm403_vm0, %v367_v19  ;;  %1737 = vmatpush.msk.msra.mxu3 %vm403_vm0, %v367_v19  ;;  %v1984_v21 = vld [vmem:[%s2855_s3] ss:$0 sm:$0xff] }
   0xe   : > { %1764 = vmatpush.msk.msrb.mxu2 %vm403_vm0, %v365_v0  ;;  %1747 = vmatpush.msk.msrb.mxu0 %vm403_vm0, %v365_v0  ;;  %s1709_s26 = smin.u32 %s1905_s10, %s354_s25 }
   0xf   : > { %s1826_s14 = smul.u32 144, %s1916_s13  ;;  %1754 = vmatpush.msk.msrb.mxu1 %vm403_vm0, %v367_v19  ;;  %1771 = vmatpush.msk.msrb.mxu3 %vm403_vm0, %v367_v19  ;;  %s356_s27 = sand.u32 3, %s1709_s26  }
  0x10   : > { %s357_s28 = ssub.s32 0, %s356_s27 }
  0x11   : > { %s1926_s17 = scalar_lea.vmem %s2853_s1, %s1826_s14  ;;  %s1978_s22 = scalar_lea.vmem %s2852_s0, %s1826_s14 }
  0x12   : > { %v390_v1 = vld [vmem:[%s1926_s17] sm:$0xff]  ;;  %v1727_v2 = vld [vmem:[%s1926_s17 + $0x18] sm:$0xff]  ;;  %v391_v3 = vld [vmem:[%s1926_s17 + $0x8] sm:$0xff]  ;;  %s2948_s28 = smov (!%p353_p4, %s357_s28), %s356_s27 }
  0x13   : > { %1713 = vmatmul.msk.f32.vlgmr.msra.gmra.mxu0 %vm2862_vm1, %v390_v1  ;;  %1731 = vmatmul.msk.f32.vlgmr.msra.gmra.mxu2 %vm2862_vm1, %v1727_v2  ;;  %v1728_v4 = vld [vmem:[%s1926_s17 + $0x20] sm:$0xff]  ;;  %v392_v5 = vld [vmem:[%s1926_s17 + $0x10] sm:$0x3]  ;;  %v1729_v6 = vld [vmem:[%s1926_s17 + $0x28] sm:$0x3]  ;;  %p1711_p5 = scmp.lt.s32.totalorder %s2948_s28, 0 }
  0x14   : > { %1798 = vmatpush.msk.msra.mxu2 %vm403_vm0, %v365_v0  ;;  %1781 = vmatpush.msk.msra.mxu0 %vm403_vm0, %v365_v0  ;;  %v1744_v7 = vld [vmem:[%s1926_s17 + $0x30] sm:$0xff]  ;;  %v1761_v8 = vld [vmem:[%s1926_s17 + $0x48] sm:$0xff]  ;;  %v1745_v9 = vld [vmem:[%s1926_s17 + $0x38] sm:$0xff]  ;;  %s363_s29 = sadd.s32 4, %s2948_s28 }
  0x15   : > { %v1762_v10 = vld [vmem:[%s1926_s17 + $0x50] sm:$0xff]  ;;  %v1746_v11 = vld [vmem:[%s1926_s17 + $0x40] sm:$0x3]  ;;  %v1763_v12 = vld [vmem:[%s1926_s17 + $0x58] sm:$0x3]  ;;  %s2950_s29 = smov (!%p1711_p5, %s363_s29), %s2948_s28 }
  0x16   : > { %v1778_v13 = vld [vmem:[%s1926_s17 + $0x60] sm:$0xff]  ;;  %v1795_v14 = vld [vmem:[%s1926_s17 + $0x78] sm:$0xff]  ;;  %v1779_v15 = vld [vmem:[%s1926_s17 + $0x68] sm:$0xff]  ;;  %s2068_s11 = sshll.u32 %s2950_s29, 2 }
  0x17   : > { %v1796_v16 = vld [vmem:[%s1926_s17 + $0x80] sm:$0xff]  ;;  %v1780_v17 = vld [vmem:[%s1926_s17 + $0x70] sm:$0x3]  ;;  %v1797_v18 = vld [vmem:[%s1926_s17 + $0x88] sm:$0x3]  ;;  %p443_p6 = scmp.ge.s32.totalorder %s2068_s11, 1 }
  0x18   : > { %v387_v20 = vld [vmem:[%s1978_s22] sm:$0xff]  ;;  %v1724_v25 = vld [vmem:[%s1978_s22 + $0x18] sm:$0xff]  ;;  %v388_v27 = vld [vmem:[%s1978_s22 + $0x8] sm:$0xff]  ;;  %p450_p7 = scmp.le.s32.totalorder %s2068_s11, 16  ;;  %s556_s12 = sadd.s32 1, %s2068_s11 }
  0x19   : > { %v1725_v33 = vld [vmem:[%s1978_s22 + $0x20] sm:$0xff]  ;;  %v389_v35 = vld [vmem:[%s1978_s22 + $0x10] sm:$0x3]  ;;  %v1726_v41 = vld [vmem:[%s1978_s22 + $0x28] sm:$0x3]  ;;  %p557_p8 = scmp.ge.s32.totalorder %s556_s12, 1 }
  0x1a   : > { %v1741_v43 = vld [vmem:[%s1978_s22 + $0x30] sm:$0xff]  ;;  %v1758_v49 = vld [vmem:[%s1978_s22 + $0x48] sm:$0xff]  ;;  %v1742_v51 = vld [vmem:[%s1978_s22 + $0x38] sm:$0xff]  ;;  %s444_s14 = scalar_select %p443_p6, 1, 0 }
  0x1b   : > { %1714 = vmatmul.msk.f32.gmra.mxu0 %vm2862_vm1, %v391_v3  ;;  %1732 = vmatmul.msk.f32.gmra.mxu2 %vm2862_vm1, %v1728_v4  ;;  %v1759_v60 = vld [vmem:[%s1978_s22 + $0x50] sm:$0xff]  ;;  %v1743_v62 = vld [vmem:[%s1978_s22 + $0x40] sm:$0x3]  ;;  %s451_s15 = scalar_select %p450_p7, 1, 0 }
  0x1c   : > { %p2075_p9 = scmp.le.s32.totalorder %s556_s12, 16  ;;  %s664_s16 = sadd.s32 2, %s2068_s11 }
  0x1d   : > { %s558_s17 = scalar_select %p557_p8, 1, 0 }
  0x1e   : > { %p2080_p10 = scmp.ge.s32.totalorder %s664_s16, 1  ;;  %s772_s20 = sadd.s32 3, %s2068_s11 }
  0x1f   : > { %s565_s19 = scalar_select %p2075_p9, 1, 0 }
  0x20   : > { %p2095_p11 = scmp.le.s32.totalorder %s664_s16, 16  ;;  %p2118_p12 = scmp.ge.s32.totalorder %s772_s20, 1 }
  0x21   : > { %p2129_p13 = scmp.le.s32.totalorder %s772_s20, 16  ;;  %s988_s23 = sadd.s32 5, %s2068_s11 }
  0x22   : > { %s673_s26 = scalar_select %p2095_p11, 1, 0 }
  0x23   : > { %1715 = vmatmul.msk.f32.gmra.mxu0 %vm2862_vm1, %v392_v5  ;;  %1733 = vmatmul.msk.f32.gmra.mxu2 %vm2862_vm1, %v1729_v6  ;;  %v1760_v5 = vld [vmem:[%s1978_s22 + $0x58] sm:$0x3]  ;;  %s774_s28 = scalar_select %p2118_p12, 1, 0 }
  0x24   : > { %p2390_p2 = scmp.ge.s32.totalorder %s988_s23, 1  ;;  %p2428_p3 = scmp.le.s32.totalorder %s988_s23, 16 }
  0x26   : > { %s990_s25 = scalar_select %p2390_p2, 1, 0 }
  0x2b   : > { %1748 = vmatmul.msk.f32.vlgmr.msrb.gmra.mxu0 %vm2862_vm1, %v1744_v7  ;;  %1765 = vmatmul.msk.f32.vlgmr.msrb.gmra.mxu2 %vm2862_vm1, %v1761_v8  ;;  %v1775_v8 = vld [vmem:[%s1978_s22 + $0x60] sm:$0xff] }
  0x33   : > { %1749 = vmatmul.msk.f32.gmra.mxu0 %vm2862_vm1, %v1745_v9  ;;  %1766 = vmatmul.msk.f32.gmra.mxu2 %vm2862_vm1, %v1762_v10 }
  0x3b   : > { %1750 = vmatmul.msk.f32.gmra.mxu0 %vm2862_vm1, %v1746_v11  ;;  %1767 = vmatmul.msk.f32.gmra.mxu2 %vm2862_vm1, %v1763_v12 }
  0x43   : > { %1782 = vmatmul.msk.f32.vlgmr.msra.gmra.mxu0 %vm2862_vm1, %v1778_v13  ;;  %1799 = vmatmul.msk.f32.vlgmr.msra.gmra.mxu2 %vm2862_vm1, %v1795_v14 }
  0x4b   : > { %1783 = vmatmul.msk.f32.gmra.mxu0 %vm2862_vm1, %v1779_v15  ;;  %1800 = vmatmul.msk.f32.gmra.mxu2 %vm2862_vm1, %v1796_v16  ;;  %v1792_v16 = vld [vmem:[%s1978_s22 + $0x78] sm:$0xff] }
  0x53   : > { %1784 = vmatmul.msk.f32.gmra.mxu0 %vm2862_vm1, %v1780_v17  ;;  %1801 = vmatmul.msk.f32.gmra.mxu2 %vm2862_vm1, %v1797_v18 }
  0x90   : > { %v424_v22 = vpop.f32.mrf.mxu0 }
  0x91   : > { %v433_v23 = vadd.f32 %v424_v22, %v387_v20 }
  0x93   : > { %v439_v24 = vadd.f32 %v1984_v21, %v433_v23 }
  0x95   : > { %1721 = vmatmul.msk.f32.vlgmr.msra.gmra.mxu1 %vm2862_vm1, %v439_v24 }
  0x96   : > { %v541_v26 = vpop.f32.mrf.mxu2  ;;  %1788 = vmatpush.msk.msra.mxu1 %vm403_vm0, %v367_v19 }
  0x97   : > { %v550_v28 = vadd.f32 %v1724_v25, %v541_v26 }
  0x98   : > { %v427_v29 = vpop.f32.mrf.mxu0 }
  0x99   : > { %v553_v30 = vadd.f32 %v1984_v21, %v550_v28  ;;  %v434_v31 = vadd.f32 %v427_v29, %v388_v27 }
  0x9b   : > { %v440_v32 = vadd.f32 %v1984_v21, %v434_v31  ;;  %1738 = vmatmul.msk.f32.vlgmr.msra.gmra.mxu3 %vm2862_vm1, %v553_v30  ;;  %v1165_v55 = vrot.slane %v553_v30, 1  ;;  %v1793_v30 = vld [vmem:[%s1978_s22 + $0x80] sm:$0xff] }
  0x9c   : > { %1805 = vmatpush.msk.msra.mxu3 %vm403_vm0, %v367_v19  ;;  %v1776_v19 = vld [vmem:[%s1978_s22 + $0x68] sm:$0xff] }
  0x9d   : > { %1722 = vmatmul.msk.f32.gmra.mxu1 %vm2862_vm1, %v440_v32 }
  0x9e   : > { %v544_v34 = vpop.f32.mrf.mxu2 }
  0x9f   : > { %v551_v36 = vadd.f32 %v1725_v33, %v544_v34  ;;  %v1777_v33 = vld [vmem:[%s1978_s22 + $0x70] sm:$0x3] }
  0xa0   : > { %v430_v37 = vpop.f32.mrf.mxu0 }
  0xa1   : > { %v554_v38 = vadd.f32 %v1984_v21, %v551_v36  ;;  %v435_v39 = vadd.f32 %v430_v37, %v389_v35 }
  0xa3   : > { %v441_v40 = vadd.f32 %v1984_v21, %v435_v39  ;;  %1739 = vmatmul.msk.f32.gmra.mxu3 %vm2862_vm1, %v554_v38  ;;  %v1166_v52 = vrot.slane %v554_v38, 1 }
  0xa5   : > { %1723 = vmatmul.msk.f32.gmra.mxu1 %vm2862_vm1, %v441_v40  ;;  %v2014_v59 = vsel %vm1057_vm2, %v1165_v55, %v1166_v52 }
  0xa6   : > { %v547_v42 = vpop.f32.mrf.mxu2 }
  0xa7   : > { %v552_v44 = vadd.f32 %v1726_v41, %v547_v42  ;;  %v1794_v41 = vld [vmem:[%s1978_s22 + $0x88] sm:$0x3]  ;;  %s666_s22 = scalar_select %p2080_p10, 1, 0 }
  0xa8   : > { %v649_v45 = vpop.f32.mrf.mxu0 }
  0xa9   : > { %v555_v46 = vadd.f32 %v1984_v21, %v552_v44  ;;  %v658_v47 = vadd.f32 %v1741_v43, %v649_v45 }
  0xab   : > { %v661_v48 = vadd.f32 %v1984_v21, %v658_v47  ;;  %1740 = vmatmul.msk.f32.gmra.mxu3 %vm2862_vm1, %v555_v46  ;;  %v1168_v0 = vrot.slane %v555_v46, 1 }
  0xad   : > { %1755 = vmatmul.msk.f32.vlgmr.msrb.gmra.mxu1 %vm2862_vm1, %v661_v48  ;;  %v2024_v6 = vsel %vm1057_vm2, %v1166_v52, %v1168_v0  ;;  %v1308_v14 = vrot.slane %v661_v48, 1  ;;  %v2142_v0 = vld [vmem:[%s2858_s6] sm:$0xff] }
  0xae   : > { %v757_v50 = vpop.f32.mrf.mxu2 }
  0xaf   : > { %v766_v53 = vadd.f32 %v1758_v49, %v757_v50 }
  0xb0   : > { %v652_v54 = vpop.f32.mrf.mxu0 }
  0xb1   : > { %v769_v56 = vadd.f32 %v1984_v21, %v766_v53  ;;  %v659_v57 = vadd.f32 %v1742_v51, %v652_v54  ;;  %v445_v51 = vstv %s444_s14  ;;  %v452_v53 = vstv %s451_s15  ;;  %s781_s14 = scalar_select %p2129_p13, 1, 0 }
  0xb2   : > { %vm2085_vm4 = vcmp.eq.s32.totalorder %v445_v51, 1  ;;  %v559_v54 = vstv %s558_s17  ;;  %vm2107_vm6 = vcmp.eq.s32.totalorder %v452_v53, 1  ;;  %s880_s15 = sadd.s32 4, %s2068_s11 }
  0xb3   : > { %v662_v58 = vadd.f32 %v1984_v21, %v659_v57  ;;  %1772 = vmatmul.msk.f32.vlgmr.msrb.gmra.mxu3 %vm2862_vm1, %v769_v56  ;;  %v1451_v24 = vrot.slane %v769_v56, 1  ;;  %vm560_vm7 = vcmp.eq.s32.totalorder %v559_v54, 1  ;;  %vm455_vm13 = vmand %vm2085_vm4, %vm2107_vm6  ;;  %p2191_p0 = scmp.ge.s32.totalorder %s880_s15, 1  ;;  %p2228_p1 = scmp.le.s32.totalorder %s880_s15, 16  ;;  %v372_v57 = vld [vmem:[%s2860_s8] sm:$0xff] }
  0xb4   : > { %s997_s11 = scalar_select %p2428_p3, 1, 0 }
  0xb5   : > { %1756 = vmatmul.msk.f32.gmra.mxu1 %vm2862_vm1, %v662_v58  ;;  %v1309_v11 = vrot.slane %v662_v58, 1  ;;  %v2116_v58 = vld [vmem:[%s2857_s5] ss:$0 sm:$0xff]  ;;  %s882_s17 = scalar_select %p2191_p0, 1, 0 }
  0xb6   : > { %v760_v61 = vpop.f32.mrf.mxu2  ;;  %s889_s20 = scalar_select %p2228_p1, 1, 0 }
  0xb7   : > { %v767_v63 = vadd.f32 %v1759_v60, %v760_v61  ;;  %v2034_v17 = vsel %vm1057_vm2, %v1308_v14, %v1309_v11  ;;  %v566_v61 = vstv %s565_s19  ;;  %v2189_v14 = vstv %s781_s14  ;;  %s1825_s14 = sshll.u32 %s1916_s13, 6 }
  0xb8   : > { %v655_v1 = vpop.f32.mrf.mxu0  ;;  %vm567_vm11 = vcmp.eq.s32.totalorder %v566_v61, 1  ;;  %v2308_v56 = vstv %s882_s17  ;;  %s352_s16 = scalar_lea.vmem %s2861_s9, %s1825_s14 }
  0xb9   : > { %v770_v2 = vadd.f32 %v1984_v21, %v767_v63  ;;  %v660_v3 = vadd.f32 %v1743_v62, %v655_v1  ;;  %v667_v62 = vstv %s666_s22  ;;  %v2865_v1 = vmov 0.0  }
  0xba   : > { %vm668_vm14 = vcmp.eq.s32.totalorder %v667_v62, 1 }
  0xbb   : > { %v663_v4 = vadd.f32 %v1984_v21, %v660_v3  ;;  %1773 = vmatmul.msk.f32.gmra.mxu3 %vm2862_vm1, %v770_v2  ;;  %v1452_v20 = vrot.slane %v770_v2, 1 }
  0xbd   : > { %1757 = vmatmul.msk.f32.gmra.mxu1 %vm2862_vm1, %v663_v4  ;;  %v1311_v25 = vrot.slane %v663_v4, 1  ;;  %v2041_v29 = vsel %vm1057_vm2, %v1451_v24, %v1452_v20  ;;  %v674_v4 = vstv %s673_s26 }
  0xbe   : > { %v763_v7 = vpop.f32.mrf.mxu2  ;;  %2872 = vst [vmem:[#allocation2_spill] sm:$0xff] %v2041_v29 }
  0xbf   : > { %v768_v9 = vadd.f32 %v1760_v5, %v763_v7  ;;  %v2046_v31 = vsel %vm1057_vm2, %v1309_v11, %v1311_v25 }
  0xc0   : > { %v865_v10 = vpop.f32.mrf.mxu0  ;;  %2873 = vst [vmem:[#allocation3_spill] sm:$0xff] %v2046_v31 }
  0xc1   : > { %v771_v12 = vadd.f32 %v1984_v21, %v768_v9  ;;  %v874_v13 = vadd.f32 %v1775_v8, %v865_v10  ;;  %v2165_v8 = vperm.slane %v2142_v0, 1  ;;  %v2171_v9 = vstv %s774_s28 }
  0xc2   : > { %v1718_v10 = vsel %vm455_vm13, 1.0, %v2865_v1  ;;  %vm776_vm13 = vcmp.eq.s32.totalorder %v2171_v9, 1 }
  0xc3   : > { %v877_v15 = vadd.f32 %v1984_v21, %v874_v13  ;;  %1774 = vmatmul.msk.f32.gmra.mxu3 %vm2862_vm1, %v771_v12  ;;  %v1454_v34 = vrot.slane %v771_v12, 1  ;;  %v2344_v13 = vstv %s889_s20 }
  0xc5   : > { %1789 = vmatmul.msk.f32.vlgmr.msra.gmra.mxu1 %vm2862_vm1, %v877_v15  ;;  %v2053_v40 = vsel %vm1057_vm2, %v1452_v20, %v1454_v34  ;;  %v1594_v46 = vrot.slane %v877_v15, 1  ;;  %v2205_v20 = vperm.slane %v2142_v0, 0 }
  0xc6   : > { %v973_v18 = vpop.f32.mrf.mxu2  ;;  %2874 = vst [vmem:[#allocation4_spill] sm:$0xff] %v2053_v40 }
  0xc7   : > { %v982_v22 = vadd.f32 %v1792_v16, %v973_v18  ;;  %v2197_v16 = vperm.slane %v2142_v0, 2 }
  0xc8   : > { %v868_v23 = vpop.f32.mrf.mxu0 }
  0xc9   : > { %v985_v26 = vadd.f32 %v1984_v21, %v982_v22  ;;  %v875_v27 = vadd.f32 %v1776_v19, %v868_v23 }
  0xcb   : > { %v878_v28 = vadd.f32 %v1984_v21, %v875_v27  ;;  %1806 = vmatmul.msk.f32.vlgmr.msra.gmra.mxu3 %vm2862_vm1, %v985_v26 }
  0xcd   : > { %1790 = vmatmul.msk.f32.gmra.mxu1 %vm2862_vm1, %v878_v28  ;;  %v1595_v44 = vrot.slane %v878_v28, 1  ;;  %v2233_v28 = vperm.slane %v2142_v0, 4 }
  0xce   : > { %v976_v32 = vpop.f32.mrf.mxu2 }
  0xcf   : > { %v983_v35 = vadd.f32 %v1793_v30, %v976_v32  ;;  %v2060_v47 = vsel %vm1057_vm2, %v1594_v46, %v1595_v44  ;;  %v2236_v30 = vperm.slane %v2142_v0, 5 }
  0xd0   : > { %v871_v36 = vpop.f32.mrf.mxu0  ;;  %2875 = vst [vmem:[#allocation5_spill] sm:$0xff] %v2060_v47 }
  0xd1   : > { %v986_v37 = vadd.f32 %v1984_v21, %v983_v35  ;;  %v876_v38 = vadd.f32 %v1777_v33, %v871_v36  ;;  %v2252_v36 = vperm.slane %v2142_v0, 7 }
  0xd3   : > { %v879_v39 = vadd.f32 %v1984_v21, %v876_v38  ;;  %1807 = vmatmul.msk.f32.gmra.mxu3 %vm2862_vm1, %v986_v37 }
  0xd5   : > { %1791 = vmatmul.msk.f32.gmra.mxu1 %vm2862_vm1, %v879_v39  ;;  %v1597_v48 = vrot.slane %v879_v39, 1  ;;  %v373_v39 = vld [vmem:[%s2860_s8 + $0x8] sm:$0xff] }
  0xd6   : > { %v979_v42 = vpop.f32.mrf.mxu2  ;;  %1193 = vmatpush.msrb.mxu0 %v373_v39  ;;  %1335 = vmatpush.msrb.mxu1 %v373_v39 }
  0xd7   : > { %v984_v43 = vadd.f32 %v1794_v41, %v979_v42  ;;  %v2063_v49 = vsel %vm1057_vm2, %v1595_v44, %v1597_v48  ;;  %v2265_v42 = vperm.slane %v2142_v0, 3  ;;  %1478 = vmatpush.msrb.mxu2 %v373_v39  ;;  %1621 = vmatpush.msrb.mxu3 %v373_v39  ;;  %v2439_v39 = vld [vmem:[%s2858_s6 + $0x8] ss:$0 sm:$0xff] }
  0xd8   : > { %2876 = vst [vmem:[#allocation6_spill] sm:$0xff] %v2063_v49  ;;  %1194 = vmatpush.msrb.mxu0 %v372_v57  ;;  %1336 = vmatpush.msrb.mxu1 %v372_v57 }
  0xd9   : > { %v987_v45 = vadd.f32 %v1984_v21, %v984_v43  ;;  %v374_v21 = vlaneseq  ;;  %1479 = vmatpush.msrb.mxu2 %v372_v57  ;;  %1622 = vmatpush.msrb.mxu3 %v372_v57 }
  0xdb   : > { %1808 = vmatmul.msk.f32.gmra.mxu3 %vm2862_vm1, %v987_v45  ;;  %v2073_v50 = vshrl.u32 %v374_v21, 7 }
  0xdd   : > { %vm378_vm3 = vcmp.ge.s32.totalorder %v2073_v50, 1  ;;  %v2093_v55 = vadd.s32 16, %v2073_v50 }
  0xde   : > { %vm2103_vm5 = vmand %vm378_vm3, %vm2085_vm4 }
  0xdf   : > { %vm454_vm8 = vmand %vm2103_vm5, %vm2107_vm6  ;;  %vm2863_vm9 = vcmp.le.s32.totalorder %v2093_v55, 16  ;;  %vm675_vm5 = vcmp.eq.s32.totalorder %v674_v4, 1 }
  0xe0   : > { %vm561_vm10 = vmand %vm378_vm3, %vm560_vm7  ;;  %v1717_v2 = vsel %vm454_vm8, 1.0, %v2865_v1 }
  0xe1   : > { %vm2149_vm12 = vmand %vm2863_vm9, %vm2085_vm4 }
  0xe2   : > { %vm2158_vm15 = vmand %vm561_vm10, %vm567_vm11 }
  0xe3   : > { %vm456_vm0 = vmand %vm2149_vm12, %vm2107_vm6  ;;  %v1734_v25 = vsel %vm2158_vm15, 1.0, %v2865_v1  ;;  %vm884_vm12 = vcmp.eq.s32.totalorder %v2308_v56, 1 }
  0xe4   : > { %vm669_vm4 = vmand %vm378_vm3, %vm668_vm14  ;;  %v1719_v43 = vsel %vm456_vm0, 1.0, %v2865_v1 }
  0xe5   : > { %vm563_vm8 = vmand %vm2863_vm9, %vm560_vm7 }
  0xe6   : > { %vm2184_vm10 = vmand %vm560_vm7, %vm567_vm11 }
  0xe7   : > { %vm2200_vm7 = vmand %vm669_vm4, %vm675_vm5  ;;  %v1735_v21 = vsel %vm2184_vm10, 1.0, %v2865_v1  ;;  %vm2914_vm10 = vcmp.le.s32.totalorder %v2093_v55, 16 }
  0xe8   : > { %vm2208_vm1 = vmand %vm563_vm8, %vm567_vm11  ;;  %vm783_vm11 = vcmp.eq.s32.totalorder %v2189_v14, 1  ;;  %v2291_v51 = vsel %vm2200_vm7, 1.0, %v2865_v1 }
  0xe9   : > { %vm2223_vm4 = vmand %vm378_vm3, %vm776_vm13  ;;  %v2306_v54 = vsel %vm2208_vm1, 1.0, %v2865_v1 }
  0xea   : > { %vm2244_vm15 = vmand %vm2863_vm9, %vm668_vm14  ;;  %vm1074_vm9 = vcmask 1045504  }
  0xeb   : > { %vm2257_vm8 = vmand %vm668_vm14, %vm675_vm5 }
  0xec   : > { %vm2277_vm14 = vmand %vm2223_vm4, %vm783_vm11 }
  0xed   : > { %vm2296_vm6 = vmand %vm2244_vm15, %vm675_vm5  ;;  %vm891_vm5 = vcmp.eq.s32.totalorder %v2344_v13, 1 }
  0xee   : > { %vm2326_vm1 = vmand %vm776_vm13, %vm783_vm11 }
  0xef   : > { %vm2365_vm0 = vmand %vm378_vm3, %vm884_vm12 }
  0xf0   : > { %vm2379_vm7 = vmand %vm2914_vm10, %vm776_vm13 }
  0xf1   : > { %vm892_vm13 = vmand %vm2365_vm0, %vm891_vm5 }
  0xf2   : > { %vm786_vm4 = vmand %vm2379_vm7, %vm783_vm11 }
  0xf3   : > { %vm2477_vm15 = vmand %vm884_vm12, %vm891_vm5 }
 0x112   : > { %v495_v60 = vpop.f32.mrf.mxu1 }
 0x113   : > { %v496_v63 = vadd.f32 %v2116_v58, %v495_v60  ;;  %v2314_v60 = vperm.slane %v2142_v0, 6 }
 0x115   : > { %v504_v7 = vmul.f32 %v1717_v2, %v496_v63  ;;  %v2320_v2 = vsel %vm2257_vm8, 1.0, %v2865_v1  ;;  %vm1172_vm8 = vcmask 130048  }
 0x117   : > { %v1051_v15 = vmul.f32 %v2165_v8, %v504_v7  ;;  %v1068_v35 = vmul.f32 %v2197_v16, %v504_v7  ;;  %v1048_v46 = vmul.f32 %v2205_v20, %v504_v7  ;;  %v2335_v7 = vsel %vm2277_vm14, 1.0, %v2865_v1 }
 0x119   : > { %v1058_v34 = vrot.slane %v1051_v15, 1  ;;  %v1075_v61 = vrot.slane %v1068_v35, 2 }
 0x11a   : > { %v498_v11 = vpop.f32.mrf.mxu1 }
 0x11b   : > { %v499_v12 = vadd.f32 %v2116_v58, %v498_v11 }
 0x11d   : > { %v505_v18 = vmul.f32 %v1718_v10, %v499_v12  ;;  %v2340_v10 = vsel %vm2296_vm6, 1.0, %v2865_v1 }
 0x11e   : > { %v603_v22 = vpop.f32.mrf.mxu3 }
 0x11f   : > { %v2213_v24 = vmul.f32 %v2165_v8, %v505_v18  ;;  %v604_v26 = vadd.f32 %v2116_v58, %v603_v22  ;;  %v2239_v32 = vmul.f32 %v2197_v16, %v505_v18  ;;  %v1049_v0 = vmul.f32 %v2205_v20, %v505_v18 }
 0x120   : > { %v2354_v22 = vsel %vm2326_vm1, 1.0, %v2865_v1  ;;  %vm2921_vm1 = vmmov %vm2914_vm10 }
 0x121   : > { %v1059_v37 = vrot.slane %v2213_v24, 1  ;;  %v612_v41 = vmul.f32 %v1734_v25, %v604_v26  ;;  %v1076_v53 = vrot.slane %v2239_v32, 2  ;;  %vm887_vm0 = vmand %vm2921_vm1, %vm884_vm12 }
 0x122   : > { %v501_v44 = vpop.f32.mrf.mxu1  ;;  %vm894_vm12 = vmand %vm887_vm0, %vm891_vm5 }
 0x123   : > { %v1060_v48 = vsel %vm1057_vm2, %v1058_v34, %v1059_v37  ;;  %v502_v63 = vadd.f32 %v2116_v58, %v501_v44  ;;  %v1090_v4 = vmul.f32 %v2233_v28, %v612_v41  ;;  %v1077_v15 = vsel %vm1074_vm9, %v1075_v61, %v1076_v53  ;;  %vm2931_vm5 = vmmov %vm2921_vm1 }
 0x124   : > { %v1065_v62 = vadd.f32 %v1060_v48, %v1048_v46  ;;  %v1085_v18 = vmul.f32 %v2265_v42, %v612_v41  ;;  %v1206_v19 = vmul.f32 %v2165_v8, %v612_v41  ;;  %v1106_v34 = vmul.f32 %v2236_v30, %v612_v41 }
 0x125   : > { %v506_v11 = vmul.f32 %v1719_v43, %v502_v63  ;;  %v1096_v33 = vrot.slane %v1090_v4, 1  ;;  %v1204_v35 = vmul.f32 %v2205_v20, %v612_v41  ;;  %v1221_v43 = vmul.f32 %v2197_v16, %v612_v41 }
 0x126   : > { %v606_v5 = vpop.f32.mrf.mxu3  ;;  %v1082_v23 = vadd.f32 %v1077_v15, %v1065_v62  ;;  %v1112_v24 = vrot.slane %v1106_v34, 2  ;;  %v2424_v34 = vsel %vm786_vm4, 1.0, %v2865_v1 }
 0x127   : > { %v607_v12 = vadd.f32 %v2116_v58, %v606_v5  ;;  %v1053_v25 = vmul.f32 %v2165_v8, %v506_v11  ;;  %v1070_v26 = vmul.f32 %v2197_v16, %v506_v11 }
 0x128   : > { %v1087_v9 = vadd.f32 %v1085_v18, %v1082_v23  ;;  %v1227_v18 = vrot.slane %v1221_v43, 2  ;;  %v2414_v23 = vsel %vm892_vm13, 1.0, %v2865_v1 }
 0x129   : > { %v613_v27 = vmul.f32 %v1735_v21, %v607_v12  ;;  %v1061_v44 = vrot.slane %v1053_v25, 1  ;;  %v1212_v21 = vrot.slane %v1206_v19, 1  ;;  %v1078_v62 = vrot.slane %v1070_v26, 2 }
 0x12a   : > { %v711_v38 = vpop.f32.mrf.mxu1 }
 0x12b   : > { %v1091_v45 = vmul.f32 %v2233_v28, %v613_v27  ;;  %v2373_v46 = vmul.f32 %v2236_v30, %v613_v27  ;;  %v712_v52 = vadd.f32 %v2116_v58, %v711_v38  ;;  %v1207_v57 = vmul.f32 %v2165_v8, %v613_v27 }
 0x12c   : > { %v2386_v41 = vmul.f32 %v2197_v16, %v613_v27  ;;  %v1062_v61 = vsel %vm1057_vm2, %v1059_v37, %v1061_v44  ;;  %v1079_v14 = vsel %vm1074_vm9, %v1076_v53, %v1078_v62  ;;  %v1205_v26 = vmul.f32 %v2205_v20, %v613_v27 }
 0x12d   : > { %v1097_v63 = vrot.slane %v1091_v45, 1  ;;  %v1066_v3 = vadd.f32 %v1062_v61, %v1049_v0  ;;  %v1113_v4 = vrot.slane %v2373_v46, 2  ;;  %v1213_v11 = vrot.slane %v1207_v57, 1 }
 0x12e   : > { %v609_v5 = vpop.f32.mrf.mxu3  ;;  %v1228_v12 = vrot.slane %v2386_v41, 2  ;;  %v2408_v37 = vmul.f32 %v2291_v51, %v712_v52  ;;  %v2448_v52 = vstv %s990_s25 }
 0x12f   : > { %v610_v15 = vadd.f32 %v2116_v58, %v609_v5  ;;  %v1098_v0 = vsel %vm1057_vm2, %v1096_v33, %v1097_v63  ;;  %v1214_v19 = vsel %vm1057_vm2, %v1212_v21, %v1213_v11  ;;  %v1083_v33 = vadd.f32 %v1079_v14, %v1066_v3 }
 0x130   : > { %v1103_v25 = vadd.f32 %v1098_v0, %v1087_v9  ;;  %v1219_v38 = vadd.f32 %v1214_v19, %v1204_v35  ;;  %v1229_v32 = vsel %vm1074_vm9, %v1227_v18, %v1228_v12  ;;  %v1122_v35 = vmul.f32 %v2314_v60, %v2408_v37 }
 0x131   : > { %v614_v51 = vmul.f32 %v2306_v54, %v610_v15  ;;  %v1114_v54 = vsel %vm1074_vm9, %v1112_v24, %v1113_v4  ;;  %v1086_v21 = vmul.f32 %v2265_v42, %v613_v27  ;;  %v1127_v62 = vmul.f32 %v2252_v36, %v2408_v37 }
 0x132   : > { %v714_v53 = vpop.f32.mrf.mxu1  ;;  %v1119_v48 = vadd.f32 %v1114_v54, %v1103_v25  ;;  %v1143_v15 = vmul.f32 %v2439_v39, %v2408_v37  ;;  %vm992_vm11 = vcmp.eq.s32.totalorder %v2448_v52, 1  ;;  %v2481_v54 = vstv %s997_s11 }
 0x133   : > { %v1092_v43 = vmul.f32 %v2233_v28, %v614_v51  ;;  %v1108_v44 = vmul.f32 %v2236_v30, %v614_v51  ;;  %v1208_v45 = vmul.f32 %v2165_v8, %v614_v51  ;;  %v715_v46 = vadd.f32 %v2116_v58, %v714_v53  ;;  %vm993_vm14 = vmand %vm378_vm3, %vm992_vm11 }
 0x134   : > { %v1223_v61 = vmul.f32 %v2197_v16, %v614_v51  ;;  %v1088_v27 = vadd.f32 %v1086_v21, %v1083_v33  ;;  %v1124_v25 = vadd.f32 %v1122_v35, %v1119_v48  ;;  %vm999_vm6 = vcmp.eq.s32.totalorder %v2481_v54, 1  ;;  %vm995_vm7 = vmand %vm2931_vm5, %vm992_vm11 }
 0x135   : > { %v1099_v57 = vrot.slane %v1092_v43, 1  ;;  %v1215_v9 = vrot.slane %v1208_v45, 1  ;;  %v1115_v3 = vrot.slane %v1108_v44, 2  ;;  %v2456_v5 = vmul.f32 %v2320_v2, %v715_v46  ;;  %vm1000_vm3 = vmand %vm993_vm14, %vm999_vm6 }
 0x136   : > { %v819_v24 = vpop.f32.mrf.mxu3  ;;  %v1230_v53 = vrot.slane %v1223_v61, 2  ;;  %vm1001_vm10 = vmand %vm992_vm11, %vm999_vm6 }
 0x137   : > { %v1216_v0 = vsel %vm1057_vm2, %v1213_v11, %v1215_v9  ;;  %v820_v18 = vadd.f32 %v2116_v58, %v819_v24  ;;  %v1100_v19 = vsel %vm1057_vm2, %v1097_v63, %v1099_v57  ;;  %v1128_v14 = vmul.f32 %v2252_v36, %v2456_v5  ;;  %vm1002_vm13 = vmand %vm995_vm7, %vm999_vm6 }
 0x138   : > { %v2468_v2 = vmul.f32 %v2439_v39, %v2456_v5  ;;  %v1104_v51 = vadd.f32 %v1100_v19, %v1088_v27  ;;  %v1133_v11 = vrot.slane %v1127_v62, 1  ;;  %v1220_v43 = vadd.f32 %v1216_v0, %v1205_v26 }
 0x139   : > { %v2471_v33 = vmul.f32 %v2335_v7, %v820_v18  ;;  %v1134_v45 = vrot.slane %v1128_v14, 1  ;;  %v1116_v7 = vsel %vm1074_vm9, %v1113_v4, %v1115_v3  ;;  %v1123_v21 = vmul.f32 %v2314_v60, %v2456_v5 }
 0x13a   : > { %v717_v44 = vpop.f32.mrf.mxu1  ;;  %v1150_v35 = vrot.slane %v2468_v2, 2  ;;  %v1120_v48 = vadd.f32 %v1116_v7, %v1104_v51  ;;  %v1234_v26 = vadd.f32 %v1229_v32, %v1219_v38  ;;  %v1149_v9 = vrot.slane %v1143_v15, 2  ;;  %v2508_v38 = vld [vmem:[%s2859_s7] ss:$0 sm:$0xff] }
 0x13b   : > { %v718_v46 = vadd.f32 %v2116_v58, %v717_v44  ;;  %v1135_v57 = vsel %vm1057_vm2, %v1133_v11, %v1134_v45  ;;  %v2497_v4 = vsel %vm2477_vm15, 1.0, %v2865_v1  ;;  %v1231_v50 = vsel %vm1074_vm9, %v1228_v12, %v1230_v53 }
 0x13c   : > { %v1140_v62 = vadd.f32 %v1135_v57, %v1124_v25  ;;  %v1492_v32 = vmul.f32 %v2165_v8, %v2471_v33  ;;  %v2514_v3 = vadd.f32 %v1231_v50, %v1220_v43  ;;  %v1151_v12 = vsel %vm1074_vm9, %v1149_v9, %v1150_v35 }
 0x13d   : > { %v2503_v61 = vmul.f32 %v2340_v10, %v718_v46  ;;  %v1490_v10 = vmul.f32 %v2205_v20, %v2471_v33  ;;  %v2521_v24 = vmul.f32 %v2233_v28, %v2456_v5  ;;  %v1125_v0 = vadd.f32 %v1123_v21, %v1120_v48 }
 0x13e   : > { %v822_v41 = vpop.f32.mrf.mxu3  ;;  %v1156_v27 = vadd.f32 %v1151_v12, %v1140_v62  ;;  %v1240_v18 = vmul.f32 %v2233_v28, %v2408_v37  ;;  %v2531_v14 = vsel %vm1000_vm3, 1.0, %v2865_v1  ;;  %v1507_v2 = vmul.f32 %v2197_v16, %v2471_v33 }
 0x13f   : > { %v823_v15 = vadd.f32 %v2116_v58, %v822_v41  ;;  %v1129_v19 = vmul.f32 %v2252_v36, %v2503_v61  ;;  %v1145_v25 = vmul.f32 %v2439_v39, %v2503_v61  ;;  %v1498_v11 = vrot.slane %v1492_v32, 1 }
 0x140   : > { %v1161_v53 = vadd.f32 %v2508_v38, %v1156_v27  ;;  %v1236_v63 = vmul.f32 %v2265_v42, %v2408_v37  ;;  %v2543_v43 = vmul.f32 %v2165_v8, %v2503_v61  ;;  %v2864_v48 = vrot.slane %v2521_v24, 1 }
 0x141   : > { %v2536_v51 = vmul.f32 %v2354_v22, %v823_v15  ;;  %v1136_v7 = vrot.slane %v1129_v19, 1  ;;  %v1152_v46 = vrot.slane %v1145_v25, 2  ;;  %v1246_v9 = vrot.slane %v1240_v18, 1 }
 0x142   : > { %v927_v44 = vpop.f32.mrf.mxu1  ;;  %v1163_v21 = vmax.f32 %v1161_v53, 0.0  ;;  %v2556_v50 = vmul.f32 %v2197_v16, %v2503_v61  ;;  %v2562_v41 = vmul.f32 %v2236_v30, %v2456_v5  ;;  %v1255_v18 = vmul.f32 %v2236_v30, %v2408_v37 }
 0x143   : > { %v2548_v22 = vmul.f32 %v2165_v8, %v2536_v51  ;;  %v2552_v57 = vmul.f32 %v2197_v16, %v2536_v51  ;;  %v928_v62 = vadd.f32 %v2116_v58, %v927_v44  ;;  %v1137_v32 = vsel %vm1057_vm2, %v1134_v45, %v1136_v7 }
 0x144   : > { %1809 = vmatmul.msk.f32.vlgmr.msrb.gmra.mxu0 %vm1172_vm8, %v1163_v21  ;;  %v1141_v12 = vadd.f32 %v1137_v32, %v1125_v0  ;;  %v1248_v27 = vsel %vm1057_vm2, %v1246_v9, %v2864_v48  ;;  %v1153_v25 = vsel %vm1074_vm9, %v1150_v35, %v1152_v46  ;;  %v1513_v45 = vrot.slane %v1507_v2, 2 }
 0x145   : > { %v2869_v15 = vrot.slane %v2548_v22, 1  ;;  %v2868_v53 = vrot.slane %v2552_v57, 2  ;;  %v1238_v44 = vadd.f32 %v1236_v63, %v1234_v26  ;;  %v2867_v32 = vrot.slane %v2562_v41, 2 }
 0x146   : > { %v825_v19 = vpop.f32.mrf.mxu3  ;;  %v1157_v21 = vadd.f32 %v1153_v25, %v1141_v12  ;;  %v2581_v1 = vmul.f32 %v2414_v23, %v928_v62  ;;  %v1261_v46 = vrot.slane %v1255_v18, 2  ;;  %v1270_v23 = vmul.f32 %v2314_v60, %v2471_v33 }
 0x147   : > { %v826_v7 = vadd.f32 %v2116_v58, %v825_v19  ;;  %v1500_v0 = vsel %vm1057_vm2, %v1498_v11, %v2869_v15  ;;  %v1253_v35 = vadd.f32 %v1248_v27, %v1238_v44  ;;  %v1515_v19 = vsel %vm1074_vm9, %v1513_v45, %v2868_v53 }
 0x148   : > { %v1162_v26 = vadd.f32 %v2508_v38, %v1157_v21  ;;  %v1505_v63 = vadd.f32 %v1500_v0, %v1490_v10  ;;  %v2589_v11 = vmul.f32 %v2252_v36, %v2581_v1  ;;  %v1526_v10 = vmul.f32 %v2233_v28, %v2581_v1 }
 0x149   : > { %v2584_v2 = vmul.f32 %v2424_v34, %v826_v7  ;;  %v1274_v34 = vmul.f32 %v2252_v36, %v2471_v33  ;;  %v1263_v18 = vsel %vm1074_vm9, %v1261_v46, %v2867_v32  ;;  %v1522_v45 = vmul.f32 %v2265_v42, %v2581_v1 }
 0x14a   : > { %v930_v12 = vpop.f32.mrf.mxu1  ;;  %v1164_v27 = vmax.f32 %v1162_v26, 0.0  ;;  %v1268_v44 = vadd.f32 %v1263_v18, %v1253_v35  ;;  %v2610_v7 = vmul.f32 %v2252_v36, %v2536_v51  ;;  %v1520_v26 = vadd.f32 %v1515_v19, %v1505_v63 }
 0x14b   : > { %v931_v62 = vadd.f32 %v2116_v58, %v930_v12  ;;  %v1494_v25 = vmul.f32 %v2165_v8, %v2584_v2  ;;  %v1509_v21 = vmul.f32 %v2197_v16, %v2584_v2  ;;  %v1541_v46 = vmul.f32 %v2236_v30, %v2581_v1 }
 0x14c   : > { %1810 = vmatmul.msk.f32.gmra.mxu0 %vm1172_vm8, %v1164_v27  ;;  %v1280_v12 = vrot.slane %v1274_v34, 1  ;;  %v2870_v18 = vrot.slane %v2610_v7, 1  ;;  %v1289_v48 = vmul.f32 %v2439_v39, %v2471_v33  ;;  %v1532_v56 = vrot.slane %v1526_v10, 1 }
 0x14d   : > { %v2615_v0 = vmul.f32 %v2497_v4, %v931_v62  ;;  %v2629_v4 = vmul.f32 %v2439_v39, %v2536_v51  ;;  %v1501_v34 = vrot.slane %v1494_v25, 1  ;;  %v1272_v27 = vadd.f32 %v1270_v23, %v1268_v44 }
 0x14e   : > { %v1035_v35 = vpop.f32.mrf.mxu3  ;;  %v1282_v9 = vsel %vm1057_vm2, %v1280_v12, %v2870_v18  ;;  %v1295_v15 = vrot.slane %v1289_v48, 2  ;;  %v1516_v23 = vrot.slane %v1509_v21, 2  ;;  %v1524_v25 = vadd.f32 %v1522_v45, %v1520_v26 }
 0x14f   : > { %v1036_v63 = vadd.f32 %v2116_v58, %v1035_v35  ;;  %v2634_v19 = vmul.f32 %v2233_v28, %v2615_v0  ;;  %v2638_v62 = vmul.f32 %v2236_v30, %v2615_v0  ;;  %v2871_v32 = vrot.slane %v2629_v4, 2 }
 0x150   : > { %v1547_v44 = vrot.slane %v1541_v46, 2  ;;  %v1287_v12 = vadd.f32 %v1282_v9, %v1272_v27  ;;  %v2655_v13 = vmul.f32 %v2252_v36, %v2615_v0  ;;  %v2924_v27 = vrot.slane %v2548_v22, 1 }
 0x151   : > { %v1044_v35 = vmul.f32 %v2531_v14, %v1036_v63  ;;  %v1533_v53 = vrot.slane %v2634_v19, 1  ;;  %v1297_v48 = vsel %vm1074_vm9, %v1295_v15, %v2871_v32  ;;  %v2922_v63 = vmov 0.0  }
 0x152   : > { %v933_v18 = vpop.f32.mrf.mxu1  ;;  %v1787_v19 = vsel %vm894_vm12, 1.0, %v2922_v63  ;;  %v1302_v40 = vadd.f32 %v1297_v48, %v1287_v12  ;;  %v1803_v45 = vsel %vm1001_vm10, 1.0, %v2922_v63  ;;  %v2923_v9 = vrot.slane %v2638_v62, 2 }
 0x153   : > { %v1534_v14 = vsel %vm1057_vm2, %v1532_v56, %v1533_v53  ;;  %v934_v21 = vadd.f32 %v2116_v58, %v933_v18  ;;  %v1560_v46 = vmul.f32 %v2252_v36, %v1044_v35  ;;  %v1491_v56 = vmul.f32 %v2205_v20, %v2536_v51 }
 0x154   : > { %v1539_v10 = vadd.f32 %v1534_v14, %v1524_v25  ;;  %v1549_v26 = vsel %vm1074_vm9, %v1547_v44, %v2923_v9  ;;  %v1502_v15 = vsel %vm1057_vm2, %v2924_v27, %v1501_v34  ;;  %v2674_v25 = vmul.f32 %v2439_v39, %v1044_v35 }
 0x155   : > { %v1304_v18 = vadd.f32 %v2508_v38, %v1302_v40  ;;  %v938_v12 = vmul.f32 %v1787_v19, %v934_v21  ;;  %v1506_v44 = vadd.f32 %v1502_v15, %v1491_v56  ;;  %v1237_v9 = vmul.f32 %v2265_v42, %v2456_v5 }
 0x156   : > { %v1554_v32 = vadd.f32 %v1549_v26, %v1539_v10  ;;  %v1038_v14 = vpop.f32.mrf.mxu3  ;;  %v1242_v49 = vmul.f32 %v2233_v28, %v2503_v61  ;;  %v1556_v22 = vmul.f32 %v2314_v60, %v1044_v35  ;;  %v2925_v10 = vrot.slane %v2552_v57, 2 }
 0x157   : > { %v1039_v48 = vadd.f32 %v2116_v58, %v1038_v14  ;;  %v1306_v34 = vmax.f32 %v1304_v18, 0.0  ;;  %v1523_v40 = vmul.f32 %v2265_v42, %v2615_v0  ;;  %v1528_v19 = vmul.f32 %v2233_v28, %v938_v12 }
 0x158   : > { %v1517_v26 = vsel %vm1074_vm9, %v2925_v10, %v1516_v23  ;;  %v1543_v21 = vmul.f32 %v2236_v30, %v938_v12  ;;  %v1423_v15 = vrot.slane %v2589_v11, 1  ;;  %v1424_v14 = vrot.slane %v2655_v13, 1 }
 0x159   : > { %v1045_v56 = vmul.f32 %v1803_v45, %v1039_v48  ;;  %v1521_v27 = vadd.f32 %v1517_v26, %v1506_v44  ;;  %v1566_v29 = vrot.slane %v1560_v46, 1  ;;  %1811 = vmatmul.msk.f32.vlgmr.msrb.gmra.mxu1 %vm1172_vm8, %v1306_v34  ;;  %v1249_v35 = vrot.slane %v1242_v49, 1 }
 0x15a   : > { %v1558_v57 = vadd.f32 %v1556_v22, %v1554_v32  ;;  %v1581_v23 = vrot.slane %v2674_v25, 2  ;;  %v1535_v18 = vrot.slane %v1528_v19, 1  ;;  %v1239_v10 = vadd.f32 %v1237_v9, %v2514_v3 }
 0x15b   : > { %v1550_v47 = vrot.slane %v1543_v21, 2  ;;  %v2696_v31 = vmul.f32 %v2252_v36, %v1045_v56  ;;  %v2926_v45 = vrot.slane %v2521_v24, 1  ;;  %v1257_v46 = vmul.f32 %v2236_v30, %v2503_v61 }
 0x15c   : > { %v2704_v44 = vmul.f32 %v2252_v36, %v938_v12  ;;  %v1525_v49 = vadd.f32 %v1523_v40, %v1521_v27  ;;  %v1536_v32 = vsel %vm1057_vm2, %v1533_v53, %v1535_v18  ;;  %v2708_v3 = vmul.f32 %v2439_v39, %v938_v12 }
 0x15d   : > { %v1250_v48 = vsel %vm1057_vm2, %v2926_v45, %v1249_v35  ;;  %v1567_v9 = vrot.slane %v2696_v31, 1  ;;  %v2712_v22 = vmul.f32 %v2439_v39, %v1045_v56  ;;  %v1264_v24 = vrot.slane %v1257_v46, 2 }
 0x15e   : > { %v1254_v25 = vadd.f32 %v1250_v48, %v1239_v10  ;;  %v1540_v34 = vadd.f32 %v1536_v32, %v1525_v49  ;;  %v2715_v26 = vmul.f32 %v2314_v60, %v1045_v56  ;;  %v1276_v61 = vmul.f32 %v2252_v36, %v2584_v2 }
 0x15f   : > { %v1291_v53 = vmul.f32 %v2439_v39, %v2584_v2  ;;  %v2927_v40 = vrot.slane %v2638_v62, 2  ;;  %v1568_v19 = vsel %vm1057_vm2, %v1566_v29, %v1567_v9  ;;  %v2928_v21 = vrot.slane %v2562_v41, 2 }
 0x160   : > { %v1349_v56 = vmul.f32 %v2165_v8, %v2408_v37  ;;  %v1271_v18 = vmul.f32 %v2314_v60, %v2536_v51  ;;  %v1283_v10 = vrot.slane %v1276_v61, 1  ;;  %v1582_v62 = vrot.slane %v2712_v22, 2 }
 0x161   : > { %v1551_v12 = vsel %vm1074_vm9, %v2927_v40, %v1550_v47  ;;  %v1265_v27 = vsel %vm1074_vm9, %v2928_v21, %v1264_v24  ;;  %v1298_v45 = vrot.slane %v1291_v53, 2  ;;  %v1347_v47 = vmul.f32 %v2205_v20, %v2408_v37 }
 0x162   : > { %v1269_v35 = vadd.f32 %v1265_v27, %v1254_v25  ;;  %v1350_v29 = vmul.f32 %v2165_v8, %v2456_v5  ;;  %v1364_v41 = vmul.f32 %v2197_v16, %v2408_v37  ;;  %v1555_v48 = vadd.f32 %v1551_v12, %v1540_v34 }
 0x163   : > { %v1573_v46 = vadd.f32 %v1568_v19, %v1558_v57  ;;  %v2929_v32 = vrot.slane %v2610_v7, 1  ;;  %v2930_v24 = vrot.slane %v2629_v4, 2  ;;  %v1355_v53 = vrot.slane %v1349_v56, 1  ;;  %v1041_v56 = vpop.f32.mrf.mxu3 }
 0x164   : > { %v1273_v49 = vadd.f32 %v1271_v18, %v1269_v35  ;;  %v1356_v40 = vrot.slane %v1350_v29, 1  ;;  %v1365_v21 = vmul.f32 %v2197_v16, %v2456_v5  ;;  %v1370_v37 = vrot.slane %v1364_v41, 2 }
 0x165   : > { %v1284_v25 = vsel %vm1057_vm2, %v2929_v32, %v1283_v10  ;;  %v1299_v61 = vsel %vm1074_vm9, %v2930_v24, %v1298_v45  ;;  %v1383_v7 = vmul.f32 %v2233_v28, %v2471_v33  ;;  %v1384_v4 = vmul.f32 %v2233_v28, %v2536_v51 }
 0x166   : > { %v1288_v8 = vadd.f32 %v1284_v25, %v1273_v49  ;;  %v1357_v57 = vsel %vm1057_vm2, %v1355_v53, %v1356_v40  ;;  %v1371_v34 = vrot.slane %v1365_v21, 2  ;;  %v1398_v12 = vmul.f32 %v2236_v30, %v2471_v33 }
 0x167   : > { %v1399_v16 = vmul.f32 %v2236_v30, %v2536_v51  ;;  %v1583_v55 = vsel %vm1074_vm9, %v1581_v23, %v1582_v62  ;;  %v1362_v19 = vadd.f32 %v1357_v57, %v1347_v47  ;;  %v1390_v27 = vrot.slane %v1384_v4, 1 }
 0x168   : > { %v1303_v52 = vadd.f32 %v1299_v61, %v1288_v8  ;;  %v1588_v35 = vadd.f32 %v1583_v55, %v1573_v46  ;;  %v1372_v18 = vsel %vm1074_vm9, %v1370_v37, %v1371_v34  ;;  %v1379_v10 = vmul.f32 %v2265_v42, %v2471_v33 }
 0x169   : > { %v1389_v45 = vrot.slane %v1383_v7, 1  ;;  %v1377_v41 = vadd.f32 %v1372_v18, %v1362_v19  ;;  %v1405_v49 = vrot.slane %v1399_v16, 2  ;;  %v1413_v23 = vmul.f32 %v2314_v60, %v2581_v1 }
 0x16a   : > { %v1305_v29 = vadd.f32 %v2508_v38, %v1303_v52  ;;  %v1404_v32 = vrot.slane %v1398_v12, 2  ;;  %v1804_v54 = vsel %vm1002_vm13, 1.0, %v2922_v63  ;;  %v1042_v46 = vadd.f32 %v2116_v58, %v1041_v56 }
 0x16b   : > { %v1391_v47 = vsel %vm1057_vm2, %v1389_v45, %v1390_v27  ;;  %v1381_v24 = vadd.f32 %v1379_v10, %v1377_v41  ;;  %v1425_v33 = vsel %vm1057_vm2, %v1423_v15, %v1424_v14  ;;  %v1348_v61 = vmul.f32 %v2205_v20, %v2456_v5 }
 0x16c   : > { %v1307_v25 = vmax.f32 %v1305_v29, 0.0  ;;  %v1432_v53 = vmul.f32 %v2439_v39, %v2581_v1  ;;  %v1433_v21 = vmul.f32 %v2439_v39, %v2615_v0  ;;  %v1046_v63 = vmul.f32 %v1804_v54, %v1042_v46 }
 0x16d   : > { %v2932_v58 = vrot.slane %v2543_v43, 1  ;;  %v1396_v37 = vadd.f32 %v1391_v47, %v1381_v24  ;;  %v1406_v11 = vsel %vm1074_vm9, %v1404_v32, %v1405_v49  ;;  %v1385_v20 = vmul.f32 %v2233_v28, %v2584_v2 }
 0x16e   : > { %1812 = vmatmul.msk.f32.gmra.mxu1 %vm1172_vm8, %v1307_v25  ;;  %v1562_v5 = vmul.f32 %v2252_v36, %v1046_v63  ;;  %v1577_v1 = vmul.f32 %v2439_v39, %v1046_v63  ;;  %v2933_v7 = vrot.slane %v2556_v50, 2  ;;  %v1400_v43 = vmul.f32 %v2236_v30, %v2584_v2  ;;  %v2939_v63 = vld [vmem:[#allocation5_spill] sm:$0xff] }
 0x16f   : > { %v1359_v8 = vsel %vm1057_vm2, %v1356_v40, %v2932_v58  ;;  %v1411_v40 = vadd.f32 %v1406_v11, %v1396_v37  ;;  %v1380_v12 = vmul.f32 %v2265_v42, %v2536_v51  ;;  %v1392_v16 = vrot.slane %v1385_v20, 1  ;;  %v2943_v11 = vld [vmem:[#allocation6_spill] sm:$0xff]  ;;  %v2945_v20 = vld [vmem:[#allocation4_spill] sm:$0xff] }
 0x170   : > { %v1363_v15 = vadd.f32 %v1359_v8, %v1348_v61  ;;  %v1374_v4 = vsel %vm1074_vm9, %v1371_v34, %v2933_v7  ;;  %v1439_v55 = vrot.slane %v1433_v21, 2  ;;  %v1569_v52 = vrot.slane %v1562_v5, 1  ;;  %v2937_v61 = vld [vmem:[#allocation3_spill] sm:$0xff]  ;;  %v2941_v8 = vld [vmem:[#allocation2_spill] sm:$0xff] }
 0x171   : > { %v1584_v28 = vrot.slane %v1577_v1, 2  ;;  %v1407_v19 = vrot.slane %v1400_v43, 2  ;;  %v1559_v36 = vadd.f32 %v2715_v26, %v1555_v48  ;;  %v1415_v39 = vadd.f32 %v1413_v23, %v1411_v40 }
 0x172   : > { %v1378_v57 = vadd.f32 %v1374_v4, %v1363_v15  ;;  %v1393_v50 = vsel %vm1057_vm2, %v1390_v27, %v1392_v16  ;;  %v1426_v34 = vrot.slane %v2704_v44, 1  ;;  %v1438_v18 = vrot.slane %v1432_v53, 2 }
 0x173   : > { %v1590_v30 = vadd.f32 %v2508_v38, %v1588_v35  ;;  %v1570_v42 = vsel %vm1057_vm2, %v1567_v9, %v1569_v52  ;;  %v1430_v51 = vadd.f32 %v1425_v33, %v1415_v39  ;;  %v1414_v10 = vmul.f32 %v2314_v60, %v2615_v0 }
 0x174   : > { %v1382_v56 = vadd.f32 %v1380_v12, %v1378_v57  ;;  %v1574_v45 = vadd.f32 %v1570_v42, %v1559_v36  ;;  %v1440_v26 = vsel %vm1074_vm9, %v1438_v18, %v1439_v55  ;;  %v1408_v48 = vsel %vm1074_vm9, %v1405_v49, %v1407_v19 }
 0x175   : > { %v1592_v27 = vmax.f32 %v1590_v30, 0.0  ;;  %v1585_v44 = vsel %vm1074_vm9, %v1582_v62, %v1584_v28  ;;  %v1445_v35 = vadd.f32 %v1440_v26, %v1430_v51  ;;  %v1441_v9 = vrot.slane %v2708_v3, 2 }
 0x176   : > { %v1397_v2 = vadd.f32 %v1393_v50, %v1382_v56  ;;  %v1589_v31 = vadd.f32 %v1585_v44, %v1574_v45  ;;  %v1427_v60 = vsel %vm1057_vm2, %v1424_v14, %v1426_v34  ;;  %vm2934_vm2 = vcmask 31744  }
 0x177   : > { %1819 = vmatmul.msk.f32.vlgmr.msrb.gmra.mxu3 %vm1172_vm8, %v1592_v27  ;;  %v1447_v0 = vadd.f32 %v2508_v38, %v1445_v35  ;;  %v1442_v62 = vsel %vm1074_vm9, %v1439_v55, %v1441_v9  ;;  %vm2935_vm9 = vmmov %vm2934_vm2 }
 0x178   : > { %v1412_v29 = vadd.f32 %v1408_v48, %v1397_v2  ;;  %v1591_v49 = vadd.f32 %v2508_v38, %v1589_v31  ;;  %vm2936_vm4 = vmmov %vm2934_vm2 }
 0x179   : > { %v1449_v22 = vmax.f32 %v1447_v0, 0.0  ;;  %vm2938_vm11 = vmmov %vm2934_vm2 }
 0x17a   : > { %v1416_v41 = vadd.f32 %v1414_v10, %v1412_v29  ;;  %v1593_v47 = vmax.f32 %v1591_v49, 0.0  ;;  %vm2940_vm15 = vmmov %vm2934_vm2 }
 0x17b   : > { %1815 = vmatmul.msk.f32.vlgmr.msrb.gmra.mxu2 %vm1172_vm8, %v1449_v22  ;;  %vm2944_vm14 = vmmov %vm2934_vm2 }
 0x17c   : > { %v1431_v23 = vadd.f32 %v1427_v60, %v1416_v41  ;;  %vm2946_vm6 = vmmov %vm2934_vm2 }
 0x17e   : > { %v1446_v3 = vadd.f32 %v1442_v62, %v1431_v23 }
 0x17f   : > { %1820 = vmatmul.msk.f32.gmra.mxu3 %vm1172_vm8, %v1593_v47 }
 0x180   : > { %v1448_v13 = vadd.f32 %v2508_v38, %v1446_v3 }
 0x182   : > { %v1450_v14 = vmax.f32 %v1448_v13, 0.0 }
 0x184   : > { %1816 = vmatmul.msk.f32.gmra.mxu2 %vm1172_vm8, %v1450_v14  ;;  %vm2942_vm8 = vmmov %vm2934_vm2 }
 0x1c1   : > { %v1196_v32 = vpop.f32.mrf.mxu0 }
 0x1c2   : > { %v1197_v54 = vadd.f32 %v1196_v32, %v2014_v59 }
 0x1c4   : > { %1202 = vst.msk [vmem:[%s352_s16] sm:$0xff] %vm2934_vm2, %v1197_v54 }
 0x1c9   : > { %v1199_v46 = vpop.f32.mrf.mxu0 }
 0x1ca   : > { %v1200_v25 = vadd.f32 %v1199_v46, %v2024_v6 }
 0x1cc   : > { %1203 = vst.msk [vmem:[%s352_s16 + $0x8] sm:$0xff] %vm2935_vm9, %v1200_v25 }
 0x1d6   : > { %v1338_v38 = vpop.f32.mrf.mxu1 }
 0x1d7   : > { %v1339_v24 = vadd.f32 %v1338_v38, %v2034_v17 }
 0x1d9   : > { %1813 = vst.msk [vmem:[%s352_s16 + $0x10] sm:$0xff] %vm2936_vm4, %v1339_v24 }
 0x1eb   : > { %v1341_v33 = vpop.f32.mrf.mxu1 }
 0x1ec   : > { %v1342_v53 = vadd.f32 %v1341_v33, %v2937_v61 }
 0x1ee   : > { %1814 = vst.msk [vmem:[%s352_s16 + $0x18] sm:$0xff] %vm2938_vm11, %v1342_v53 }
 0x1fa   : > { %v1624_v21 = vpop.f32.mrf.mxu3 }
 0x1fb   : > { %v1625_v59 = vadd.f32 %v1624_v21, %v2939_v63 }
 0x1fd   : > { %1821 = vst.msk [vmem:[%s352_s16 + $0x30] sm:$0xff] %vm2940_vm15, %v1625_v59 }
 0x1fe   : > { %v1481_v58 = vpop.f32.mrf.mxu2 }
 0x1ff   : > { %v1482_v6 = vadd.f32 %v1481_v58, %v2941_v8 }
 0x201   : > { %1817 = vst.msk [vmem:[%s352_s16 + $0x20] sm:$0xff] %vm2942_vm8, %v1482_v6 }
 0x202   : > { %v1627_v37 = vpop.f32.mrf.mxu3 }
 0x203   : > { %v1628_v17 = vadd.f32 %v1627_v37, %v2943_v11 }
 0x205   : > { %1822 = vst.msk [vmem:[%s352_s16 + $0x38] sm:$0xff] %vm2944_vm14, %v1628_v17 }
 0x207   : > { %v1484_v15 = vpop.f32.mrf.mxu2 }
 0x208   : > { %v1485_v5 = vadd.f32 %v1484_v15, %v2945_v20 }
 0x20a   : > { %1818 = vst.msk [vmem:[%s352_s16 + $0x28] sm:$0xff] %vm2946_vm6, %v1485_v5 }
 0x20b PF: > { %s19_s30 = sadd.s32 1, %s1846_s30  }
 0x20c   : > { %p16_p4 = scmp.ge.s32.totalorder %s19_s30, 10  }
 0x20e   :  { %18 = sbr.rel (!%p16_p4) target bundleno = 1 (0x1), region = 102 }

</bundles_post_ra>
